<compile_context>
chip_gen: v7x
topology: tpu7x:2x2x1
jax: 0.10.0
libtpu: 0.0.40
codegen_flags: <defaults>
</compile_context>

<pallas_src>
import functools

import numpy as np
import jax
import jax.numpy as jnp
from jax import lax
from jax.experimental import pallas as pl
from jax.experimental.pallas import tpu as pltpu


# ----------------------------------------------------------------------------
# Pallas kernel: whole DiscOptBlock for one batch element.
# ----------------------------------------------------------------------------
def _disc_opt_block_kernel(x_ref, w1_ref, b1_ref, w2_ref, b2_ref, w0_ref, b0_ref,
                           o_ref, pad_ref, col_ref, prow_ref,
                           *, H, W, CP, downsample):
    HW = H * W
    Ho, Wo = H // 2, W // 2

    x_hwc = x_ref[0]                                    # (H, W, CP)

    # Zero the padded scratch image once; its 1-pixel border stays zero and
    # provides the conv padding=1 zeros for both 3x3 convolutions.
    pad_ref[...] = jnp.zeros_like(pad_ref)

    def im2col(src_hwc):
        """Fill col_ref with the (HW, 9*CP) im2col slab of a 3x3/pad=1 conv."""
        pad_ref[1:H + 1, 1:W + 1, :] = src_hwc
        for k in range(9):                              # 9 static shifted views
            kh, kw = k // 3, k % 3
            tap = pad_ref[kh:kh + H, kw:kw + W, :]      # (H, W, CP)
            col_ref[:, k * CP:(k + 1) * CP] = tap.reshape(HW, CP)

    def avgpool2(t_hwc):
        """2x2 average pool of a (H, W, CP) tile -> (Ho, Wo, CP) (VPU only)."""
        tr = t_hwc.reshape(Ho, 2, W, CP)                # split H (outer dims only)
        prow_ref[...] = tr[:, 0] + tr[:, 1]             # vertical pair sums
        even = prow_ref[:, pl.ds(0, Wo, stride=2), :]   # horizontal pair select
        odd = prow_ref[:, pl.ds(1, Wo, stride=2), :]
        return (even + odd) * 0.25

    # ---- main branch: conv3x3 -> relu -> conv3x3 (one fused matmul each) ----
    im2col(x_hwc)
    a1 = jnp.dot(col_ref[...], w1_ref[...],
                 preferred_element_type=jnp.float32) + b1_ref[...]
    h1 = jnp.maximum(a1, 0.0)                           # (HW, CP)

    im2col(h1.reshape(H, W, CP))
    a2 = jnp.dot(col_ref[...], w2_ref[...],
                 preferred_element_type=jnp.float32) + b2_ref[...]   # (HW, CP)

    # ---- shortcut branch (pool -> 1x1 conv) + merge --------------------------
    if downsample:
        main = avgpool2(a2.reshape(H, W, CP))           # (Ho, Wo, CP)
        x_ds = avgpool2(x_hwc)                          # (Ho, Wo, CP)
        s0 = jnp.dot(x_ds.reshape(Ho * Wo, CP), w0_ref[...],
                     preferred_element_type=jnp.float32) + b0_ref[...]
        out = main + s0.reshape(Ho, Wo, CP)
    else:
        s0 = jnp.dot(x_hwc.reshape(HW, CP), w0_ref[...],
                     preferred_element_type=jnp.float32) + b0_ref[...]
        out = (a2 + s0).reshape(H, W, CP)

    o_ref[0] = out.astype(o_ref.dtype)


# ----------------------------------------------------------------------------
# Wrapper: NCHW in / NCHW out, matching the PyTorch module semantics.
# ----------------------------------------------------------------------------
def _round_up(v, m):
    return (v + m - 1) // m * m


def disc_opt_block(x_nchw, params, downsample=True):
    W1, b1, W2, b2, W0, b0 = params
    N, Cin, H, W = x_nchw.shape
    Cout = W1.shape[0]
    if downsample:
        assert H % 2 == 0 and W % 2 == 0
    CP = _round_up(max(Cin, Cout, 128), 128)            # lane-dense channel pad
    HW = H * W
    Ho, Wo = (H // 2, W // 2) if downsample else (H, W)
    f32 = jnp.float32

    # NCHW -> NHWC, zero-pad channels to CP (layout plumbing only).
    x_nhwc = jnp.transpose(x_nchw.astype(f32), (0, 2, 3, 1))
    x_p = jnp.pad(x_nhwc, ((0, 0), (0, 0), (0, 0), (0, CP - Cin)))

    # 3x3 conv weights (O, I, 3, 3) -> lane-aligned (9*CP, CP) im2col slabs.
    def conv3x3_weight(Wt, ci):
        w = jnp.transpose(Wt.astype(f32), (2, 3, 1, 0)).reshape(9, ci, Cout)
        return (jnp.zeros((9, CP, CP), f32).at[:, :ci, :Cout].set(w)
                ).reshape(9 * CP, CP)

    def bias_row(b):
        return jnp.zeros((1, CP), f32).at[0, :Cout].set(b.astype(f32))

    w1f = conv3x3_weight(W1, Cin)
    w2f = conv3x3_weight(W2, Cout)
    w0f = jnp.zeros((CP, CP), f32).at[:Cin, :Cout].set(
        jnp.transpose(W0[:, :, 0, 0].astype(f32)))
    b1f, b2f, b0f = bias_row(b1), bias_row(b2), bias_row(b0)

    kernel = functools.partial(_disc_opt_block_kernel,
                               H=H, W=W, CP=CP, downsample=downsample)

    out_p = pl.pallas_call(
        kernel,
        out_shape=jax.ShapeDtypeStruct((N, Ho, Wo, CP), f32),
        grid=(N,),
        in_specs=[
            pl.BlockSpec((1, H, W, CP), lambda n: (n, 0, 0, 0)),   # x (padded)
            pl.BlockSpec((9 * CP, CP), lambda n: (0, 0)),          # w1 im2col slab
            pl.BlockSpec((1, CP), lambda n: (0, 0)),               # b1
            pl.BlockSpec((9 * CP, CP), lambda n: (0, 0)),          # w2 im2col slab
            pl.BlockSpec((1, CP), lambda n: (0, 0)),               # b2
            pl.BlockSpec((CP, CP), lambda n: (0, 0)),              # w0 (1x1)
            pl.BlockSpec((1, CP), lambda n: (0, 0)),               # b0
        ],
        out_specs=pl.BlockSpec((1, Ho, Wo, CP), lambda n: (n, 0, 0, 0)),
        scratch_shapes=[
            pltpu.VMEM((H + 2, W + 2, CP), f32),   # zero-padded image
            pltpu.VMEM((HW, 9 * CP), f32),         # im2col slab
            pltpu.VMEM((H // 2, W, CP), f32),      # pooling row sums
        ],
        compiler_params=pltpu.CompilerParams(
            dimension_semantics=("parallel",)),
    )(x_p, w1f, b1f, w2f, b2f, w0f, b0f)

    # Drop channel padding, NHWC -> NCHW.
    return jnp.transpose(out_p[:, :, :, :Cout], (0, 3, 1, 2))


# ----------------------------------------------------------------------------
# Plain-JAX reference (mirrors the PyTorch DiscOptBlock.forward) for validation.
# ----------------------------------------------------------------------------
def ref_forward(x, params, downsample=True):
    W1, b1, W2, b2, W0, b0 = params

    def conv(h, Wt, bt, pad):
        y = lax.conv_general_dilated(
            h, Wt, window_strides=(1, 1), padding=[(pad, pad), (pad, pad)],
            dimension_numbers=("NCHW", "OIHW", "NCHW"),
            precision=lax.Precision.HIGHEST)
        return y + bt[None, :, None, None]

    def avg_pool(h):
        s = lax.reduce_window(h, 0.0, lax.add, (1, 1, 2, 2), (1, 1, 2, 2),
                              "VALID")
        return s * 0.25

    x0 = x
    if downsample:
        x0 = avg_pool(x0)
    x0 = conv(x0, W0, b0, 0)
    h = conv(x, W1, b1, 1)
    h = jnp.maximum(h, 0.0)
    h = conv(h, W2, b2, 1)
    if downsample:
        h = avg_pool(h)
    return h + x0


if __name__ == "__main__":
    N, Cin, Cout, H, W = 2, 4, 8, 16, 16

    key = jax.random.PRNGKey(0)
    kx, k1, k2, k3, kb1, kb2, kb3 = jax.random.split(key, 7)

    x = jax.random.normal(kx, (N, Cin, H, W), dtype=jnp.float32)

    # Parameter shapes follow nn.Conv2d in DiscOptBlock.__init__.
    # TODO(synk): spectral_norm is a training-time weight reparameterization
    # (power-iteration state); weights here are consumed as-is.
    W1 = jax.random.normal(k1, (Cout, Cin, 3, 3), dtype=jnp.float32) * 0.2
    W2 = jax.random.normal(k2, (Cout, Cout, 3, 3), dtype=jnp.float32) * 0.2
    W0 = jax.random.normal(k3, (Cout, Cin, 1, 1), dtype=jnp.float32) * 0.2
    b1 = jax.random.normal(kb1, (Cout,), dtype=jnp.float32) * 0.05
    b2 = jax.random.normal(kb2, (Cout,), dtype=jnp.float32) * 0.05
    b0 = jax.random.normal(kb3, (Cout,), dtype=jnp.float32) * 0.05
    params = (W1, b1, W2, b2, W0, b0)

    for ds in (True, False):
        out = jax.block_until_ready(disc_opt_block(x, params, downsample=ds))
        ref = jax.block_until_ready(ref_forward(x, params, downsample=ds))
        assert out.shape == ref.shape, (out.shape, ref.shape)
        np.testing.assert_allclose(np.asarray(out), np.asarray(ref),
                                   rtol=2e-2, atol=2e-2)

    print("KERNEL_OK")
</pallas_src>

<mosaic_0001>
module attributes {stable_mosaic.version = 11 : i64} {
  func.func @_disc_opt_block_kernel(%arg0: i32, %arg1: memref<1x16x16x128xf32, #tpu.memory_space<vmem>>, %arg2: memref<1152x128xf32, #tpu.memory_space<vmem>>, %arg3: memref<1x128xf32, #tpu.memory_space<vmem>>, %arg4: memref<1152x128xf32, #tpu.memory_space<vmem>>, %arg5: memref<1x128xf32, #tpu.memory_space<vmem>>, %arg6: memref<128x128xf32, #tpu.memory_space<vmem>>, %arg7: memref<1x128xf32, #tpu.memory_space<vmem>>, %arg8: memref<1x8x8x128xf32, #tpu.memory_space<vmem>>, %arg9: memref<18x18x128xf32, #tpu.memory_space<vmem>>, %arg10: memref<256x1152xf32, #tpu.memory_space<vmem>>, %arg11: memref<8x16x128xf32, #tpu.memory_space<vmem>>) attributes {dimension_semantics = [#tpu.dimension_semantics<parallel>], iteration_bounds = array<i64: 2>, scalar_prefetch = 0 : i64, scratch_operands = 3 : i64, tpu.core_type = #tpu.core_type<tc>, window_params = [{transform_indices = @transform_0, window_bounds = array<i64: 1, 16, 16, 128>}, {pipeline_mode = #tpu.pipeline_mode<synchronous>, transform_indices = @transform_1, window_bounds = array<i64: 1152, 128>}, {pipeline_mode = #tpu.pipeline_mode<synchronous>, transform_indices = @transform_2, window_bounds = array<i64: 1, 128>}, {pipeline_mode = #tpu.pipeline_mode<synchronous>, transform_indices = @transform_3, window_bounds = array<i64: 1152, 128>}, {pipeline_mode = #tpu.pipeline_mode<synchronous>, transform_indices = @transform_4, window_bounds = array<i64: 1, 128>}, {pipeline_mode = #tpu.pipeline_mode<synchronous>, transform_indices = @transform_5, window_bounds = array<i64: 128, 128>}, {pipeline_mode = #tpu.pipeline_mode<synchronous>, transform_indices = @transform_6, window_bounds = array<i64: 1, 128>}, {transform_indices = @transform_7, window_bounds = array<i64: 1, 8, 8, 128>}]} {
    %c0 = arith.constant 0 : index
    %c0_0 = arith.constant 0 : index
    %c0_1 = arith.constant 0 : index
    %c0_2 = arith.constant 0 : index
    %0 = vector.load %arg1[%c0, %c0_0, %c0_1, %c0_2] : memref<1x16x16x128xf32, #tpu.memory_space<vmem>>, vector<1x16x16x128xf32>
    %1 = vector.shape_cast %0 : vector<1x16x16x128xf32> to vector<16x16x128xf32>
    %cst = arith.constant 0.000000e+00 : f32
    %2 = vector.broadcast %cst : f32 to vector<18x18x128xf32>
    %c0_3 = arith.constant 0 : index
    %c0_4 = arith.constant 0 : index
    %c0_5 = arith.constant 0 : index
    %3 = vector.load %arg9[%c0_3, %c0_4, %c0_5] : memref<18x18x128xf32, #tpu.memory_space<vmem>>, vector<18x18x128xf32>
    tpu.vector_store %arg9[%c0_3, %c0_4, %c0_5], %2 {strides = array<i32>} : memref<18x18x128xf32, #tpu.memory_space<vmem>>, vector<18x18x128xf32>,
    %c1 = arith.constant 1 : index
    %c1_6 = arith.constant 1 : index
    %c0_7 = arith.constant 0 : index
    %4 = vector.load %arg9[%c1, %c1_6, %c0_7] : memref<18x18x128xf32, #tpu.memory_space<vmem>>, vector<16x16x128xf32>
    tpu.vector_store %arg9[%c1, %c1_6, %c0_7], %1 {strides = array<i32>} : memref<18x18x128xf32, #tpu.memory_space<vmem>>, vector<16x16x128xf32>,
    %c0_8 = arith.constant 0 : index
    %c0_9 = arith.constant 0 : index
    %c0_10 = arith.constant 0 : index
    %5 = vector.load %arg9[%c0_8, %c0_9, %c0_10] : memref<18x18x128xf32, #tpu.memory_space<vmem>>, vector<16x16x128xf32>
    %6 = vector.shape_cast %5 : vector<16x16x128xf32> to vector<256x128xf32>
    %c0_11 = arith.constant 0 : index
    %c0_12 = arith.constant 0 : index
    %7 = vector.load %arg10[%c0_11, %c0_12] : memref<256x1152xf32, #tpu.memory_space<vmem>>, vector<256x128xf32>
    tpu.vector_store %arg10[%c0_11, %c0_12], %6 {strides = array<i32>} : memref<256x1152xf32, #tpu.memory_space<vmem>>, vector<256x128xf32>,
    %c0_13 = arith.constant 0 : index
    %c1_14 = arith.constant 1 : index
    %c0_15 = arith.constant 0 : index
    %8 = vector.load %arg9[%c0_13, %c1_14, %c0_15] : memref<18x18x128xf32, #tpu.memory_space<vmem>>, vector<16x16x128xf32>
    %9 = vector.shape_cast %8 : vector<16x16x128xf32> to vector<256x128xf32>
    %c0_16 = arith.constant 0 : index
    %c128 = arith.constant 128 : index
    %10 = vector.load %arg10[%c0_16, %c128] : memref<256x1152xf32, #tpu.memory_space<vmem>>, vector<256x128xf32>
    tpu.vector_store %arg10[%c0_16, %c128], %9 {strides = array<i32>} : memref<256x1152xf32, #tpu.memory_space<vmem>>, vector<256x128xf32>,
    %c0_17 = arith.constant 0 : index
    %c2 = arith.constant 2 : index
    %c0_18 = arith.constant 0 : index
    %11 = vector.load %arg9[%c0_17, %c2, %c0_18] : memref<18x18x128xf32, #tpu.memory_space<vmem>>, vector<16x16x128xf32>
    %12 = vector.shape_cast %11 : vector<16x16x128xf32> to vector<256x128xf32>
    %c0_19 = arith.constant 0 : index
    %c256 = arith.constant 256 : index
    %13 = vector.load %arg10[%c0_19, %c256] : memref<256x1152xf32, #tpu.memory_space<vmem>>, vector<256x128xf32>
    tpu.vector_store %arg10[%c0_19, %c256], %12 {strides = array<i32>} : memref<256x1152xf32, #tpu.memory_space<vmem>>, vector<256x128xf32>,
    %c1_20 = arith.constant 1 : index
    %c0_21 = arith.constant 0 : index
    %c0_22 = arith.constant 0 : index
    %14 = vector.load %arg9[%c1_20, %c0_21, %c0_22] : memref<18x18x128xf32, #tpu.memory_space<vmem>>, vector<16x16x128xf32>
    %15 = vector.shape_cast %14 : vector<16x16x128xf32> to vector<256x128xf32>
    %c0_23 = arith.constant 0 : index
    %c384 = arith.constant 384 : index
    %16 = vector.load %arg10[%c0_23, %c384] : memref<256x1152xf32, #tpu.memory_space<vmem>>, vector<256x128xf32>
    tpu.vector_store %arg10[%c0_23, %c384], %15 {strides = array<i32>} : memref<256x1152xf32, #tpu.memory_space<vmem>>, vector<256x128xf32>,
    %c1_24 = arith.constant 1 : index
    %c1_25 = arith.constant 1 : index
    %c0_26 = arith.constant 0 : index
    %17 = vector.load %arg9[%c1_24, %c1_25, %c0_26] : memref<18x18x128xf32, #tpu.memory_space<vmem>>, vector<16x16x128xf32>
    %18 = vector.shape_cast %17 : vector<16x16x128xf32> to vector<256x128xf32>
    %c0_27 = arith.constant 0 : index
    %c512 = arith.constant 512 : index
    %19 = vector.load %arg10[%c0_27, %c512] : memref<256x1152xf32, #tpu.memory_space<vmem>>, vector<256x128xf32>
    tpu.vector_store %arg10[%c0_27, %c512], %18 {strides = array<i32>} : memref<256x1152xf32, #tpu.memory_space<vmem>>, vector<256x128xf32>,
    %c1_28 = arith.constant 1 : index
    %c2_29 = arith.constant 2 : index
    %c0_30 = arith.constant 0 : index
    %20 = vector.load %arg9[%c1_28, %c2_29, %c0_30] : memref<18x18x128xf32, #tpu.memory_space<vmem>>, vector<16x16x128xf32>
    %21 = vector.shape_cast %20 : vector<16x16x128xf32> to vector<256x128xf32>
    %c0_31 = arith.constant 0 : index
    %c640 = arith.constant 640 : index
    %22 = vector.load %arg10[%c0_31, %c640] : memref<256x1152xf32, #tpu.memory_space<vmem>>, vector<256x128xf32>
    tpu.vector_store %arg10[%c0_31, %c640], %21 {strides = array<i32>} : memref<256x1152xf32, #tpu.memory_space<vmem>>, vector<256x128xf32>,
    %c2_32 = arith.constant 2 : index
    %c0_33 = arith.constant 0 : index
    %c0_34 = arith.constant 0 : index
    %23 = vector.load %arg9[%c2_32, %c0_33, %c0_34] : memref<18x18x128xf32, #tpu.memory_space<vmem>>, vector<16x16x128xf32>
    %24 = vector.shape_cast %23 : vector<16x16x128xf32> to vector<256x128xf32>
    %c0_35 = arith.constant 0 : index
    %c768 = arith.constant 768 : index
    %25 = vector.load %arg10[%c0_35, %c768] : memref<256x1152xf32, #tpu.memory_space<vmem>>, vector<256x128xf32>
    tpu.vector_store %arg10[%c0_35, %c768], %24 {strides = array<i32>} : memref<256x1152xf32, #tpu.memory_space<vmem>>, vector<256x128xf32>,
    %c2_36 = arith.constant 2 : index
    %c1_37 = arith.constant 1 : index
    %c0_38 = arith.constant 0 : index
    %26 = vector.load %arg9[%c2_36, %c1_37, %c0_38] : memref<18x18x128xf32, #tpu.memory_space<vmem>>, vector<16x16x128xf32>
    %27 = vector.shape_cast %26 : vector<16x16x128xf32> to vector<256x128xf32>
    %c0_39 = arith.constant 0 : index
    %c896 = arith.constant 896 : index
    %28 = vector.load %arg10[%c0_39, %c896] : memref<256x1152xf32, #tpu.memory_space<vmem>>, vector<256x128xf32>
    tpu.vector_store %arg10[%c0_39, %c896], %27 {strides = array<i32>} : memref<256x1152xf32, #tpu.memory_space<vmem>>, vector<256x128xf32>,
    %c2_40 = arith.constant 2 : index
    %c2_41 = arith.constant 2 : index
    %c0_42 = arith.constant 0 : index
    %29 = vector.load %arg9[%c2_40, %c2_41, %c0_42] : memref<18x18x128xf32, #tpu.memory_space<vmem>>, vector<16x16x128xf32>
    %30 = vector.shape_cast %29 : vector<16x16x128xf32> to vector<256x128xf32>
    %c0_43 = arith.constant 0 : index
    %c1024 = arith.constant 1024 : index
    %31 = vector.load %arg10[%c0_43, %c1024] : memref<256x1152xf32, #tpu.memory_space<vmem>>, vector<256x128xf32>
    tpu.vector_store %arg10[%c0_43, %c1024], %30 {strides = array<i32>} : memref<256x1152xf32, #tpu.memory_space<vmem>>, vector<256x128xf32>,
    %c0_44 = arith.constant 0 : index
    %c0_45 = arith.constant 0 : index
    %32 = vector.load %arg10[%c0_44, %c0_45] : memref<256x1152xf32, #tpu.memory_space<vmem>>, vector<256x1152xf32>
    %c0_46 = arith.constant 0 : index
    %c0_47 = arith.constant 0 : index
    %33 = vector.load %arg2[%c0_46, %c0_47] : memref<1152x128xf32, #tpu.memory_space<vmem>>, vector<1152x128xf32>
    %cst_48 = arith.constant dense<0.000000e+00> : vector<256x128xf32>
    %34 = tpu.matmul %32, %33, %cst_48 {dimension_numbers = #tpu.dot_dimension_numbers<[1], [0], [0], [1], [0, 0, 1, 1], [], []>} : vector<256x1152xf32>, vector<1152x128xf32>, vector<256x128xf32> -> vector<256x128xf32>
    %c0_49 = arith.constant 0 : index
    %c0_50 = arith.constant 0 : index
    %35 = vector.load %arg3[%c0_49, %c0_50] : memref<1x128xf32, #tpu.memory_space<vmem>>, vector<1x128xf32>
    %36 = vector.broadcast %35 : vector<1x128xf32> to vector<256x128xf32>
    %37 = arith.addf %34, %36 : vector<256x128xf32>
    %cst_51 = arith.constant 0.000000e+00 : f32
    %38 = vector.broadcast %cst_51 : f32 to vector<256x128xf32>
    %39 = arith.maximumf %37, %38 : vector<256x128xf32>
    %40 = vector.shape_cast %39 : vector<256x128xf32> to vector<16x16x128xf32>
    %c1_52 = arith.constant 1 : index
    %c1_53 = arith.constant 1 : index
    %c0_54 = arith.constant 0 : index
    %41 = vector.load %arg9[%c1_52, %c1_53, %c0_54] : memref<18x18x128xf32, #tpu.memory_space<vmem>>, vector<16x16x128xf32>
    tpu.vector_store %arg9[%c1_52, %c1_53, %c0_54], %40 {strides = array<i32>} : memref<18x18x128xf32, #tpu.memory_space<vmem>>, vector<16x16x128xf32>,
    %c0_55 = arith.constant 0 : index
    %c0_56 = arith.constant 0 : index
    %c0_57 = arith.constant 0 : index
    %42 = vector.load %arg9[%c0_55, %c0_56, %c0_57] : memref<18x18x128xf32, #tpu.memory_space<vmem>>, vector<16x16x128xf32>
    %43 = vector.shape_cast %42 : vector<16x16x128xf32> to vector<256x128xf32>
    %c0_58 = arith.constant 0 : index
    %c0_59 = arith.constant 0 : index
    %44 = vector.load %arg10[%c0_58, %c0_59] : memref<256x1152xf32, #tpu.memory_space<vmem>>, vector<256x128xf32>
    tpu.vector_store %arg10[%c0_58, %c0_59], %43 {strides = array<i32>} : memref<256x1152xf32, #tpu.memory_space<vmem>>, vector<256x128xf32>,
    %c0_60 = arith.constant 0 : index
    %c1_61 = arith.constant 1 : index
    %c0_62 = arith.constant 0 : index
    %45 = vector.load %arg9[%c0_60, %c1_61, %c0_62] : memref<18x18x128xf32, #tpu.memory_space<vmem>>, vector<16x16x128xf32>
    %46 = vector.shape_cast %45 : vector<16x16x128xf32> to vector<256x128xf32>
    %c0_63 = arith.constant 0 : index
    %c128_64 = arith.constant 128 : index
    %47 = vector.load %arg10[%c0_63, %c128_64] : memref<256x1152xf32, #tpu.memory_space<vmem>>, vector<256x128xf32>
    tpu.vector_store %arg10[%c0_63, %c128_64], %46 {strides = array<i32>} : memref<256x1152xf32, #tpu.memory_space<vmem>>, vector<256x128xf32>,
    %c0_65 = arith.constant 0 : index
    %c2_66 = arith.constant 2 : index
    %c0_67 = arith.constant 0 : index
    %48 = vector.load %arg9[%c0_65, %c2_66, %c0_67] : memref<18x18x128xf32, #tpu.memory_space<vmem>>, vector<16x16x128xf32>
    %49 = vector.shape_cast %48 : vector<16x16x128xf32> to vector<256x128xf32>
    %c0_68 = arith.constant 0 : index
    %c256_69 = arith.constant 256 : index
    %50 = vector.load %arg10[%c0_68, %c256_69] : memref<256x1152xf32, #tpu.memory_space<vmem>>, vector<256x128xf32>
    tpu.vector_store %arg10[%c0_68, %c256_69], %49 {strides = array<i32>} : memref<256x1152xf32, #tpu.memory_space<vmem>>, vector<256x128xf32>,
    %c1_70 = arith.constant 1 : index
    %c0_71 = arith.constant 0 : index
    %c0_72 = arith.constant 0 : index
    %51 = vector.load %arg9[%c1_70, %c0_71, %c0_72] : memref<18x18x128xf32, #tpu.memory_space<vmem>>, vector<16x16x128xf32>
    %52 = vector.shape_cast %51 : vector<16x16x128xf32> to vector<256x128xf32>
    %c0_73 = arith.constant 0 : index
    %c384_74 = arith.constant 384 : index
    %53 = vector.load %arg10[%c0_73, %c384_74] : memref<256x1152xf32, #tpu.memory_space<vmem>>, vector<256x128xf32>
    tpu.vector_store %arg10[%c0_73, %c384_74], %52 {strides = array<i32>} : memref<256x1152xf32, #tpu.memory_space<vmem>>, vector<256x128xf32>,
    %c1_75 = arith.constant 1 : index
    %c1_76 = arith.constant 1 : index
    %c0_77 = arith.constant 0 : index
    %54 = vector.load %arg9[%c1_75, %c1_76, %c0_77] : memref<18x18x128xf32, #tpu.memory_space<vmem>>, vector<16x16x128xf32>
    %55 = vector.shape_cast %54 : vector<16x16x128xf32> to vector<256x128xf32>
    %c0_78 = arith.constant 0 : index
    %c512_79 = arith.constant 512 : index
    %56 = vector.load %arg10[%c0_78, %c512_79] : memref<256x1152xf32, #tpu.memory_space<vmem>>, vector<256x128xf32>
    tpu.vector_store %arg10[%c0_78, %c512_79], %55 {strides = array<i32>} : memref<256x1152xf32, #tpu.memory_space<vmem>>, vector<256x128xf32>,
    %c1_80 = arith.constant 1 : index
    %c2_81 = arith.constant 2 : index
    %c0_82 = arith.constant 0 : index
    %57 = vector.load %arg9[%c1_80, %c2_81, %c0_82] : memref<18x18x128xf32, #tpu.memory_space<vmem>>, vector<16x16x128xf32>
    %58 = vector.shape_cast %57 : vector<16x16x128xf32> to vector<256x128xf32>
    %c0_83 = arith.constant 0 : index
    %c640_84 = arith.constant 640 : index
    %59 = vector.load %arg10[%c0_83, %c640_84] : memref<256x1152xf32, #tpu.memory_space<vmem>>, vector<256x128xf32>
    tpu.vector_store %arg10[%c0_83, %c640_84], %58 {strides = array<i32>} : memref<256x1152xf32, #tpu.memory_space<vmem>>, vector<256x128xf32>,
    %c2_85 = arith.constant 2 : index
    %c0_86 = arith.constant 0 : index
    %c0_87 = arith.constant 0 : index
    %60 = vector.load %arg9[%c2_85, %c0_86, %c0_87] : memref<18x18x128xf32, #tpu.memory_space<vmem>>, vector<16x16x128xf32>
    %61 = vector.shape_cast %60 : vector<16x16x128xf32> to vector<256x128xf32>
    %c0_88 = arith.constant 0 : index
    %c768_89 = arith.constant 768 : index
    %62 = vector.load %arg10[%c0_88, %c768_89] : memref<256x1152xf32, #tpu.memory_space<vmem>>, vector<256x128xf32>
    tpu.vector_store %arg10[%c0_88, %c768_89], %61 {strides = array<i32>} : memref<256x1152xf32, #tpu.memory_space<vmem>>, vector<256x128xf32>,
    %c2_90 = arith.constant 2 : index
    %c1_91 = arith.constant 1 : index
    %c0_92 = arith.constant 0 : index
    %63 = vector.load %arg9[%c2_90, %c1_91, %c0_92] : memref<18x18x128xf32, #tpu.memory_space<vmem>>, vector<16x16x128xf32>
    %64 = vector.shape_cast %63 : vector<16x16x128xf32> to vector<256x128xf32>
    %c0_93 = arith.constant 0 : index
    %c896_94 = arith.constant 896 : index
    %65 = vector.load %arg10[%c0_93, %c896_94] : memref<256x1152xf32, #tpu.memory_space<vmem>>, vector<256x128xf32>
    tpu.vector_store %arg10[%c0_93, %c896_94], %64 {strides = array<i32>} : memref<256x1152xf32, #tpu.memory_space<vmem>>, vector<256x128xf32>,
    %c2_95 = arith.constant 2 : index
    %c2_96 = arith.constant 2 : index
    %c0_97 = arith.constant 0 : index
    %66 = vector.load %arg9[%c2_95, %c2_96, %c0_97] : memref<18x18x128xf32, #tpu.memory_space<vmem>>, vector<16x16x128xf32>
    %67 = vector.shape_cast %66 : vector<16x16x128xf32> to vector<256x128xf32>
    %c0_98 = arith.constant 0 : index
    %c1024_99 = arith.constant 1024 : index
    %68 = vector.load %arg10[%c0_98, %c1024_99] : memref<256x1152xf32, #tpu.memory_space<vmem>>, vector<256x128xf32>
    tpu.vector_store %arg10[%c0_98, %c1024_99], %67 {strides = array<i32>} : memref<256x1152xf32, #tpu.memory_space<vmem>>, vector<256x128xf32>,
    %c0_100 = arith.constant 0 : index
    %c0_101 = arith.constant 0 : index
    %69 = vector.load %arg10[%c0_100, %c0_101] : memref<256x1152xf32, #tpu.memory_space<vmem>>, vector<256x1152xf32>
    %c0_102 = arith.constant 0 : index
    %c0_103 = arith.constant 0 : index
    %70 = vector.load %arg4[%c0_102, %c0_103] : memref<1152x128xf32, #tpu.memory_space<vmem>>, vector<1152x128xf32>
    %cst_104 = arith.constant dense<0.000000e+00> : vector<256x128xf32>
    %71 = tpu.matmul %69, %70, %cst_104 {dimension_numbers = #tpu.dot_dimension_numbers<[1], [0], [0], [1], [0, 0, 1, 1], [], []>} : vector<256x1152xf32>, vector<1152x128xf32>, vector<256x128xf32> -> vector<256x128xf32>
    %c0_105 = arith.constant 0 : index
    %c0_106 = arith.constant 0 : index
    %72 = vector.load %arg5[%c0_105, %c0_106] : memref<1x128xf32, #tpu.memory_space<vmem>>, vector<1x128xf32>
    %73 = vector.broadcast %72 : vector<1x128xf32> to vector<256x128xf32>
    %74 = arith.addf %71, %73 : vector<256x128xf32>
    %75 = vector.shape_cast %74 : vector<256x128xf32> to vector<16x16x128xf32>
    %76 = vector.shape_cast %75 : vector<16x16x128xf32> to vector<8x2x16x128xf32>
    %77 = vector.extract_strided_slice %76 {offsets = [0, 0, 0, 0], sizes = [8, 1, 16, 128], strides = [1, 1, 1, 1]} : vector<8x2x16x128xf32> to vector<8x1x16x128xf32>
    %78 = vector.shape_cast %77 : vector<8x1x16x128xf32> to vector<8x16x128xf32>
    %79 = vector.extract_strided_slice %76 {offsets = [0, 1, 0, 0], sizes = [8, 1, 16, 128], strides = [1, 1, 1, 1]} : vector<8x2x16x128xf32> to vector<8x1x16x128xf32>
    %80 = vector.shape_cast %79 : vector<8x1x16x128xf32> to vector<8x16x128xf32>
    %81 = arith.addf %78, %80 : vector<8x16x128xf32>
    %c0_107 = arith.constant 0 : index
    %c0_108 = arith.constant 0 : index
    %c0_109 = arith.constant 0 : index
    %82 = vector.load %arg11[%c0_107, %c0_108, %c0_109] : memref<8x16x128xf32, #tpu.memory_space<vmem>>, vector<8x16x128xf32>
    tpu.vector_store %arg11[%c0_107, %c0_108, %c0_109], %81 {strides = array<i32>} : memref<8x16x128xf32, #tpu.memory_space<vmem>>, vector<8x16x128xf32>,
    %c0_110 = arith.constant 0 : index
    %c0_111 = arith.constant 0 : index
    %c0_112 = arith.constant 0 : index
    %83 = tpu.strided_load %arg11[%c0_110, %c0_111, %c0_112] {strides = array<i32: 1, 2, 1>} : memref<8x16x128xf32, #tpu.memory_space<vmem>>, vector<8x8x128xf32>
    %c0_113 = arith.constant 0 : index
    %c1_114 = arith.constant 1 : index
    %c0_115 = arith.constant 0 : index
    %84 = tpu.strided_load %arg11[%c0_113, %c1_114, %c0_115] {strides = array<i32: 1, 2, 1>} : memref<8x16x128xf32, #tpu.memory_space<vmem>>, vector<8x8x128xf32>
    %85 = arith.addf %83, %84 : vector<8x8x128xf32>
    %cst_116 = arith.constant 2.500000e-01 : f32
    %86 = vector.broadcast %cst_116 : f32 to vector<8x8x128xf32>
    %87 = arith.mulf %85, %86 : vector<8x8x128xf32>
    %88 = vector.shape_cast %1 : vector<16x16x128xf32> to vector<8x2x16x128xf32>
    %89 = vector.extract_strided_slice %88 {offsets = [0, 0, 0, 0], sizes = [8, 1, 16, 128], strides = [1, 1, 1, 1]} : vector<8x2x16x128xf32> to vector<8x1x16x128xf32>
    %90 = vector.shape_cast %89 : vector<8x1x16x128xf32> to vector<8x16x128xf32>
    %91 = vector.extract_strided_slice %88 {offsets = [0, 1, 0, 0], sizes = [8, 1, 16, 128], strides = [1, 1, 1, 1]} : vector<8x2x16x128xf32> to vector<8x1x16x128xf32>
    %92 = vector.shape_cast %91 : vector<8x1x16x128xf32> to vector<8x16x128xf32>
    %93 = arith.addf %90, %92 : vector<8x16x128xf32>
    %c0_117 = arith.constant 0 : index
    %c0_118 = arith.constant 0 : index
    %c0_119 = arith.constant 0 : index
    %94 = vector.load %arg11[%c0_117, %c0_118, %c0_119] : memref<8x16x128xf32, #tpu.memory_space<vmem>>, vector<8x16x128xf32>
    tpu.vector_store %arg11[%c0_117, %c0_118, %c0_119], %93 {strides = array<i32>} : memref<8x16x128xf32, #tpu.memory_space<vmem>>, vector<8x16x128xf32>,
    %c0_120 = arith.constant 0 : index
    %c0_121 = arith.constant 0 : index
    %c0_122 = arith.constant 0 : index
    %95 = tpu.strided_load %arg11[%c0_120, %c0_121, %c0_122] {strides = array<i32: 1, 2, 1>} : memref<8x16x128xf32, #tpu.memory_space<vmem>>, vector<8x8x128xf32>
    %c0_123 = arith.constant 0 : index
    %c1_124 = arith.constant 1 : index
    %c0_125 = arith.constant 0 : index
    %96 = tpu.strided_load %arg11[%c0_123, %c1_124, %c0_125] {strides = array<i32: 1, 2, 1>} : memref<8x16x128xf32, #tpu.memory_space<vmem>>, vector<8x8x128xf32>
    %97 = arith.addf %95, %96 : vector<8x8x128xf32>
    %cst_126 = arith.constant 2.500000e-01 : f32
    %98 = vector.broadcast %cst_126 : f32 to vector<8x8x128xf32>
    %99 = arith.mulf %97, %98 : vector<8x8x128xf32>
    %100 = vector.shape_cast %99 : vector<8x8x128xf32> to vector<64x128xf32>
    %c0_127 = arith.constant 0 : index
    %c0_128 = arith.constant 0 : index
    %101 = vector.load %arg6[%c0_127, %c0_128] : memref<128x128xf32, #tpu.memory_space<vmem>>, vector<128x128xf32>
    %cst_129 = arith.constant dense<0.000000e+00> : vector<64x128xf32>
    %102 = tpu.matmul %100, %101, %cst_129 {dimension_numbers = #tpu.dot_dimension_numbers<[1], [0], [0], [1], [0, 0, 1, 1], [], []>} : vector<64x128xf32>, vector<128x128xf32>, vector<64x128xf32> -> vector<64x128xf32>
    %c0_130 = arith.constant 0 : index
    %c0_131 = arith.constant 0 : index
    %103 = vector.load %arg7[%c0_130, %c0_131] : memref<1x128xf32, #tpu.memory_space<vmem>>, vector<1x128xf32>
    %104 = vector.broadcast %103 : vector<1x128xf32> to vector<64x128xf32>
    %105 = arith.addf %102, %104 : vector<64x128xf32>
    %106 = vector.shape_cast %105 : vector<64x128xf32> to vector<8x8x128xf32>
    %107 = arith.addf %87, %106 : vector<8x8x128xf32>
    %c0_132 = arith.constant 0 : index
    %c0_133 = arith.constant 0 : index
    %c0_134 = arith.constant 0 : index
    %c0_135 = arith.constant 0 : index
    %108 = vector.load %arg8[%c0_132, %c0_133, %c0_134, %c0_135] : memref<1x8x8x128xf32, #tpu.memory_space<vmem>>, vector<1x8x8x128xf32>
    %109 = vector.shape_cast %108 : vector<1x8x8x128xf32> to vector<8x8x128xf32>
    %110 = vector.shape_cast %107 : vector<8x8x128xf32> to vector<1x8x8x128xf32>
    tpu.vector_store %arg8[%c0_132, %c0_133, %c0_134, %c0_135], %110 {strides = array<i32>} : memref<1x8x8x128xf32, #tpu.memory_space<vmem>>, vector<1x8x8x128xf32>,
    return
  }
  func.func @transform_0(%arg0: i32) -> (i32, i32, i32, i32) {
    %c0_i32 = arith.constant 0 : i32
    %c0_i32_0 = arith.constant 0 : i32
    %c0_i32_1 = arith.constant 0 : i32
    %c0_i32_2 = arith.constant 0 : i32
    return %arg0, %c0_i32, %c0_i32_0, %c0_i32_1 : i32, i32, i32, i32
  }
  func.func @transform_1(%arg0: i32) -> (i32, i32) {
    %c0_i32 = arith.constant 0 : i32
    %c0_i32_0 = arith.constant 0 : i32
    %c0_i32_1 = arith.constant 0 : i32
    return %c0_i32, %c0_i32_0 : i32, i32
  }
  func.func @transform_2(%arg0: i32) -> (i32, i32) {
    %c0_i32 = arith.constant 0 : i32
    %c0_i32_0 = arith.constant 0 : i32
    %c0_i32_1 = arith.constant 0 : i32
    return %c0_i32, %c0_i32_0 : i32, i32
  }
  func.func @transform_3(%arg0: i32) -> (i32, i32) {
    %c0_i32 = arith.constant 0 : i32
    %c0_i32_0 = arith.constant 0 : i32
    %c0_i32_1 = arith.constant 0 : i32
    return %c0_i32, %c0_i32_0 : i32, i32
  }
  func.func @transform_4(%arg0: i32) -> (i32, i32) {
    %c0_i32 = arith.constant 0 : i32
    %c0_i32_0 = arith.constant 0 : i32
    %c0_i32_1 = arith.constant 0 : i32
    return %c0_i32, %c0_i32_0 : i32, i32
  }
  func.func @transform_5(%arg0: i32) -> (i32, i32) {
    %c0_i32 = arith.constant 0 : i32
    %c0_i32_0 = arith.constant 0 : i32
    %c0_i32_1 = arith.constant 0 : i32
    return %c0_i32, %c0_i32_0 : i32, i32
  }
  func.func @transform_6(%arg0: i32) -> (i32, i32) {
    %c0_i32 = arith.constant 0 : i32
    %c0_i32_0 = arith.constant 0 : i32
    %c0_i32_1 = arith.constant 0 : i32
    return %c0_i32, %c0_i32_0 : i32, i32
  }
  func.func @transform_7(%arg0: i32) -> (i32, i32, i32, i32) {
    %c0_i32 = arith.constant 0 : i32
    %c0_i32_0 = arith.constant 0 : i32
    %c0_i32_1 = arith.constant 0 : i32
    %c0_i32_2 = arith.constant 0 : i32
    return %arg0, %c0_i32, %c0_i32_0, %c0_i32_1 : i32, i32, i32, i32
  }
}

</mosaic_0001>

<bundles_post_ra>
// kernel: tpu_custom_call.1
= control target key start
LH: loop header
LB: loop body
LE: loop exit
PB: predicated region body
PF: predicated region fallthrough
CT: control target
= control target key end

     0   :  { %12 = vsyncpa [#allocation6], 0  ;;  %s8570_s0 = inlined_call_operand.hbm [shape: f32[2,16,16,128], index: 0, kind: input, shape index: {}]   ;;  %s8571_s1 = inlined_call_operand.hbm [shape: f32[1152,128], index: 1, kind: input, shape index: {}]   ;;  %s8572_s2 = inlined_call_operand.vmem [shape: f32[1,128], index: 2, kind: input, shape index: {}]   ;;  %s8573_s3 = inlined_call_operand.hbm [shape: f32[1152,128], index: 3, kind: input, shape index: {}]   ;;  %s8574_s4 = inlined_call_operand.vmem [shape: f32[1,128], index: 4, kind: input, shape index: {}]   ;;  %s8575_s5 = inlined_call_operand.hbm [shape: f32[128,128], index: 5, kind: input, shape index: {}]   ;;  %s8576_s6 = inlined_call_operand.vmem [shape: f32[1,128], index: 6, kind: input, shape index: {}]   ;;  %s8577_s7 = inlined_call_operand.hbm [shape: f32[2,8,8,128], index: 7, kind: output, shape index: {}]  }
   0x1   :  { %14 = vsyncpa [#allocation6 + $0x1], 0 }
   0x2   :  { %15 = vsyncpa [#allocation9], 0 }
   0x3   :  { %16 = vsyncpa [#allocation12], 0 }
   0x4   :  { %17 = vsyncpa [#allocation7], 0 }
   0x5   :  { %19 = vsyncpa [#allocation7 + $0x1], 0  ;;  %s6843_s24 = smov 0   ;;  %s6845_s25 = smov 0  }
   0x6   :  { %s6847_s26 = smov 0   ;;  %s6849_s27 = smov 0  }
   0x7 LB: > { %s6864_s28 = sadd.s32 4294967295, %s6790_s27   ;;  %s5208_s29 = sadd.s32 4294967294, %s6790_s27   ;;  %s6790_s27 = sphi %s6849_s27, %s8761_s27   ;;  %s6786_s26 = sphi %s6847_s26, %s8760_s26   ;;  %s6782_s25 = sphi %s6845_s25, %s8759_s25   ;;  %s6778_s24 = sphi %s6843_s24, %s8758_s24  }
   0x8   : > { %p45_p0 = scmp.ne.s32.totalorder %s6782_s25, %s6778_s24  ;;  %p8578_p1 = scmp.eq.s32.totalorder %s6864_s28, 0 }
   0x9   : > { %p201_p3 = scmp.eq.s32.totalorder %s5208_s29, 1  ;;  %p5209_p5 = scmp.ge.s32.totalorder %s6790_s27, 1 }
   0xa   : > { %p6873_p4 = por %p8578_p1, %p45_p0  ;;  %p208_p7 = scmp.lt.s32.totalorder %s6790_s27, 3 }
   0xb   : > { %p6878_p6 = por %p201_p3, %p45_p0  ;;  %s6792_s10 = smov [#allocation8]  }
   0xc   : > { %s8637_s30 = scalar_select %p6873_p4, 1, 0 }
   0xd   : > { %s8638_s8 = scalar_select %p6878_p6, 1, 0 }
   0xe   : > { %p6883_p8 = pnand %p5209_p5, %p208_p7  ;;  %s220_s11 = sshll.u32 %s6792_s10, 4  ;;  %s6887_s11 = int_to_ptr.vmem [resolvable:$true] %s220_s11 }
   0xf   : > { %8639 = sst [smem:[#allocation18_spill]] %s8638_s8  ;;  %s6793_s13 = smov [#allocation10]  }
  0x10   : > { %s8640_s9 = scalar_select %p6883_p8, 1, 0 }
  0x11   : > { %p6501_p9 = pneg %p6883_p8  ;;  %s236_s14 = sshll.u32 %s6793_s13, 4  ;;  %s6898_s14 = int_to_ptr.vmem [resolvable:$true] %s236_s14 }
  0x12   : > { %s6794_s15 = smov [#allocation11]   ;;  %s6602_s19 = scalar_lea.hbm %s8571_s1, 18432 }
  0x13   : > { %p6894_p11 = pnand %p6501_p9, %p8578_p1  ;;  %s6900_s16 = sshll.u32 %s6794_s15, 4  ;;  %s253_s16 = int_to_ptr.vmem [resolvable:$true] %s6900_s16 }
  0x14   : > { %p6603_p12 = scmp.ne.s32.totalorder %s8571_s1, %s6602_s19  ;;  %p6609_p5 = scmp.lt.u32.totalorder %s6602_s19, %s8571_s1 }
  0x15   : > { %p6910_p13 = pneg %p6894_p11 }
  0x17   : > { %p6605_p0 = pnand %p6910_p13, %p6603_p12 }
  0x19   : > { %p6606_p3 = pneg %p6605_p0 }
  0x1b   : > { %p6611_p7 = pnand %p6609_p5, %p6606_p3 }
  0x1d   : > { %6614 = shalt.err (!%p6611_p7)
}
  0x1e   : > { %s6615_s10 = scalar_lea.vmem %s6887_s11, 18432  ;;  %p6623_p2 = scmp.lt.s32.totalorder %s6887_s11, %s6887_s11 }
  0x1f   : > { %p6616_p9 = scmp.ne.s32.totalorder %s6887_s11, %s6615_s10  ;;  %p6624_p6 = scmp.lt.s32.totalorder %s6615_s10, %s6615_s10 }
  0x21   : > { %p6618_p10 = pnand %p6616_p9, %p6910_p13  ;;  %p6625_p12 = por %p6624_p6, %p6623_p2 }
  0x23   : > { %p6619_p1 = pneg %p6618_p10 }
  0x25   : > { %p6626_p0 = pnand %p6625_p12, %p6619_p1 }
  0x27   : > { %6629 = shalt.err (!%p6626_p0)
}
  0x28   : > { %s6795_s13 = smov 128   ;;  %s6796_s15 = smov 8  }
  0x29   : > { %6504 = dma.hbm_to_vmem [thread:$0]  (!%p6894_p11), %s8571_s1, 18432, %s6887_s11, [#allocation9], %s6795_s13, %s6795_s13, %s6796_s15  }
  0x2a   : > { %s6630_s21 = scalar_lea.hbm %s8573_s3, 18432 }
  0x2b   : > { %p6631_p1 = scmp.ne.s32.totalorder %s8573_s3, %s6630_s21  ;;  %p6637_p10 = scmp.lt.u32.totalorder %s6630_s21, %s8573_s3 }
  0x2d   : > { %p6633_p2 = pnand %p6631_p1, %p6910_p13 }
  0x2f   : > { %p6634_p6 = pneg %p6633_p2 }
  0x31   : > { %p6639_p3 = pnand %p6637_p10, %p6634_p6 }
  0x33   : > { %6642 = shalt.err (!%p6639_p3)
}
  0x34   : > { %s6643_s11 = scalar_lea.vmem %s6898_s14, 18432  ;;  %p6651_p12 = scmp.lt.s32.totalorder %s6898_s14, %s6898_s14 }
  0x35   : > { %p6644_p5 = scmp.ne.s32.totalorder %s6898_s14, %s6643_s11  ;;  %p6652_p0 = scmp.lt.s32.totalorder %s6643_s11, %s6643_s11 }
  0x37   : > { %p6646_p7 = pnand %p6644_p5, %p6910_p13  ;;  %p6653_p1 = por %p6652_p0, %p6651_p12 }
  0x39   : > { %p6647_p9 = pneg %p6646_p7 }
  0x3b   : > { %p6654_p2 = pnand %p6653_p1, %p6647_p9 }
  0x3d   : > { %6657 = shalt.err (!%p6654_p2)
}
  0x3e   : > { %6507 = dma.hbm_to_vmem [thread:$0]  (!%p6894_p11), %s8573_s3, 18432, %s6898_s14, [#allocation9], %s6795_s13, %s6795_s13, %s6796_s15  }
  0x3f   : > { %s6658_s20 = scalar_lea.hbm %s8575_s5, 2048 }
  0x40   : > { %p6659_p6 = scmp.ne.s32.totalorder %s8575_s5, %s6658_s20  ;;  %p6665_p5 = scmp.lt.u32.totalorder %s6658_s20, %s8575_s5 }
  0x42   : > { %p6661_p10 = pnand %p6659_p6, %p6910_p13 }
  0x44   : > { %p6662_p3 = pneg %p6661_p10 }
  0x46   : > { %p6667_p7 = pnand %p6665_p5, %p6662_p3 }
  0x48   : > { %6670 = shalt.err (!%p6667_p7)
}
  0x49   : > { %s6671_s11 = scalar_lea.vmem %s253_s16, 2048  ;;  %p6679_p1 = scmp.lt.s32.totalorder %s253_s16, %s253_s16 }
  0x4a   : > { %p6672_p9 = scmp.ne.s32.totalorder %s253_s16, %s6671_s11  ;;  %p6680_p2 = scmp.lt.s32.totalorder %s6671_s11, %s6671_s11 }
  0x4c   : > { %p6674_p12 = pnand %p6672_p9, %p6910_p13  ;;  %p6681_p4 = por %p6680_p2, %p6679_p1 }
  0x4e   : > { %p6675_p0 = pneg %p6674_p12 }
  0x50   : > { %p6682_p8 = pnand %p6681_p4, %p6675_p0 }
  0x52   : > { %6685 = shalt.err (!%p6682_p8)
}
  0x53   : > { %6510 = dma.hbm_to_vmem [thread:$0]  (!%p6894_p11), %s8575_s5, 2048, %s253_s16, [#allocation12], %s6795_s13, %s6795_s13, %s6796_s15  }
  0x54   : > { %s6983_s22 = sadd.s32 1, %s6790_s27   ;;  %s32_s17 = sadd.s32 1, %s6786_s26 }
  0x55   : > { %s29_s12 = ssub.s32 %s6790_s27, %s6983_s22  ;;  %p39_p8 = scmp.ne.s32.totalorder %s6786_s26, %s6782_s25 }
  0x56   : > { %p30_p4 = scmp.eq.s32.totalorder %s29_s12, 0  ;;  %p40_p13 = scmp.eq.s32.totalorder %s6790_s27, 0 }
  0x57   : > { %p6522_p6 = scmp.lt.s32.totalorder %s6790_s27, 2  ;;  %p8643_p3 = scmp.eq.s32.totalorder %s6864_s28, 1 }
  0x58   : > { %s6993_s18 = scalar_select %p30_p4, %s6786_s26, %s32_s17  }
  0x59   : > { %p41_p10 = por %p40_p13, %p39_p8  ;;  %p6997_p5 = por %p8643_p3, %p39_p8 }
  0x5a   : > { %s269_s20 = sand.u32 1, %s6786_s26   ;;  %s5231_s21 = sshll.u32 %s6790_s27, 12 }
  0x5b   : > { %s5214_s16 = sshll.u32 %s269_s20, 8  ;;  %s7006_s10 = scalar_lea.hbm %s8570_s0, %s5231_s21 }
  0x5c   : > { %s273_s11 = scalar_lea.vmem [#allocation5], %s5214_s16  ;;  %p7008_p11 = pnand %p6522_p6, %p41_p10 }
  0x5d   : > { %s280_s14 = sshll.u32 %s273_s11, 4  ;;  %s7014_s12 = scalar_lea.sflag [#allocation6], %s269_s20  ;;  %s7012_s14 = int_to_ptr.vmem [resolvable:$true] %s280_s14 }
  0x5e   : > { %s6686_s17 = scalar_lea.hbm %s7006_s10, 4096  ;;  %p6688_p9 = pneg %p7008_p11 }
  0x5f   : > { %p6687_p7 = scmp.ne.s32.totalorder %s7006_s10, %s6686_s17  ;;  %s6691_s23 = scalar_lea.hbm %s8570_s0, 8192 }
  0x60   : > { %p6692_p1 = scmp.lt.u32.totalorder %s7006_s10, %s8570_s0  ;;  %p6693_p2 = scmp.lt.u32.totalorder %s6691_s23, %s6686_s17 }
  0x61   : > { %p6689_p12 = pnand %p6688_p9, %p6687_p7  ;;  %p6695_p8 = scmp.lt.u32.totalorder %s6686_s17, %s7006_s10 }
  0x62   : > { %p6694_p4 = por %p6693_p2, %p6692_p1 }
  0x63   : > { %p6690_p0 = pneg %p6689_p12 }
  0x64   : > { %p6696_p13 = por %p6695_p8, %p6694_p4 }
  0x66   : > { %p6697_p6 = pnand %p6696_p13, %p6690_p0 }
  0x68   : > { %6700 = shalt.err (!%p6697_p6)
}
  0x69   : > { %s6701_s20 = scalar_lea.vmem %s7012_s14, 4096  ;;  %s6797_s21 = smov [#allocation5]  }
  0x6a   : > { %p6702_p10 = scmp.ne.s32.totalorder %s7012_s14, %s6701_s20  ;;  %s6706_s16 = sshll.u32 %s6797_s21, 4  ;;  %s6707_s16 = int_to_ptr.vmem [resolvable:$false] %s6706_s16 }
  0x6b   : > { %s6708_s29 = scalar_lea.vmem %s6707_s16, 8192  ;;  %p6709_p12 = scmp.lt.s32.totalorder %s7012_s14, %s6707_s16 }
  0x6c   : > { %p6704_p3 = pnand %p6702_p10, %p6688_p9  ;;  %p6710_p1 = scmp.lt.s32.totalorder %s6708_s29, %s6701_s20 }
  0x6e   : > { %p6705_p7 = pneg %p6704_p3  ;;  %p6711_p2 = por %p6710_p1, %p6709_p12 }
  0x70   : > { %p6712_p4 = pnand %p6711_p2, %p6705_p7 }
  0x72   : > { %6715 = shalt.err (!%p6712_p4)
}
  0x73   : > { %6514 = dma.hbm_to_vmem [thread:$0]  (!%p7008_p11), %s7006_s10, 4096, %s7012_s14, %s7014_s12, %s6795_s13, %s6795_s13, %s6796_s15  }
  0x74   : > { %p8646_p9 = scmp.ne.s32.totalorder %s8640_s9, 0 }
  0x76   : > { %292 = sbr.rel (%p8646_p9) target bundleno = 1784 (0x6f8), region = 48 }
  0x7d   : > { %s7048_s17 = sand.u32 1, %s6782_s25   ;;  %p8647_p0 = scmp.ne.s32.totalorder %s8637_s30, 0 }
  0x7e   : > { %s5218_s23 = sshll.u32 %s7048_s17, 8  ;;  %s295_s11 = scalar_lea.sflag [#allocation6], %s7048_s17 }
  0x7f   : > { %s7052_s20 = scalar_lea.vmem [#allocation5], %s5218_s23 }
  0x80   : > { %6761 = dma.done.wait (%p8647_p0), %s295_s11, 4096  }
  0x81   : > { %6763 = vsyncadd (%p8647_p0), %s295_s11, 4294963200  ;;  %p8648_p11 = scmp.eq.s32.totalorder %s6864_s28, 0 }
  0x83   : > { %6765 = dma.done.wait (%p8648_p11), [#allocation9], 36864   ;;  %p8649_p8 = pmov %p8648_p11 }
  0x85   : > { %6767 = vsyncadd (%p8649_p8), [#allocation9], 4294930432  ;;  %p8650_p13 = pmov %p8649_p8 }
  0x86   : > { %p8651_p6 = pmov %p8649_p8 }
  0x87   : > { %6769 = dma.done.wait (%p8650_p13), [#allocation12], 2048  }
  0x88   : > { %6771 = vsyncadd (%p8651_p6), [#allocation12], 4294965248  ;;  %v8598_v0 = vmov 0.0|0.0   ;;  %v6799_v1 = vmov 0.0   ;;  %v1325_v2 = vld [vmem:[#allocation8] sm:$0xff]  ;;  %v1326_v3 = vld [vmem:[#allocation8 + $0x8] sm:$0xff] }
  0x89   : > { %5557 = vmatprep.subr.bf16.mxu0 %v8598_v0  ;;  %373 = vst [vmem:[#allocation2] sm:$0xff] %v6799_v1  ;;  %374 = vst [vmem:[#allocation2 + $0x8] sm:$0xff] %v6799_v1  ;;  %v1327_v4 = vld [vmem:[#allocation8 + $0x10] sm:$0xff]  ;;  %v5558_v5 = vpack.c.bf16 %v1326_v3, %v1325_v2  ;;  %v1328_v6 = vld [vmem:[#allocation8 + $0x18] sm:$0xff]  ;;  %s5222_s8 = sshll.u32 %s7048_s17, 6  ;;  %s5232_s16 = sshll.u32 %s6864_s28, 10 }
  0x8a   : > { %375 = vst [vmem:[#allocation2 + $0x10] sm:$0x3] %v6799_v1  ;;  %376 = vst [vmem:[#allocation2 + $0x18] sm:$0xff] %v6799_v1  ;;  %v5561_v7 = vpack.c.bf16 %v1328_v6, %v1327_v4  ;;  %v1329_v8 = vld [vmem:[#allocation8 + $0x20] sm:$0xff]  ;;  %v1330_v9 = vld [vmem:[#allocation8 + $0x28] sm:$0xff]  ;;  %s8504_s12 = scalar_lea.vmem [#allocation13], %s5222_s8  ;;  %s8524_s11 = scalar_lea.hbm %s8577_s7, %s5232_s16 }
  0x8b   : > { %377 = vst [vmem:[#allocation2 + $0x20] sm:$0xff] %v6799_v1  ;;  %378 = vst [vmem:[#allocation2 + $0x28] sm:$0x3] %v6799_v1  ;;  %5559 = vmatpush1.bf16.msra.mxu0 %v5558_v5  ;;  %v5564_v10 = vpack.c.bf16 %v1330_v9, %v1329_v8  ;;  %v1331_v11 = vld [vmem:[#allocation8 + $0x30] sm:$0xff]  ;;  %v1332_v12 = vld [vmem:[#allocation8 + $0x38] sm:$0xff]  ;;  %s5106_s21 = sshll.u32 %s8504_s12, 4  ;;  %s8518_s21 = int_to_ptr.vmem [resolvable:$true] %s5106_s21 }
  0x8c   : > { %379 = vst [vmem:[#allocation2 + $0x30] sm:$0xff] %v6799_v1  ;;  %380 = vst [vmem:[#allocation2 + $0x38] sm:$0xff] %v6799_v1  ;;  %5560 = vmatprep.subr.bf16.mxu0 %v8598_v0  ;;  %v5567_v14 = vpack.c.bf16 %v1332_v12, %v1331_v11  ;;  %v1333_v15 = vld [vmem:[#allocation8 + $0x40] sm:$0xff]  ;;  %v1334_v16 = vld [vmem:[#allocation8 + $0x48] sm:$0xff]  ;;  %s5093_s28 = scalar_lea.sflag [#allocation7], %s7048_s17  ;;  %s6800_s30 = smov [#allocation13]  }
  0x8d   : > { %381 = vst [vmem:[#allocation2 + $0x40] sm:$0x3] %v6799_v1  ;;  %382 = vst [vmem:[#allocation2 + $0x48] sm:$0xff] %v6799_v1  ;;  %v7125_v17 = vld [vmem:[%s7052_s20] sm:$0xff]  ;;  %v7129_v18 = vld [vmem:[%s7052_s20 + $0x8] sm:$0xff]  ;;  %v5570_v22 = vpack.c.bf16 %v1334_v16, %v1333_v15  ;;  %s6720_s9 = sshll.u32 %s6800_s30, 4  ;;  %s6721_s9 = int_to_ptr.vmem [resolvable:$false] %s6720_s9 }
  0x8e   : > { %383 = vst [vmem:[#allocation2 + $0x50] sm:$0xff] %v6799_v1  ;;  %384 = vst [vmem:[#allocation2 + $0x58] sm:$0x3] %v6799_v1  ;;  %v7132_v19 = vld [vmem:[%s7052_s20 + $0x10] sm:$0xff]  ;;  %v7137_v20 = vld [vmem:[%s7052_s20 + $0x18] sm:$0xff]  ;;  %s6722_s13 = scalar_lea.vmem %s6721_s9, 2048  ;;  %p6723_p12 = scmp.lt.s32.totalorder %s8518_s21, %s6721_s9 }
  0x8f   : > { %385 = vst [vmem:[#allocation2 + $0x60] sm:$0xff] %v6799_v1  ;;  %386 = vst [vmem:[#allocation2 + $0x68] sm:$0xff] %v6799_v1  ;;  %5562 = vmatpush1.bf16.msra.mxu0 %v5561_v7  ;;  %v7140_v21 = vld [vmem:[%s7052_s20 + $0x20] sm:$0xff]  ;;  %v7145_v23 = vld [vmem:[%s7052_s20 + $0x28] sm:$0xff] }
  0x90   : > { %387 = vst [vmem:[#allocation2 + $0x70] sm:$0x3] %v6799_v1  ;;  %388 = vst [vmem:[#allocation2 + $0x78] sm:$0xff] %v6799_v1  ;;  %5563 = vmatprep.subr.bf16.mxu0 %v8598_v0  ;;  %v524_v13 = vld [vmem:[#allocation2 + $0x1] sm:$0xff]  ;;  %v7157_v28 = vld [vmem:[%s7052_s20 + $0x40] sm:$0xff] }
  0x91   : > { %389 = vst [vmem:[#allocation2 + $0x80] sm:$0xff] %v6799_v1  ;;  %390 = vst [vmem:[#allocation2 + $0x88] sm:$0x3] %v6799_v1  ;;  %1540 = vmatprep.mubr.f32.mxu0 %v524_v13  ;;  %v1335_v24 = vld [vmem:[#allocation8 + $0x50] sm:$0xff]  ;;  %v1336_v25 = vld [vmem:[#allocation8 + $0x58] sm:$0xff] }
  0x92   : > { %391 = vst [vmem:[#allocation2 + $0x90] sm:$0xff] %v6799_v1  ;;  %392 = vst [vmem:[#allocation2 + $0x98] sm:$0xff] %v6799_v1  ;;  %v7150_v26 = vld [vmem:[%s7052_s20 + $0x30] sm:$0xff]  ;;  %v7154_v27 = vld [vmem:[%s7052_s20 + $0x38] sm:$0xff]  ;;  %v5573_v31 = vpack.c.bf16 %v1336_v25, %v1335_v24 }
  0x93   : > { %393 = vst [vmem:[#allocation2 + $0xa0] sm:$0x3] %v6799_v1  ;;  %394 = vst [vmem:[#allocation2 + $0xa8] sm:$0xff] %v6799_v1  ;;  %5565 = vmatpush1.bf16.msra.mxu0 %v5564_v10  ;;  %v7162_v29 = vld [vmem:[%s7052_s20 + $0x48] sm:$0xff]  ;;  %v7165_v30 = vld [vmem:[%s7052_s20 + $0x50] sm:$0xff] }
  0x94   : > { %395 = vst [vmem:[#allocation2 + $0xb0] sm:$0xff] %v6799_v1  ;;  %396 = vst [vmem:[#allocation2 + $0xb8] sm:$0x3] %v6799_v1  ;;  %5566 = vmatprep.subr.bf16.mxu0 %v8598_v0  ;;  %v7170_v32 = vld [vmem:[%s7052_s20 + $0x58] sm:$0xff]  ;;  %v1337_v33 = vld [vmem:[#allocation8 + $0x60] sm:$0xff] }
  0x95   : > { %397 = vst [vmem:[#allocation2 + $0xc0] sm:$0xff] %v6799_v1  ;;  %398 = vst [vmem:[#allocation2 + $0xc8] sm:$0xff] %v6799_v1  ;;  %v1338_v34 = vld [vmem:[#allocation8 + $0x68] sm:$0xff]  ;;  %v7175_v35 = vld [vmem:[%s7052_s20 + $0x60] sm:$0xff] }
  0x96   : > { %399 = vst [vmem:[#allocation2 + $0xd0] sm:$0x3] %v6799_v1  ;;  %400 = vst [vmem:[#allocation2 + $0xd8] sm:$0xff] %v6799_v1  ;;  %v7179_v36 = vld [vmem:[%s7052_s20 + $0x68] sm:$0xff]  ;;  %v5576_v37 = vpack.c.bf16 %v1338_v34, %v1337_v33  ;;  %v7183_v38 = vld [vmem:[%s7052_s20 + $0x70] sm:$0xff] }
  0x97   : > { %401 = vst [vmem:[#allocation2 + $0xe0] sm:$0xff] %v6799_v1  ;;  %402 = vst [vmem:[#allocation2 + $0xe8] sm:$0x3] %v6799_v1  ;;  %5568 = vmatpush1.bf16.msra.mxu0 %v5567_v14  ;;  %v1339_v39 = vld [vmem:[#allocation8 + $0x70] sm:$0xff]  ;;  %v1340_v40 = vld [vmem:[#allocation8 + $0x78] sm:$0xff] }
  0x98   : > { %403 = vst [vmem:[#allocation2 + $0xf0] sm:$0xff] %v6799_v1  ;;  %404 = vst [vmem:[#allocation2 + $0xf8] sm:$0xff] %v6799_v1  ;;  %5569 = vmatprep.subr.bf16.mxu0 %v8598_v0  ;;  %v7188_v41 = vld [vmem:[%s7052_s20 + $0x78] sm:$0xff]  ;;  %v7192_v42 = vld [vmem:[%s7052_s20 + $0x80] sm:$0xff]  ;;  %v5579_v43 = vpack.c.bf16 %v1340_v40, %v1339_v39 }
  0x99   : > { %405 = vst [vmem:[#allocation2 + $0x100] sm:$0x3] %v6799_v1  ;;  %406 = vst [vmem:[#allocation2 + $0x108] sm:$0xff] %v6799_v1  ;;  %v7196_v44 = vld [vmem:[%s7052_s20 + $0x88] sm:$0xff]  ;;  %v1341_v45 = vld [vmem:[#allocation8 + $0x80] sm:$0xff] }
  0x9a   : > { %407 = vst [vmem:[#allocation2 + $0x110] sm:$0xff] %v6799_v1  ;;  %408 = vst [vmem:[#allocation2 + $0x118] sm:$0x3] %v6799_v1  ;;  %v1342_v46 = vld [vmem:[#allocation8 + $0x88] sm:$0xff]  ;;  %v7201_v47 = vld [vmem:[%s7052_s20 + $0x90] sm:$0xff] }
  0x9b   : > { %409 = vst [vmem:[#allocation2 + $0x120] sm:$0xff] %v6799_v1  ;;  %410 = vst [vmem:[#allocation2 + $0x128] sm:$0xff] %v6799_v1  ;;  %5571 = vmatpush1.bf16.msra.mxu0 %v5570_v22  ;;  %v7205_v48 = vld [vmem:[%s7052_s20 + $0x98] sm:$0xff]  ;;  %v7208_v49 = vld [vmem:[%s7052_s20 + $0xa0] sm:$0xff]  ;;  %v5582_v50 = vpack.c.bf16 %v1342_v46, %v1341_v45 }
  0x9c   : > { %411 = vst [vmem:[#allocation2 + $0x130] sm:$0x3] %v6799_v1  ;;  %412 = vst [vmem:[#allocation2 + $0x138] sm:$0xff] %v6799_v1  ;;  %5572 = vmatprep.subr.bf16.mxu0 %v8598_v0  ;;  %v7213_v51 = vld [vmem:[%s7052_s20 + $0xa8] sm:$0xff]  ;;  %v7216_v52 = vld [vmem:[%s7052_s20 + $0xb0] sm:$0xff] }
  0x9d   : > { %413 = vst [vmem:[#allocation2 + $0x140] sm:$0xff] %v6799_v1  ;;  %414 = vst [vmem:[#allocation2 + $0x148] sm:$0x3] %v6799_v1  ;;  %v1343_v53 = vld [vmem:[#allocation8 + $0x90] sm:$0xff]  ;;  %v1344_v54 = vld [vmem:[#allocation8 + $0x98] sm:$0xff] }
  0x9e   : > { %415 = vst [vmem:[#allocation2 + $0x150] sm:$0xff] %v6799_v1  ;;  %416 = vst [vmem:[#allocation2 + $0x158] sm:$0xff] %v6799_v1  ;;  %v7222_v55 = vld [vmem:[%s7052_s20 + $0xb8] sm:$0xff]  ;;  %v7226_v56 = vld [vmem:[%s7052_s20 + $0xc0] sm:$0xff]  ;;  %v5585_v57 = vpack.c.bf16 %v1344_v54, %v1343_v53 }
  0x9f   : > { %417 = vst [vmem:[#allocation2 + $0x160] sm:$0x3] %v6799_v1  ;;  %418 = vst [vmem:[#allocation2 + $0x168] sm:$0xff] %v6799_v1  ;;  %5574 = vmatpush1.bf16.msra.mxu0 %v5573_v31  ;;  %v1345_v58 = vld [vmem:[#allocation8 + $0xa0] sm:$0xff]  ;;  %v1346_v59 = vld [vmem:[#allocation8 + $0xa8] sm:$0xff] }
  0xa0   : > { %419 = vst [vmem:[#allocation2 + $0x170] sm:$0xff] %v6799_v1  ;;  %420 = vst [vmem:[#allocation2 + $0x178] sm:$0x3] %v6799_v1  ;;  %5575 = vmatprep.subr.bf16.mxu0 %v8598_v0  ;;  %v7231_v60 = vld [vmem:[%s7052_s20 + $0xc8] sm:$0xff]  ;;  %v5588_v61 = vpack.c.bf16 %v1346_v59, %v1345_v58  ;;  %v1347_v62 = vld [vmem:[#allocation8 + $0xb0] sm:$0xff] }
  0xa1   : > { %421 = vst [vmem:[#allocation2 + $0x180] sm:$0xff] %v6799_v1  ;;  %422 = vst [vmem:[#allocation2 + $0x188] sm:$0xff] %v6799_v1  ;;  %v1348_v63 = vld [vmem:[#allocation8 + $0xb8] sm:$0xff]  ;;  %v7236_v2 = vld [vmem:[%s7052_s20 + $0xd0] sm:$0xff] }
  0xa2   : > { %423 = vst [vmem:[#allocation2 + $0x190] sm:$0x3] %v6799_v1  ;;  %424 = vst [vmem:[#allocation2 + $0x198] sm:$0xff] %v6799_v1  ;;  %v5591_v3 = vpack.c.bf16 %v1348_v63, %v1347_v62  ;;  %v1349_v4 = vld [vmem:[#allocation8 + $0xc0] sm:$0xff]  ;;  %v1350_v5 = vld [vmem:[#allocation8 + $0xc8] sm:$0xff] }
  0xa3   : > { %425 = vst [vmem:[#allocation2 + $0x1a0] sm:$0xff] %v6799_v1  ;;  %426 = vst [vmem:[#allocation2 + $0x1a8] sm:$0x3] %v6799_v1  ;;  %5577 = vmatpush1.bf16.msra.mxu0 %v5576_v37  ;;  %v7241_v6 = vld [vmem:[%s7052_s20 + $0xd8] sm:$0xff]  ;;  %v5594_v7 = vpack.c.bf16 %v1350_v5, %v1349_v4  ;;  %v1351_v8 = vld [vmem:[#allocation8 + $0xd0] sm:$0xff] }
  0xa4   : > { %428 = vst [vmem:[#allocation2 + $0x19] sm:$0xff] %v7125_v17  ;;  %429 = vst [vmem:[#allocation2 + $0x21] sm:$0xff] %v7129_v18  ;;  %5578 = vmatprep.subr.bf16.mxu0 %v8598_v0  ;;  %v1352_v9 = vld [vmem:[#allocation8 + $0xd8] sm:$0xff]  ;;  %v7246_v10 = vld [vmem:[%s7052_s20 + $0xe0] sm:$0xff] }
  0xa5   : > { %430 = vst [vmem:[#allocation2 + $0x31] sm:$0xff] %v7132_v19  ;;  %431 = vst [vmem:[#allocation2 + $0x39] sm:$0xff] %v7137_v20  ;;  %v5597_v11 = vpack.c.bf16 %v1352_v9, %v1351_v8  ;;  %v1353_v12 = vld [vmem:[#allocation8 + $0xe0] sm:$0xff]  ;;  %v1354_v13 = vld [vmem:[#allocation8 + $0xe8] sm:$0xff] }
  0xa6   : > { %432 = vst [vmem:[#allocation2 + $0x49] sm:$0xff] %v7140_v21  ;;  %433 = vst [vmem:[#allocation2 + $0x51] sm:$0xff] %v7145_v23  ;;  %v7251_v14 = vld [vmem:[%s7052_s20 + $0xe8] sm:$0xff]  ;;  %v5600_v15 = vpack.c.bf16 %v1354_v13, %v1353_v12  ;;  %v1355_v16 = vld [vmem:[#allocation8 + $0xf0] sm:$0xff] }
  0xa7   : > { %434 = vst [vmem:[#allocation2 + $0x61] sm:$0xff] %v7150_v26  ;;  %435 = vst [vmem:[#allocation2 + $0x69] sm:$0xff] %v7154_v27  ;;  %5580 = vmatpush1.bf16.msra.mxu0 %v5579_v43  ;;  %v1356_v22 = vld [vmem:[#allocation8 + $0xf8] sm:$0xff]  ;;  %v1357_v25 = vld [vmem:[#allocation8 + $0x100] sm:$0xff] }
  0xa8   : > { %436 = vst [vmem:[#allocation2 + $0x79] sm:$0xff] %v7157_v28  ;;  %437 = vst [vmem:[#allocation2 + $0x81] sm:$0xff] %v7162_v29  ;;  %5581 = vmatprep.subr.bf16.mxu0 %v8598_v0  ;;  %v5603_v24 = vpack.c.bf16 %v1356_v22, %v1355_v16  ;;  %v1358_v31 = vld [vmem:[#allocation8 + $0x108] sm:$0xff]  ;;  %v525_v34 = vld [vmem:[#allocation2 + $0x9] sm:$0xff] }
  0xa9   : > { %438 = vst [vmem:[#allocation2 + $0x91] sm:$0xff] %v7165_v30  ;;  %439 = vst [vmem:[#allocation2 + $0x99] sm:$0xff] %v7170_v32  ;;  %v5606_v33 = vpack.c.bf16 %v1358_v31, %v1357_v25  ;;  %v1359_v37 = vld [vmem:[#allocation8 + $0x110] sm:$0xff]  ;;  %v1360_v39 = vld [vmem:[#allocation8 + $0x118] sm:$0xff] }
  0xaa   : > { %440 = vst [vmem:[#allocation2 + $0xa9] sm:$0xff] %v7175_v35  ;;  %441 = vst [vmem:[#allocation2 + $0xb1] sm:$0xff] %v7179_v36  ;;  %v5609_v40 = vpack.c.bf16 %v1360_v39, %v1359_v37  ;;  %v1361_v43 = vld [vmem:[#allocation8 + $0x120] sm:$0xff]  ;;  %v1362_v45 = vld [vmem:[#allocation8 + $0x128] sm:$0xff] }
  0xab   : > { %442 = vst [vmem:[#allocation2 + $0xc1] sm:$0xff] %v7183_v38  ;;  %443 = vst [vmem:[#allocation2 + $0xc9] sm:$0xff] %v7188_v41  ;;  %5583 = vmatpush1.bf16.msra.mxu0 %v5582_v50  ;;  %v7261_v46 = vld [vmem:[#allocation2 + $0x18] sm:$0xff]  ;;  %v5612_v50 = vpack.c.bf16 %v1362_v45, %v1361_v43  ;;  %v1363_v53 = vld [vmem:[#allocation8 + $0x130] sm:$0xff] }
  0xac   : > { %444 = vst [vmem:[#allocation2 + $0xd9] sm:$0xff] %v7192_v42  ;;  %445 = vst [vmem:[#allocation2 + $0xe1] sm:$0xff] %v7196_v44  ;;  %5584 = vmatprep.subr.bf16.mxu0 %v8598_v0  ;;  %v1364_v54 = vld [vmem:[#allocation8 + $0x138] sm:$0xff]  ;;  %v7271_v59 = vld [vmem:[#allocation2 + $0x30] sm:$0xff] }
  0xad   : > { %446 = vst [vmem:[#allocation2 + $0xf1] sm:$0xff] %v7201_v47  ;;  %447 = vst [vmem:[#allocation2 + $0xf9] sm:$0xff] %v7205_v48  ;;  %v5615_v58 = vpack.c.bf16 %v1364_v54, %v1363_v53  ;;  %v7273_v62 = vld [vmem:[#allocation2 + $0x32] sm:$0xff]  ;;  %v1368_v63 = vld [vmem:[#allocation8 + $0x158] sm:$0xff] }
  0xae   : > { %448 = vst [vmem:[#allocation2 + $0x109] sm:$0xff] %v7208_v49  ;;  %449 = vst [vmem:[#allocation2 + $0x111] sm:$0xff] %v7213_v51  ;;  %5385 = vmatprep.mubr.f32.mxu1 %v7273_v62  ;;  %v1369_v4 = vld [vmem:[#allocation8 + $0x160] sm:$0xff]  ;;  %v1370_v5 = vld [vmem:[#allocation8 + $0x168] sm:$0xff] }
  0xaf   : > { %450 = vst [vmem:[#allocation2 + $0x121] sm:$0xff] %v7216_v52  ;;  %451 = vst [vmem:[#allocation2 + $0x129] sm:$0xff] %v7222_v55  ;;  %5586 = vmatpush1.bf16.msra.mxu0 %v5585_v57  ;;  %v7266_v57 = vld [vmem:[#allocation2 + $0x20] sm:$0xff]  ;;  %v5624_v8 = vpack.c.bf16 %v1370_v5, %v1369_v4  ;;  %v1373_v13 = vld [vmem:[#allocation8 + $0x180] sm:$0xff] }
  0xb0   : > { %452 = vst [vmem:[#allocation2 + $0x139] sm:$0xff] %v7226_v56  ;;  %453 = vst [vmem:[#allocation2 + $0x141] sm:$0xff] %v7231_v60  ;;  %5587 = vmatprep.subr.bf16.mxu0 %v8598_v0  ;;  %v1371_v9 = vld [vmem:[#allocation8 + $0x170] sm:$0xff]  ;;  %v1377_v31 = vld [vmem:[#allocation8 + $0x1a0] sm:$0xff] }
  0xb1   : > { %454 = vst [vmem:[#allocation2 + $0x151] sm:$0xff] %v7236_v2  ;;  %455 = vst [vmem:[#allocation2 + $0x159] sm:$0xff] %v7241_v6  ;;  %v1375_v22 = vld [vmem:[#allocation8 + $0x190] sm:$0xff]  ;;  %v1381_v43 = vld [vmem:[#allocation8 + $0x1c0] sm:$0xff] }
  0xb2   : > { %456 = vst [vmem:[#allocation2 + $0x169] sm:$0xff] %v7246_v10  ;;  %457 = vst [vmem:[#allocation2 + $0x171] sm:$0xff] %v7251_v14  ;;  %v1379_v37 = vld [vmem:[#allocation8 + $0x1b0] sm:$0xff]  ;;  %v7314_v45 = vld [vmem:[#allocation2 + $0x90] sm:$0xff] }
  0xb3   : > { %5589 = vmatpush1.bf16.msra.mxu0 %v5588_v61  ;;  %v7309_v39 = vld [vmem:[#allocation2 + $0x80] sm:$0xff]  ;;  %v7319_v54 = vld [vmem:[#allocation2 + $0x98] sm:$0xff] }
  0xb4   : > { %5590 = vmatprep.subr.bf16.mxu0 %v8598_v0  ;;  %v1383_v53 = vld [vmem:[#allocation8 + $0x1d0] sm:$0xff]  ;;  %v7343_v4 = vld [vmem:[#allocation2 + $0xd8] sm:$0xff]  ;;  %v7351_v5 = vld [vmem:[#allocation2 + $0xf0] sm:$0xff] }
  0xb7   : > { %5592 = vmatpush1.bf16.msra.mxu0 %v5591_v3  ;;  %v7279_v3 = vld [vmem:[#allocation2 + $0x38] sm:$0xff] }
  0xb8   : > { %5593 = vmatprep.subr.bf16.mxu0 %v8598_v0 }
  0xbb   : > { %5595 = vmatpush1.bf16.msra.mxu0 %v5594_v7  ;;  %v7284_v7 = vld [vmem:[#allocation2 + $0x48] sm:$0xff] }
  0xbc   : > { %5596 = vmatprep.subr.bf16.mxu0 %v8598_v0 }
  0xbf   : > { %5598 = vmatpush1.bf16.msra.mxu0 %v5597_v11  ;;  %v7289_v11 = vld [vmem:[#allocation2 + $0x50] sm:$0xff] }
  0xc0   : > { %5599 = vmatprep.subr.bf16.mxu0 %v8598_v0 }
  0xc3   : > { %5601 = vmatpush1.bf16.msra.mxu0 %v5600_v15  ;;  %v7294_v15 = vld [vmem:[#allocation2 + $0x60] sm:$0xff] }
  0xc4   : > { %5602 = vmatprep.subr.bf16.mxu0 %v8598_v0 }
  0xc7   : > { %5604 = vmatpush1.bf16.msra.mxu0 %v5603_v24  ;;  %v7299_v24 = vld [vmem:[#allocation2 + $0x68] sm:$0xff] }
  0xc8   : > { %5605 = vmatprep.subr.bf16.mxu0 %v8598_v0 }
  0xca   : > { %1541 = vmatmul.mubr.f32.vlgmr.msra.gmra.mrb[0].mxu0 %v6799_v1 }
  0xcb   : > { %5607 = vmatpush1.bf16.msra.mxu0 %v5606_v33  ;;  %1545 = vmatprep.mubr.f32.mxu0 %v525_v34  ;;  %v7304_v33 = vld [vmem:[#allocation2 + $0x78] sm:$0xff] }
  0xcc   : > { %5608 = vmatprep.subr.bf16.mxu0 %v8598_v0 }
  0xce   : > { %1546 = vmatmul.mubr.f32.gmra.mrb[2].mxu0 %v6799_v1  ;;  %v1365_v1 = vld [vmem:[#allocation8 + $0x140] sm:$0xff] }
  0xcf   : > { %1550 = vmatprep.mubr.f32.mxu0 %v7125_v17  ;;  %5610 = vmatpush1.bf16.msra.mxu0 %v5609_v40  ;;  %v1366_v17 = vld [vmem:[#allocation8 + $0x148] sm:$0xff] }
  0xd0   : > { %5611 = vmatprep.subr.bf16.mxu0 %v8598_v0  ;;  %v5618_v61 = vpack.c.bf16 %v1366_v17, %v1365_v1  ;;  %v1385_v1 = vld [vmem:[#allocation8 + $0x1e0] sm:$0xff]  ;;  %v7324_v17 = vld [vmem:[#allocation2 + $0xa8] sm:$0xff] }
  0xd2   : > { %1551 = vmatmul.mubr.f32.gmra.mrb[4].mxu0 %v7261_v46 }
  0xd3   : > { %1555 = vmatprep.mubr.f32.mxu0 %v7129_v18  ;;  %5613 = vmatpush1.bf16.msra.mxu0 %v5612_v50  ;;  %v1367_v18 = vld [vmem:[#allocation8 + $0x150] sm:$0xff] }
  0xd4   : > { %5614 = vmatprep.subr.bf16.mxu0 %v8598_v0 }
  0xd6   : > { %1556 = vmatmul.mubr.f32.gmra.mrb[6].mxu0 %v7266_v57 }
  0xd7   : > { %1560 = vmatprep.mubr.f32.mxu0 %v7132_v19  ;;  %5616 = vmatpush1.bf16.msra.mxu0 %v5615_v58  ;;  %v5621_v19 = vpack.c.bf16 %v1368_v63, %v1367_v18  ;;  %v1387_v18 = vld [vmem:[#allocation8 + $0x1f0] sm:$0xff]  ;;  %v7329_v63 = vld [vmem:[#allocation2 + $0xb0] sm:$0xff] }
  0xd8   : > { %5617 = vmatprep.subr.bf16.mxu0 %v8598_v0 }
  0xda   : > { %1561 = vmatmul.mubr.f32.gmra.mrb[8].mxu0 %v7271_v59 }
  0xdb   : > { %1565 = vmatprep.mubr.f32.mxu0 %v7137_v20  ;;  %5619 = vmatpush1.bf16.msra.mxu0 %v5618_v61  ;;  %v1372_v20 = vld [vmem:[#allocation8 + $0x178] sm:$0xff] }
  0xdc   : > { %5620 = vmatprep.subr.bf16.mxu0 %v8598_v0  ;;  %v5627_v12 = vpack.c.bf16 %v1372_v20, %v1371_v9  ;;  %v1389_v9 = vld [vmem:[#allocation8 + $0x200] sm:$0xff]  ;;  %v588_v20 = vld [vmem:[#allocation2 + $0x2] sm:$0xff] }
  0xde   : > { %1566 = vmatmul.mubr.f32.gmra.mrb[10].mxu0 %v7279_v3 }
  0xdf   : > { %1570 = vmatprep.mubr.f32.mxu0 %v7140_v21  ;;  %5622 = vmatpush1.bf16.msra.mxu0 %v5621_v19  ;;  %v1374_v21 = vld [vmem:[#allocation8 + $0x188] sm:$0xff] }
  0xe0   : > { %5623 = vmatprep.subr.bf16.mxu0 %v8598_v0  ;;  %v5630_v16 = vpack.c.bf16 %v1374_v21, %v1373_v13  ;;  %v1391_v13 = vld [vmem:[#allocation8 + $0x210] sm:$0xff]  ;;  %v1392_v21 = vld [vmem:[#allocation8 + $0x218] sm:$0xff] }
  0xe2   : > { %1571 = vmatmul.mubr.f32.gmra.mrb[12].mxu0 %v7284_v7 }
  0xe3   : > { %1575 = vmatprep.mubr.f32.mxu0 %v7145_v23  ;;  %5625 = vmatpush1.bf16.msra.mxu0 %v5624_v8  ;;  %v1376_v23 = vld [vmem:[#allocation8 + $0x198] sm:$0xff] }
  0xe4   : > { %5626 = vmatprep.subr.bf16.mxu0 %v8598_v0  ;;  %v5633_v25 = vpack.c.bf16 %v1376_v23, %v1375_v22  ;;  %v7394_v8 = vld [vmem:[%s7052_s20 + $0xf8] sm:$0xff]  ;;  %v1394_v22 = vld [vmem:[#allocation8 + $0x228] sm:$0xff] }
  0xe5   : > { %459 = vst [vmem:[#allocation2 + $0x189] sm:$0xff] %v7394_v8  ;;  %v7410_v23 = vld [vmem:[#allocation2 + $0x1a] sm:$0xff] }
  0xe6   : > { %1576 = vmatmul.mubr.f32.gmra.mrb[14].mxu0 %v7289_v11 }
  0xe7   : > { %1580 = vmatprep.mubr.f32.mxu0 %v7150_v26  ;;  %5628 = vmatpush1.bf16.msra.mxu0 %v5627_v12  ;;  %v1378_v26 = vld [vmem:[#allocation8 + $0x1a8] sm:$0xff] }
  0xe8   : > { %5629 = vmatprep.subr.bf16.mxu0 %v8598_v0  ;;  %v5636_v34 = vpack.c.bf16 %v1378_v26, %v1377_v31  ;;  %v1396_v31 = vld [vmem:[#allocation8 + $0x238] sm:$0xff] }
  0xea   : > { %1581 = vmatmul.mubr.f32.gmra.mrb[16].mxu0 %v7294_v15 }
  0xeb   : > { %1585 = vmatprep.mubr.f32.mxu0 %v7154_v27  ;;  %5631 = vmatpush1.bf16.msra.mxu0 %v5630_v16  ;;  %v1380_v27 = vld [vmem:[#allocation8 + $0x1b8] sm:$0xff]  ;;  %v5657_v16 = vpack.c.bf16 %v1392_v21, %v1391_v13  ;;  %v1411_v13 = vld [vmem:[#allocation8 + $0x2b0] sm:$0xff] }
  0xec   : > { %5632 = vmatprep.subr.bf16.mxu0 %v8598_v0  ;;  %v5639_v40 = vpack.c.bf16 %v1380_v27, %v1379_v37  ;;  %v1399_v27 = vld [vmem:[#allocation8 + $0x250] sm:$0xff] }
  0xed   : > { %v7453_v21 = vld [vmem:[#allocation2 + $0x82] sm:$0xff] }
  0xee   : > { %1586 = vmatmul.mubr.f32.gmra.mrb[18].mxu0 %v7299_v24 }
  0xef   : > { %1590 = vmatprep.mubr.f32.mxu0 %v7157_v28  ;;  %5634 = vmatpush1.bf16.msra.mxu0 %v5633_v25  ;;  %v1382_v28 = vld [vmem:[#allocation8 + $0x1c8] sm:$0xff]  ;;  %v1395_v25 = vld [vmem:[#allocation8 + $0x230] sm:$0xff] }
  0xf0   : > { %5635 = vmatprep.subr.bf16.mxu0 %v8598_v0  ;;  %v5642_v50 = vpack.c.bf16 %v1382_v28, %v1381_v43  ;;  %v5663_v26 = vpack.c.bf16 %v1396_v31, %v1395_v25  ;;  %v1401_v28 = vld [vmem:[#allocation8 + $0x260] sm:$0xff]  ;;  %v7463_v25 = vld [vmem:[#allocation2 + $0x9a] sm:$0xff] }
  0xf2   : > { %1591 = vmatmul.mubr.f32.gmra.mrb[20].mxu0 %v7304_v33 }
  0xf3   : > { %1595 = vmatprep.mubr.f32.mxu0 %v7162_v29  ;;  %5637 = vmatpush1.bf16.msra.mxu0 %v5636_v34  ;;  %v1384_v29 = vld [vmem:[#allocation8 + $0x1d8] sm:$0xff]  ;;  %v1397_v34 = vld [vmem:[#allocation8 + $0x240] sm:$0xff] }
  0xf4   : > { %5638 = vmatprep.subr.bf16.mxu0 %v8598_v0  ;;  %v5645_v58 = vpack.c.bf16 %v1384_v29, %v1383_v53  ;;  %v1403_v29 = vld [vmem:[#allocation8 + $0x270] sm:$0xff] }
  0xf6   : > { %1596 = vmatmul.mubr.f32.gmra.mrb[22].mxu0 %v7309_v39 }
  0xf7   : > { %1600 = vmatprep.mubr.f32.mxu0 %v7165_v30  ;;  %5640 = vmatpush1.bf16.msra.mxu0 %v5639_v40  ;;  %v1386_v30 = vld [vmem:[#allocation8 + $0x1e8] sm:$0xff]  ;;  %v1400_v40 = vld [vmem:[#allocation8 + $0x258] sm:$0xff] }
  0xf8   : > { %5641 = vmatprep.subr.bf16.mxu0 %v8598_v0  ;;  %v5648_v61 = vpack.c.bf16 %v1386_v30, %v1385_v1  ;;  %v5669_v43 = vpack.c.bf16 %v1400_v40, %v1399_v27  ;;  %v1405_v30 = vld [vmem:[#allocation8 + $0x280] sm:$0xff] }
  0xf9   : > { %v7473_v27 = vld [vmem:[#allocation2 + $0xb2] sm:$0xff] }
  0xfa   : > { %1601 = vmatmul.mubr.f32.gmra.mrb[24].mxu0 %v7314_v45 }
  0xfb   : > { %1605 = vmatprep.mubr.f32.mxu0 %v7170_v32  ;;  %5643 = vmatpush1.bf16.msra.mxu0 %v5642_v50  ;;  %v1388_v32 = vld [vmem:[#allocation8 + $0x1f8] sm:$0xff]  ;;  %v1402_v50 = vld [vmem:[#allocation8 + $0x268] sm:$0xff] }
  0xfc   : > { %5644 = vmatprep.subr.bf16.mxu0 %v8598_v0  ;;  %v5651_v19 = vpack.c.bf16 %v1388_v32, %v1387_v18  ;;  %v5672_v53 = vpack.c.bf16 %v1402_v50, %v1401_v28  ;;  %v1407_v32 = vld [vmem:[#allocation8 + $0x290] sm:$0xff]  ;;  %v7495_v28 = vld [vmem:[#allocation2 + $0xf2] sm:$0xff] }
  0xfd   : > { %v1454_v50 = vld [vmem:[#allocation8 + $0x408] sm:$0xff] }
  0xfe   : > { %1606 = vmatmul.mubr.f32.gmra.mrb[26].mxu0 %v7319_v54 }
  0xff   : > { %1610 = vmatprep.mubr.f32.mxu0 %v7175_v35  ;;  %5646 = vmatpush1.bf16.msra.mxu0 %v5645_v58  ;;  %v7334_v35 = vld [vmem:[#allocation2 + $0xc0] sm:$0xff]  ;;  %v7433_v58 = vld [vmem:[#allocation2 + $0x52] sm:$0xff] }
 0x100   : > { %5647 = vmatprep.subr.bf16.mxu0 %v8598_v0 }
 0x102   : > { %1611 = vmatmul.mubr.f32.gmra.mrb[28].mxu0 %v7324_v17 }
 0x103   : > { %1615 = vmatprep.mubr.f32.mxu0 %v7179_v36  ;;  %5649 = vmatpush1.bf16.msra.mxu0 %v5648_v61  ;;  %v7339_v36 = vld [vmem:[#allocation2 + $0xc8] sm:$0xff] }
 0x104   : > { %5650 = vmatprep.subr.bf16.mxu0 %v8598_v0  ;;  %v7438_v61 = vld [vmem:[#allocation2 + $0x62] sm:$0xff] }
 0x106   : > { %1616 = vmatmul.mubr.f32.gmra.mrb[30].mxu0 %v7329_v63 }
 0x107   : > { %1620 = vmatprep.mubr.f32.mxu0 %v7183_v38  ;;  %5652 = vmatpush1.bf16.msra.mxu0 %v5651_v19  ;;  %v7347_v38 = vld [vmem:[#allocation2 + $0xe0] sm:$0xff]  ;;  %v7443_v19 = vld [vmem:[#allocation2 + $0x6a] sm:$0xff] }
 0x108   : > { %5653 = vmatprep.subr.bf16.mxu0 %v8598_v0 }
 0x10a   : > { %1621 = vmatmul.mubr.f32.gmra.mrb[32].mxu0 %v7334_v35 }
 0x10b   : > { %1625 = vmatprep.mubr.f32.mxu0 %v7188_v41  ;;  %v7355_v41 = vld [vmem:[#allocation2 + $0xf8] sm:$0xff] }
 0x10e   : > { %1626 = vmatmul.mubr.f32.gmra.mrb[34].mxu0 %v7339_v36 }
 0x10f   : > { %1630 = vmatprep.mubr.f32.mxu0 %v7192_v42  ;;  %v7359_v42 = vld [vmem:[#allocation2 + $0x108] sm:$0xff] }
 0x112   : > { %1631 = vmatmul.mubr.f32.gmra.mrb[36].mxu0 %v7343_v4 }
 0x113   : > { %1635 = vmatprep.mubr.f32.mxu0 %v7196_v44  ;;  %v7363_v44 = vld [vmem:[#allocation2 + $0x110] sm:$0xff] }
 0x116   : > { %1636 = vmatmul.mubr.f32.gmra.mrb[38].mxu0 %v7347_v38 }
 0x117   : > { %1640 = vmatprep.mubr.f32.mxu0 %v7201_v47  ;;  %v7367_v47 = vld [vmem:[#allocation2 + $0x120] sm:$0xff] }
 0x11a   : > { %1641 = vmatmul.mubr.f32.gmra.mrb[40].mxu0 %v7351_v5 }
 0x11b   : > { %1645 = vmatprep.mubr.f32.mxu0 %v7205_v48  ;;  %v7371_v48 = vld [vmem:[#allocation2 + $0x128] sm:$0xff] }
 0x11e   : > { %1646 = vmatmul.mubr.f32.gmra.mrb[42].mxu0 %v7355_v41 }
 0x11f   : > { %1650 = vmatprep.mubr.f32.mxu0 %v7208_v49  ;;  %v7375_v49 = vld [vmem:[#allocation2 + $0x138] sm:$0xff] }
 0x122   : > { %1651 = vmatmul.mubr.f32.gmra.mrb[44].mxu0 %v7359_v42 }
 0x123   : > { %1655 = vmatprep.mubr.f32.mxu0 %v7213_v51  ;;  %v7379_v51 = vld [vmem:[#allocation2 + $0x140] sm:$0xff] }
 0x126   : > { %1656 = vmatmul.mubr.f32.gmra.mrb[46].mxu0 %v7363_v44 }
 0x127   : > { %1660 = vmatprep.mubr.f32.mxu0 %v7216_v52  ;;  %v7383_v52 = vld [vmem:[#allocation2 + $0x150] sm:$0xff] }
 0x12a   : > { %1661 = vmatmul.mubr.f32.gmra.mrb[48].mxu0 %v7367_v47 }
 0x12b   : > { %1665 = vmatprep.mubr.f32.mxu0 %v7222_v55  ;;  %v7386_v55 = vld [vmem:[%s7052_s20 + $0xf0] sm:$0xff]  ;;  %s6716_s20 = scalar_lea.vmem %s8518_s21, 1024 }
 0x12c   : > { %458 = vst [vmem:[#allocation2 + $0x181] sm:$0xff] %v7386_v55  ;;  %p6717_p10 = scmp.ne.s32.totalorder %s8518_s21, %s6716_s20  ;;  %p6724_p1 = scmp.lt.s32.totalorder %s6722_s13, %s6716_s20 }
 0x12e   : > { %1666 = vmatmul.mubr.f32.gmra.mrb[50].mxu0 %v7371_v48  ;;  %p6718_p3 = pnand %p6717_p10, %p6997_p5  ;;  %p6725_p2 = por %p6724_p1, %p6723_p12 }
 0x12f   : > { %1670 = vmatprep.mubr.f32.mxu0 %v7226_v56  ;;  %v7391_v56 = vld [vmem:[#allocation2 + $0x158] sm:$0xff] }
 0x130   : > { %p6719_p7 = pneg %p6718_p3 }
 0x132   : > { %1671 = vmatmul.mubr.f32.gmra.mrb[52].mxu0 %v7375_v49  ;;  %p6726_p4 = pnand %p6725_p2, %p6719_p7 }
 0x133   : > { %1675 = vmatprep.mubr.f32.mxu0 %v7231_v60  ;;  %v7399_v60 = vld [vmem:[#allocation2 + $0x168] sm:$0xff] }
 0x136   : > { %1676 = vmatmul.mubr.f32.gmra.mrb[54].mxu0 %v7379_v51 }
 0x137   : > { %1680 = vmatprep.mubr.f32.mxu0 %v7236_v2  ;;  %v7403_v2 = vld [vmem:[#allocation2 + $0x170] sm:$0xff] }
 0x13a   : > { %1681 = vmatmul.mubr.f32.gmra.mrb[56].mxu0 %v7383_v52 }
 0x13b   : > { %1685 = vmatprep.mubr.f32.mxu0 %v7241_v6  ;;  %v1390_v6 = vld [vmem:[#allocation8 + $0x208] sm:$0xff] }
 0x13c   : > { %v5654_v12 = vpack.c.bf16 %v1390_v6, %v1389_v9  ;;  %v1409_v6 = vld [vmem:[#allocation8 + $0x2a0] sm:$0xff] }
 0x13e   : > { %1686 = vmatmul.mubr.f32.gmra.mrb[58].mxu0 %v7391_v56 }
 0x13f   : > { %1690 = vmatprep.mubr.f32.mxu0 %v7246_v10  ;;  %v589_v10 = vld [vmem:[#allocation2 + $0xa] sm:$0xff] }
 0x142   : > { %1691 = vmatmul.mubr.f32.gmra.mrb[60].mxu0 %v7399_v60 }
 0x143   : > { %1695 = vmatprep.mubr.f32.mxu0 %v7251_v14  ;;  %v1393_v14 = vld [vmem:[#allocation8 + $0x220] sm:$0xff] }
 0x146   : > { %1696 = vmatmul.mubr.f32.gmra.mrb[62].mxu0 %v7403_v2 }
 0x147   : > { %1765 = vmatprep.mubr.f32.mxu0 %v7261_v46  ;;  %v5660_v46 = vpack.c.bf16 %v1394_v22, %v1393_v14  ;;  %v7458_v14 = vld [vmem:[#allocation2 + $0x92] sm:$0xff] }
 0x14a   : > { %1766 = vmatmul.mubr.f32.vlgmr.msra.gmra.mrb[0].mxu0 %v588_v20  ;;  %v7448_v20 = vld [vmem:[#allocation2 + $0x7a] sm:$0xff] }
 0x14b   : > { %5655 = vmatpush1.bf16.msra.mxu0 %v5654_v12  ;;  %1770 = vmatprep.mubr.f32.mxu0 %v7266_v57  ;;  %v7415_v57 = vld [vmem:[#allocation2 + $0x22] sm:$0xff] }
 0x14c   : > { %5656 = vmatprep.subr.bf16.mxu0 %v8598_v0 }
 0x14e   : > { %1771 = vmatmul.mubr.f32.gmra.mrb[2].mxu0 %v589_v10 }
 0x14f   : > { %1775 = vmatprep.mubr.f32.mxu0 %v7271_v59  ;;  %5658 = vmatpush1.bf16.msra.mxu0 %v5657_v16  ;;  %v1398_v59 = vld [vmem:[#allocation8 + $0x248] sm:$0xff]  ;;  %v1413_v16 = vld [vmem:[#allocation8 + $0x2c0] sm:$0xff] }
 0x150   : > { %5659 = vmatprep.subr.bf16.mxu0 %v8598_v0  ;;  %v5666_v37 = vpack.c.bf16 %v1398_v59, %v1397_v34  ;;  %v7468_v34 = vld [vmem:[#allocation2 + $0xaa] sm:$0xff] }
 0x152   : > { %1776 = vmatmul.mubr.f32.gmra.mrb[4].mxu0 %v7410_v23 }
 0x153   : > { %1780 = vmatprep.mubr.f32.mxu0 %v7279_v3  ;;  %5661 = vmatpush1.bf16.msra.mxu0 %v5660_v46  ;;  %v7423_v3 = vld [vmem:[#allocation2 + $0x3a] sm:$0xff] }
 0x154   : > { %5662 = vmatprep.subr.bf16.mxu0 %v8598_v0  ;;  %v1415_v46 = vld [vmem:[#allocation8 + $0x2d0] sm:$0xff] }
 0x156   : > { %1781 = vmatmul.mubr.f32.gmra.mrb[6].mxu0 %v7415_v57 }
 0x157   : > { %1785 = vmatprep.mubr.f32.mxu0 %v7284_v7  ;;  %5664 = vmatpush1.bf16.msra.mxu0 %v5663_v26  ;;  %v7428_v7 = vld [vmem:[#allocation2 + $0x4a] sm:$0xff] }
 0x158   : > { %5665 = vmatprep.subr.bf16.mxu0 %v8598_v0  ;;  %v1417_v26 = vld [vmem:[#allocation8 + $0x2e0] sm:$0xff] }
 0x15a   : > { %1786 = vmatmul.mubr.f32.gmra.mrb[8].mxu0 %v7273_v62 }
 0x15b   : > { %1790 = vmatprep.mubr.f32.mxu0 %v7289_v11  ;;  %5667 = vmatpush1.bf16.msra.mxu0 %v5666_v37  ;;  %v1404_v11 = vld [vmem:[#allocation8 + $0x278] sm:$0xff]  ;;  %v1419_v37 = vld [vmem:[#allocation8 + $0x2f0] sm:$0xff] }
 0x15c   : > { %5668 = vmatprep.subr.bf16.mxu0 %v8598_v0  ;;  %v5675_v1 = vpack.c.bf16 %v1404_v11, %v1403_v29  ;;  %v1456_v29 = vld [vmem:[#allocation8 + $0x418] sm:$0xff] }
 0x15e   : > { %1791 = vmatmul.mubr.f32.gmra.mrb[10].mxu0 %v7423_v3 }
 0x15f   : > { %1795 = vmatprep.mubr.f32.mxu0 %v7294_v15  ;;  %5670 = vmatpush1.bf16.msra.mxu0 %v5669_v43  ;;  %v1406_v15 = vld [vmem:[#allocation8 + $0x288] sm:$0xff] }
 0x160   : > { %5671 = vmatprep.subr.bf16.mxu0 %v8598_v0  ;;  %v5678_v18 = vpack.c.bf16 %v1406_v15, %v1405_v30  ;;  %v7487_v43 = vld [vmem:[#allocation2 + $0xda] sm:$0xff] }
 0x161   : > { %v1458_v30 = vld [vmem:[#allocation8 + $0x428] sm:$0xff] }
 0x162   : > { %1796 = vmatmul.mubr.f32.gmra.mrb[12].mxu0 %v7428_v7 }
 0x163   : > { %1800 = vmatprep.mubr.f32.mxu0 %v7299_v24  ;;  %5673 = vmatpush1.bf16.msra.mxu0 %v5672_v53  ;;  %v1408_v24 = vld [vmem:[#allocation8 + $0x298] sm:$0xff] }
 0x164   : > { %5674 = vmatprep.subr.bf16.mxu0 %v8598_v0  ;;  %v5681_v9 = vpack.c.bf16 %v1408_v24, %v1407_v32  ;;  %v1460_v32 = vld [vmem:[#allocation8 + $0x438] sm:$0xff] }
 0x166   : > { %1801 = vmatmul.mubr.f32.gmra.mrb[14].mxu0 %v7433_v58 }
 0x167   : > { %1805 = vmatprep.mubr.f32.mxu0 %v7304_v33  ;;  %5676 = vmatpush1.bf16.msra.mxu0 %v5675_v1  ;;  %v1410_v33 = vld [vmem:[#allocation8 + $0x2a8] sm:$0xff]  ;;  %v1457_v1 = vld [vmem:[#allocation8 + $0x420] sm:$0xff] }
 0x168   : > { %5677 = vmatprep.subr.bf16.mxu0 %v8598_v0  ;;  %v5684_v12 = vpack.c.bf16 %v1410_v33, %v1409_v6  ;;  %v5757_v15 = vpack.c.bf16 %v1458_v30, %v1457_v1  ;;  %v1462_v6 = vld [vmem:[#allocation8 + $0x448] sm:$0xff] }
 0x169   : > { %v7562_v1 = vld [vmem:[#allocation2 + $0x31] sm:$0xff] }
 0x16a   : > { %1806 = vmatmul.mubr.f32.gmra.mrb[16].mxu0 %v7438_v61  ;;  %8654 = vst [vmem:[#allocation21_spill] sm:$0xff] %v7562_v1 }
 0x16b   : > { %1810 = vmatprep.mubr.f32.mxu0 %v7309_v39  ;;  %5679 = vmatpush1.bf16.msra.mxu0 %v5678_v18  ;;  %v1412_v39 = vld [vmem:[#allocation8 + $0x2b8] sm:$0xff]  ;;  %v1459_v18 = vld [vmem:[#allocation8 + $0x430] sm:$0xff] }
 0x16c   : > { %5680 = vmatprep.subr.bf16.mxu0 %v8598_v0  ;;  %v5687_v10 = vpack.c.bf16 %v1412_v39, %v1411_v13  ;;  %v5761_v24 = vpack.c.bf16 %v1460_v32, %v1459_v18  ;;  %v1464_v13 = vld [vmem:[#allocation8 + $0x458] sm:$0xff]  ;;  %v7533_v39 = vld [vmem:[#allocation2 + $0x180] sm:$0xff] }
 0x16d   : > { %v7569_v18 = vld [vmem:[#allocation2 + $0x39] sm:$0xff] }
 0x16e   : > { %1811 = vmatmul.mubr.f32.gmra.mrb[18].mxu0 %v7443_v19  ;;  %8655 = vst [vmem:[#allocation22_spill] sm:$0xff] %v7569_v18 }
 0x16f   : > { %1815 = vmatprep.mubr.f32.mxu0 %v7314_v45  ;;  %5682 = vmatpush1.bf16.msra.mxu0 %v5681_v9  ;;  %v1414_v45 = vld [vmem:[#allocation8 + $0x2c8] sm:$0xff]  ;;  %v1461_v9 = vld [vmem:[#allocation8 + $0x440] sm:$0xff] }
 0x170   : > { %5683 = vmatprep.subr.bf16.mxu0 %v8598_v0  ;;  %v5690_v22 = vpack.c.bf16 %v1414_v45, %v1413_v16  ;;  %v5765_v33 = vpack.c.bf16 %v1462_v6, %v1461_v9  ;;  %v1465_v16 = vld [vmem:[#allocation8 + $0x460] sm:$0xff]  ;;  %v1466_v45 = vld [vmem:[#allocation8 + $0x468] sm:$0xff] }
 0x171   : > { %v7576_v9 = vld [vmem:[#allocation2 + $0x49] sm:$0xff] }
 0x172   : > { %1816 = vmatmul.mubr.f32.gmra.mrb[20].mxu0 %v7448_v20  ;;  %8656 = vst [vmem:[#allocation23_spill] sm:$0xff] %v7576_v9 }
 0x173   : > { %1820 = vmatprep.mubr.f32.mxu0 %v7319_v54  ;;  %5685 = vmatpush1.bf16.msra.mxu0 %v5684_v12  ;;  %v1416_v54 = vld [vmem:[#allocation8 + $0x2d8] sm:$0xff]  ;;  %v1463_v12 = vld [vmem:[#allocation8 + $0x450] sm:$0xff] }
 0x174   : > { %5686 = vmatprep.subr.bf16.mxu0 %v8598_v0  ;;  %v5693_v31 = vpack.c.bf16 %v1416_v54, %v1415_v46  ;;  %v7543_v46 = vld [vmem:[#allocation2 + $0x172] sm:$0xff]  ;;  %v1467_v54 = vld [vmem:[#allocation8 + $0x470] sm:$0xff] }
 0x176   : > { %1821 = vmatmul.mubr.f32.gmra.mrb[22].mxu0 %v7453_v21 }
 0x177   : > { %1825 = vmatprep.mubr.f32.mxu0 %v7324_v17  ;;  %5688 = vmatpush1.bf16.msra.mxu0 %v5687_v10  ;;  %v1418_v17 = vld [vmem:[#allocation8 + $0x2e8] sm:$0xff]  ;;  %v5769_v10 = vpack.c.bf16 %v1464_v13, %v1463_v12 }
 0x178   : > { %5689 = vmatprep.subr.bf16.mxu0 %v8598_v0  ;;  %v5696_v59 = vpack.c.bf16 %v1418_v17, %v1417_v26  ;;  %v1421_v26 = vld [vmem:[#allocation8 + $0x300] sm:$0xff]  ;;  %v1422_v17 = vld [vmem:[#allocation8 + $0x308] sm:$0xff] }
 0x179   : > { %v7583_v12 = vld [vmem:[#allocation2 + $0x51] sm:$0xff] }
 0x17a   : > { %1826 = vmatmul.mubr.f32.gmra.mrb[24].mxu0 %v7458_v14  ;;  %8657 = vst [vmem:[#allocation24_spill] sm:$0xff] %v7583_v12 }
 0x17b   : > { %1830 = vmatprep.mubr.f32.mxu0 %v7329_v63  ;;  %5691 = vmatpush1.bf16.msra.mxu0 %v5690_v22  ;;  %v1420_v63 = vld [vmem:[#allocation8 + $0x2f8] sm:$0xff] }
 0x17c   : > { %5692 = vmatprep.subr.bf16.mxu0 %v8598_v0  ;;  %v5699_v40 = vpack.c.bf16 %v1420_v63, %v1419_v37  ;;  %v7539_v22 = vld [vmem:[#allocation2 + $0x188] sm:$0xff]  ;;  %v5702_v37 = vpack.c.bf16 %v1422_v17, %v1421_v26  ;;  %v1423_v63 = vld [vmem:[#allocation8 + $0x310] sm:$0xff] }
 0x17d   : > { %v1440_v26 = vld [vmem:[#allocation8 + $0x398] sm:$0xff]  ;;  %v7604_v17 = vld [vmem:[#allocation2 + $0x79] sm:$0xff] }
 0x17e   : > { %1831 = vmatmul.mubr.f32.gmra.mrb[26].mxu0 %v7463_v25  ;;  %8660 = vst [vmem:[#allocation27_spill] sm:$0xff] %v7604_v17 }
 0x17f   : > { %1835 = vmatprep.mubr.f32.mxu0 %v7334_v35  ;;  %5694 = vmatpush1.bf16.msra.mxu0 %v5693_v31  ;;  %v7478_v35 = vld [vmem:[#allocation2 + $0xc2] sm:$0xff] }
 0x180   : > { %5695 = vmatprep.subr.bf16.mxu0 %v8598_v0  ;;  %v1468_v31 = vld [vmem:[#allocation8 + $0x478] sm:$0xff] }
 0x182   : > { %1836 = vmatmul.mubr.f32.gmra.mrb[28].mxu0 %v7468_v34 }
 0x183   : > { %1840 = vmatprep.mubr.f32.mxu0 %v7339_v36  ;;  %5697 = vmatpush1.bf16.msra.mxu0 %v5696_v59  ;;  %v7483_v36 = vld [vmem:[#allocation2 + $0xca] sm:$0xff]  ;;  %v5777_v59 = vpack.c.bf16 %v1468_v31, %v1467_v54 }
 0x184   : > { %5698 = vmatprep.subr.bf16.mxu0 %v8598_v0  ;;  %v7597_v54 = vld [vmem:[#allocation2 + $0x69] sm:$0xff] }
 0x185   : > { %8659 = vst [vmem:[#allocation26_spill] sm:$0xff] %v7597_v54 }
 0x186   : > { %1841 = vmatmul.mubr.f32.gmra.mrb[30].mxu0 %v7473_v27 }
 0x187   : > { %1845 = vmatprep.mubr.f32.mxu0 %v7343_v4  ;;  %5700 = vmatpush1.bf16.msra.mxu0 %v5699_v40  ;;  %v7491_v4 = vld [vmem:[#allocation2 + $0xe2] sm:$0xff] }
 0x188   : > { %5701 = vmatprep.subr.bf16.mxu0 %v8598_v0  ;;  %v1424_v40 = vld [vmem:[#allocation8 + $0x318] sm:$0xff] }
 0x18a   : > { %1846 = vmatmul.mubr.f32.gmra.mrb[32].mxu0 %v7478_v35 }
 0x18b   : > { %1850 = vmatprep.mubr.f32.mxu0 %v7347_v38  ;;  %v7499_v38 = vld [vmem:[#allocation2 + $0xfa] sm:$0xff] }
 0x18e   : > { %1851 = vmatmul.mubr.f32.gmra.mrb[34].mxu0 %v7483_v36 }
 0x18f   : > { %1855 = vmatprep.mubr.f32.mxu0 %v7351_v5  ;;  %v7503_v5 = vld [vmem:[#allocation2 + $0x10a] sm:$0xff] }
 0x192   : > { %1856 = vmatmul.mubr.f32.gmra.mrb[36].mxu0 %v7487_v43 }
 0x193   : > { %1860 = vmatprep.mubr.f32.mxu0 %v7355_v41  ;;  %v7507_v41 = vld [vmem:[#allocation2 + $0x112] sm:$0xff] }
 0x196   : > { %1861 = vmatmul.mubr.f32.gmra.mrb[38].mxu0 %v7491_v4 }
 0x197   : > { %1865 = vmatprep.mubr.f32.mxu0 %v7359_v42  ;;  %v7511_v42 = vld [vmem:[#allocation2 + $0x122] sm:$0xff] }
 0x19a   : > { %1866 = vmatmul.mubr.f32.gmra.mrb[40].mxu0 %v7495_v28 }
 0x19b   : > { %1870 = vmatprep.mubr.f32.mxu0 %v7363_v44  ;;  %v1453_v44 = vld [vmem:[#allocation8 + $0x400] sm:$0xff] }
 0x19c   : > { %v5749_v53 = vpack.c.bf16 %v1454_v50, %v1453_v44  ;;  %v7548_v44 = vld [vmem:[#allocation2 + $0x19] sm:$0xff]  ;;  %v5705_v50 = vpack.c.bf16 %v1424_v40, %v1423_v63  ;;  %v7611_v63 = vld [vmem:[#allocation2 + $0x81] sm:$0xff] }
 0x19d   : > { %8652 = vst [vmem:[#allocation19_spill] sm:$0xff] %v7548_v44  ;;  %8661 = vst [vmem:[#allocation28_spill] sm:$0xff] %v7611_v63 }
 0x19e   : > { %1871 = vmatmul.mubr.f32.gmra.mrb[42].mxu0 %v7499_v38  ;;  %5750 = vmatprep.subr.bf16.mxu1 %v5749_v53 }
 0x19f   : > { %1875 = vmatprep.mubr.f32.mxu0 %v7367_v47  ;;  %v7515_v47 = vld [vmem:[#allocation2 + $0x12a] sm:$0xff]  ;;  %5752 = vmatpush3.bf16.msra.mxu1 %v5749_v53 }
 0x1a0   : > { %v1425_v53 = vld [vmem:[#allocation8 + $0x320] sm:$0xff] }
 0x1a2   : > { %1876 = vmatmul.mubr.f32.gmra.mrb[44].mxu0 %v7503_v5 }
 0x1a3   : > { %1880 = vmatprep.mubr.f32.mxu0 %v7371_v48  ;;  %v1455_v48 = vld [vmem:[#allocation8 + $0x410] sm:$0xff] }
 0x1a4   : > { %v5753_v11 = vpack.c.bf16 %v1456_v29, %v1455_v48  ;;  %v7555_v48 = vld [vmem:[#allocation2 + $0x21] sm:$0xff] }
 0x1a5   : > { %8653 = vst [vmem:[#allocation20_spill] sm:$0xff] %v7555_v48 }
 0x1a6   : > { %1881 = vmatmul.mubr.f32.gmra.mrb[46].mxu0 %v7507_v41  ;;  %5754 = vmatprep.subr.bf16.mxu1 %v5753_v11 }
 0x1a7   : > { %1885 = vmatprep.mubr.f32.mxu0 %v7375_v49  ;;  %v7519_v49 = vld [vmem:[#allocation2 + $0x13a] sm:$0xff]  ;;  %5756 = vmatpush3.bf16.msra.mxu1 %v5753_v11  ;;  %v1428_v11 = vld [vmem:[#allocation8 + $0x338] sm:$0xff] }
 0x1a8   : > { %5758 = vmatprep.subr.bf16.mxu1 %v5757_v15 }
 0x1aa   : > { %1886 = vmatmul.mubr.f32.gmra.mrb[48].mxu0 %v7511_v42 }
 0x1ab   : > { %1890 = vmatprep.mubr.f32.mxu0 %v7379_v51  ;;  %v7523_v51 = vld [vmem:[#allocation2 + $0x142] sm:$0xff]  ;;  %5760 = vmatpush3.bf16.msra.mxu1 %v5757_v15  ;;  %v1430_v15 = vld [vmem:[#allocation8 + $0x348] sm:$0xff] }
 0x1ac   : > { %5762 = vmatprep.subr.bf16.mxu1 %v5761_v24 }
 0x1ae   : > { %1891 = vmatmul.mubr.f32.gmra.mrb[50].mxu0 %v7515_v47 }
 0x1af   : > { %1895 = vmatprep.mubr.f32.mxu0 %v7383_v52  ;;  %v7527_v52 = vld [vmem:[#allocation2 + $0x152] sm:$0xff]  ;;  %5764 = vmatpush3.bf16.msra.mxu1 %v5761_v24  ;;  %v1432_v24 = vld [vmem:[#allocation8 + $0x358] sm:$0xff] }
 0x1b0   : > { %5766 = vmatprep.subr.bf16.mxu1 %v5765_v33 }
 0x1b2   : > { %1896 = vmatmul.mubr.f32.gmra.mrb[52].mxu0 %v7519_v49 }
 0x1b3   : > { %1900 = vmatprep.mubr.f32.mxu0 %v7391_v56  ;;  %v7531_v56 = vld [vmem:[#allocation2 + $0x15a] sm:$0xff]  ;;  %5768 = vmatpush3.bf16.msra.mxu1 %v5765_v33 }
 0x1b4   : > { %5770 = vmatprep.subr.bf16.mxu1 %v5769_v10  ;;  %v1434_v33 = vld [vmem:[#allocation8 + $0x368] sm:$0xff] }
 0x1b6   : > { %1901 = vmatmul.mubr.f32.gmra.mrb[54].mxu0 %v7523_v51 }
 0x1b7   : > { %1905 = vmatprep.mubr.f32.mxu0 %v7399_v60  ;;  %v7537_v60 = vld [vmem:[#allocation2 + $0x16a] sm:$0xff]  ;;  %5772 = vmatpush3.bf16.msra.mxu1 %v5769_v10 }
 0x1b8   : > { %v1436_v10 = vld [vmem:[#allocation8 + $0x378] sm:$0xff] }
 0x1ba   : > { %1906 = vmatmul.mubr.f32.gmra.mrb[56].mxu0 %v7527_v52 }
 0x1bb   : > { %1910 = vmatprep.mubr.f32.mxu0 %v7403_v2  ;;  %v5773_v2 = vpack.c.bf16 %v1466_v45, %v1465_v16  ;;  %v7590_v16 = vld [vmem:[#allocation2 + $0x61] sm:$0xff] }
 0x1bc   : > { %8658 = vst [vmem:[#allocation25_spill] sm:$0xff] %v7590_v16 }
 0x1bd   : > { %5774 = vmatprep.subr.bf16.mxu1 %v5773_v2 }
 0x1be   : > { %1911 = vmatmul.mubr.f32.gmra.mrb[58].mxu0 %v7531_v56  ;;  %5776 = vmatpush3.bf16.msra.mxu1 %v5773_v2  ;;  %v1438_v2 = vld [vmem:[#allocation8 + $0x388] sm:$0xff] }
 0x1bf   : > { %1915 = vmatprep.mubr.f32.mxu0 %v7533_v39  ;;  %5778 = vmatprep.subr.bf16.mxu1 %v5777_v59 }
 0x1c2   : > { %1916 = vmatmul.mubr.f32.gmra.mrb[60].mxu0 %v7537_v60  ;;  %5780 = vmatpush3.bf16.msra.mxu1 %v5777_v59 }
 0x1c3   : > { %1920 = vmatprep.mubr.f32.mxu0 %v7539_v22  ;;  %5781 = vmatprep.subr.bf16.mxu1 %v8598_v0 }
 0x1c5   : > { %5386 = vmatmul.mubr.f32.vlgmr.msra.gmra.mrb[0].mxu1 %v7423_v3 }
 0x1c6   : > { %1921 = vmatmul.mubr.f32.gmra.mrb[62].mxu0 %v7543_v46  ;;  %5388 = vmatprep.mubr.f32.mxu1 %v7428_v7 }
 0x1c7   : > { %1990 = vmatprep.mubr.f32.mxu0 %v7410_v23  ;;  %v1426_v23 = vld [vmem:[#allocation8 + $0x328] sm:$0xff] }
 0x1c8   : > { %v5708_v29 = vpack.c.bf16 %v1426_v23, %v1425_v53  ;;  %v7618_v53 = vld [vmem:[#allocation2 + $0x91] sm:$0xff] }
 0x1c9   : > { %5389 = vmatmul.mubr.f32.gmra.mrb[2].mxu1 %v7433_v58  ;;  %8662 = vst [vmem:[#allocation29_spill] sm:$0xff] %v7618_v53 }
 0x1ca   : > { %1991 = vmatmul.mubr.f32.vlgmr.msra.gmra.mrb[0].mxu0 %v7548_v44  ;;  %5391 = vmatprep.mubr.f32.mxu1 %v7438_v61 }
 0x1cb   : > { %5703 = vmatpush1.bf16.msra.mxu0 %v5702_v37  ;;  %1995 = vmatprep.mubr.f32.mxu0 %v7415_v57  ;;  %v1427_v57 = vld [vmem:[#allocation8 + $0x330] sm:$0xff]  ;;  %v1442_v37 = vld [vmem:[#allocation8 + $0x3a8] sm:$0xff] }
 0x1cc   : > { %5704 = vmatprep.subr.bf16.mxu0 %v8598_v0  ;;  %v5711_v30 = vpack.c.bf16 %v1428_v11, %v1427_v57  ;;  %v7625_v57 = vld [vmem:[#allocation2 + $0x99] sm:$0xff] }
 0x1cd   : > { %5392 = vmatmul.mubr.f32.gmra.mrb[4].mxu1 %v7443_v19  ;;  %8663 = vst [vmem:[#allocation30_spill] sm:$0xff] %v7625_v57 }
 0x1ce   : > { %1996 = vmatmul.mubr.f32.gmra.mrb[2].mxu0 %v7555_v48  ;;  %5394 = vmatprep.mubr.f32.mxu1 %v7448_v20 }
 0x1cf   : > { %2000 = vmatprep.mubr.f32.mxu0 %v7273_v62  ;;  %5706 = vmatpush1.bf16.msra.mxu0 %v5705_v50  ;;  %v1429_v62 = vld [vmem:[#allocation8 + $0x340] sm:$0xff]  ;;  %v1444_v50 = vld [vmem:[#allocation8 + $0x3b8] sm:$0xff] }
 0x1d0   : > { %5707 = vmatprep.subr.bf16.mxu0 %v8598_v0  ;;  %v5714_v32 = vpack.c.bf16 %v1430_v15, %v1429_v62  ;;  %v7632_v62 = vld [vmem:[#allocation2 + $0xa9] sm:$0xff] }
 0x1d1   : > { %5395 = vmatmul.mubr.f32.gmra.mrb[6].mxu1 %v7453_v21  ;;  %8664 = vst [vmem:[#allocation31_spill] sm:$0xff] %v7632_v62 }
 0x1d2   : > { %2001 = vmatmul.mubr.f32.gmra.mrb[4].mxu0 %v7562_v1  ;;  %5397 = vmatprep.mubr.f32.mxu1 %v7458_v14 }
 0x1d3   : > { %2005 = vmatprep.mubr.f32.mxu0 %v7423_v3  ;;  %5709 = vmatpush1.bf16.msra.mxu0 %v5708_v29  ;;  %v1431_v3 = vld [vmem:[#allocation8 + $0x350] sm:$0xff]  ;;  %v1446_v29 = vld [vmem:[#allocation8 + $0x3c8] sm:$0xff] }
 0x1d4   : > { %5710 = vmatprep.subr.bf16.mxu0 %v8598_v0  ;;  %v5717_v6 = vpack.c.bf16 %v1432_v24, %v1431_v3  ;;  %v7639_v3 = vld [vmem:[#allocation2 + $0xb1] sm:$0xff] }
 0x1d5   : > { %5398 = vmatmul.mubr.f32.gmra.mrb[8].mxu1 %v7463_v25  ;;  %8665 = vst [vmem:[#allocation32_spill] sm:$0xff] %v7639_v3 }
 0x1d6   : > { %2006 = vmatmul.mubr.f32.gmra.mrb[6].mxu0 %v7569_v18  ;;  %5400 = vmatprep.mubr.f32.mxu1 %v7468_v34 }
 0x1d7   : > { %2010 = vmatprep.mubr.f32.mxu0 %v7428_v7  ;;  %5712 = vmatpush1.bf16.msra.mxu0 %v5711_v30  ;;  %v1433_v7 = vld [vmem:[#allocation8 + $0x360] sm:$0xff]  ;;  %v1448_v30 = vld [vmem:[#allocation8 + $0x3d8] sm:$0xff] }
 0x1d8   : > { %5713 = vmatprep.subr.bf16.mxu0 %v8598_v0  ;;  %v5720_v13 = vpack.c.bf16 %v1434_v33, %v1433_v7  ;;  %v1452_v7 = vld [vmem:[#allocation8 + $0x3f8] sm:$0xff] }
 0x1d9   : > { %5401 = vmatmul.mubr.f32.gmra.mrb[10].mxu1 %v7473_v27  ;;  %v811_v33 = vld [vmem:[#allocation2 + $0x18a] sm:$0xff] }
 0x1da   : > { %2011 = vmatmul.mubr.f32.gmra.mrb[8].mxu0 %v7576_v9  ;;  %5403 = vmatprep.mubr.f32.mxu1 %v7478_v35 }
 0x1db   : > { %2015 = vmatprep.mubr.f32.mxu0 %v7433_v58  ;;  %5715 = vmatpush1.bf16.msra.mxu0 %v5714_v32  ;;  %v1435_v58 = vld [vmem:[#allocation8 + $0x370] sm:$0xff]  ;;  %v1450_v32 = vld [vmem:[#allocation8 + $0x3e8] sm:$0xff] }
 0x1dc   : > { %5716 = vmatprep.subr.bf16.mxu0 %v8598_v0  ;;  %v5723_v45 = vpack.c.bf16 %v1436_v10, %v1435_v58  ;;  %v7654_v10 = vld [vmem:[#allocation2 + $0xd9] sm:$0xff] }
 0x1dd   : > { %5404 = vmatmul.mubr.f32.gmra.mrb[12].mxu1 %v7483_v36  ;;  %8668 = vst [vmem:[#allocation35_spill] sm:$0xff] %v7654_v10 }
 0x1de   : > { %2016 = vmatmul.mubr.f32.gmra.mrb[10].mxu0 %v7583_v12  ;;  %5406 = vmatprep.mubr.f32.mxu1 %v7487_v43 }
 0x1df   : > { %2020 = vmatprep.mubr.f32.mxu0 %v7438_v61  ;;  %5718 = vmatpush1.bf16.msra.mxu0 %v5717_v6  ;;  %v1437_v61 = vld [vmem:[#allocation8 + $0x380] sm:$0xff]  ;;  %v810_v6 = vld [vmem:[#allocation2 + $0x182] sm:$0xff] }
 0x1e0   : > { %5719 = vmatprep.subr.bf16.mxu0 %v8598_v0  ;;  %v5726_v31 = vpack.c.bf16 %v1438_v2, %v1437_v61  ;;  %v7670_v61 = vld [vmem:[#allocation2 + $0x109] sm:$0xff]  ;;  %v909_v2 = vld [vmem:[#allocation2 + $0x31] sm:$0xff] }
 0x1e1   : > { %5407 = vmatmul.mubr.f32.gmra.mrb[14].mxu1 %v7491_v4  ;;  %8672 = vst [vmem:[#allocation39_spill] sm:$0xff] %v7670_v61 }
 0x1e2   : > { %2021 = vmatmul.mubr.f32.gmra.mrb[12].mxu0 %v7590_v16  ;;  %5409 = vmatprep.mubr.f32.mxu1 %v7495_v28 }
 0x1e3   : > { %2025 = vmatprep.mubr.f32.mxu0 %v7443_v19  ;;  %5721 = vmatpush1.bf16.msra.mxu0 %v5720_v13  ;;  %v1439_v19 = vld [vmem:[#allocation8 + $0x390] sm:$0xff] }
 0x1e4   : > { %5722 = vmatprep.subr.bf16.mxu0 %v8598_v0  ;;  %v5729_v59 = vpack.c.bf16 %v1440_v26, %v1439_v19  ;;  %v7645_v13 = vld [vmem:[#allocation2 + $0xc1] sm:$0xff] }
 0x1e5   : > { %5410 = vmatmul.mubr.f32.gmra.mrb[16].mxu1 %v7499_v38  ;;  %8666 = vst [vmem:[#allocation33_spill] sm:$0xff] %v7645_v13  ;;  %v3531_v19 = vld [vmem:[#allocation10 + $0x10] sm:$0xff] }
 0x1e6   : > { %2026 = vmatmul.mubr.f32.gmra.mrb[14].mxu0 %v7597_v54  ;;  %5412 = vmatprep.mubr.f32.mxu1 %v7503_v5 }
 0x1e7   : > { %2030 = vmatprep.mubr.f32.mxu0 %v7448_v20  ;;  %5724 = vmatpush1.bf16.msra.mxu0 %v5723_v45  ;;  %v1441_v20 = vld [vmem:[#allocation8 + $0x3a0] sm:$0xff]  ;;  %v7658_v45 = vld [vmem:[#allocation2 + $0xe1] sm:$0xff] }
 0x1e8   : > { %5725 = vmatprep.subr.bf16.mxu0 %v8598_v0  ;;  %v5732_v40 = vpack.c.bf16 %v1442_v37, %v1441_v20  ;;  %8669 = vst [vmem:[#allocation36_spill] sm:$0xff] %v7658_v45  ;;  %v910_v20 = vld [vmem:[#allocation2 + $0x39] sm:$0xff] }
 0x1e9   : > { %5413 = vmatmul.mubr.f32.gmra.mrb[18].mxu1 %v7507_v41 }
 0x1ea   : > { %2031 = vmatmul.mubr.f32.gmra.mrb[16].mxu0 %v7604_v17  ;;  %5415 = vmatprep.mubr.f32.mxu1 %v7511_v42 }
 0x1eb   : > { %2035 = vmatprep.mubr.f32.mxu0 %v7453_v21  ;;  %5727 = vmatpush1.bf16.msra.mxu0 %v5726_v31  ;;  %v1443_v21 = vld [vmem:[#allocation8 + $0x3b0] sm:$0xff]  ;;  %v3530_v31 = vld [vmem:[#allocation10 + $0x8] sm:$0xff] }
 0x1ec   : > { %5728 = vmatprep.subr.bf16.mxu0 %v8598_v0  ;;  %v5735_v23 = vpack.c.bf16 %v1444_v50, %v1443_v21  ;;  %v846_v21 = vld [vmem:[#allocation2 + $0x38] sm:$0xff]  ;;  %v911_v50 = vld [vmem:[#allocation2 + $0x49] sm:$0xff] }
 0x1ed   : > { %5416 = vmatmul.mubr.f32.gmra.mrb[20].mxu1 %v7515_v47 }
 0x1ee   : > { %2036 = vmatmul.mubr.f32.gmra.mrb[18].mxu0 %v7611_v63  ;;  %5418 = vmatprep.mubr.f32.mxu1 %v7519_v49 }
 0x1ef   : > { %2040 = vmatprep.mubr.f32.mxu0 %v7458_v14  ;;  %5730 = vmatpush1.bf16.msra.mxu0 %v5729_v59  ;;  %v1445_v14 = vld [vmem:[#allocation8 + $0x3c0] sm:$0xff]  ;;  %v3532_v59 = vld [vmem:[#allocation10 + $0x18] sm:$0xff] }
 0x1f0   : > { %5731 = vmatprep.subr.bf16.mxu0 %v8598_v0  ;;  %v5738_v11 = vpack.c.bf16 %v1446_v29, %v1445_v14  ;;  %v5785_v37 = vpack.c.bf16 %v3532_v59, %v3531_v19  ;;  %v3536_v14 = vld [vmem:[#allocation10 + $0x38] sm:$0xff]  ;;  %v3657_v29 = vld [vmem:[#allocation10 + $0x400] sm:$0xff]  ;;  %v3543_v59 = vld [vmem:[#allocation10 + $0x70] sm:$0xff] }
 0x1f1   : > { %5419 = vmatmul.mubr.f32.gmra.mrb[22].mxu1 %v7523_v51  ;;  %v850_v19 = vld [vmem:[#allocation2 + $0x68] sm:$0xff] }
 0x1f2   : > { %2041 = vmatmul.mubr.f32.gmra.mrb[20].mxu0 %v7618_v53  ;;  %5421 = vmatprep.mubr.f32.mxu1 %v7527_v52 }
 0x1f3   : > { %2045 = vmatprep.mubr.f32.mxu0 %v7463_v25  ;;  %5733 = vmatpush1.bf16.msra.mxu0 %v5732_v40  ;;  %v1447_v25 = vld [vmem:[#allocation8 + $0x3d0] sm:$0xff]  ;;  %v3534_v40 = vld [vmem:[#allocation10 + $0x28] sm:$0xff] }
 0x1f4   : > { %5734 = vmatprep.subr.bf16.mxu0 %v8598_v0  ;;  %v5741_v15 = vpack.c.bf16 %v1448_v30, %v1447_v25  ;;  %v3658_v25 = vld [vmem:[#allocation10 + $0x408] sm:$0xff] }
 0x1f5   : > { %5422 = vmatmul.mubr.f32.gmra.mrb[24].mxu1 %v7531_v56  ;;  %v912_v30 = vld [vmem:[#allocation2 + $0x51] sm:$0xff] }
 0x1f6   : > { %2046 = vmatmul.mubr.f32.gmra.mrb[22].mxu0 %v7625_v57  ;;  %5424 = vmatprep.mubr.f32.mxu1 %v7537_v60 }
 0x1f7   : > { %2050 = vmatprep.mubr.f32.mxu0 %v7468_v34  ;;  %5736 = vmatpush1.bf16.msra.mxu0 %v5735_v23  ;;  %v1449_v34 = vld [vmem:[#allocation8 + $0x3e0] sm:$0xff]  ;;  %v3535_v23 = vld [vmem:[#allocation10 + $0x30] sm:$0xff] }
 0x1f8   : > { %5737 = vmatprep.subr.bf16.mxu0 %v8598_v0  ;;  %v5744_v24 = vpack.c.bf16 %v1450_v32, %v1449_v34  ;;  %v5791_v34 = vpack.c.bf16 %v3536_v14, %v3535_v23  ;;  %v3537_v32 = vld [vmem:[#allocation10 + $0x40] sm:$0xff] }
 0x1f9   : > { %5425 = vmatmul.mubr.f32.gmra.mrb[26].mxu1 %v7543_v46  ;;  %v917_v23 = vld [vmem:[#allocation2 + $0x91] sm:$0xff] }
 0x1fa   : > { %2051 = vmatmul.mubr.f32.gmra.mrb[24].mxu0 %v7632_v62  ;;  %5427 = vmatprep.mubr.f32.mxu1 %v810_v6 }
 0x1fb   : > { %2055 = vmatprep.mubr.f32.mxu0 %v7473_v27  ;;  %5739 = vmatpush1.bf16.msra.mxu0 %v5738_v11  ;;  %v1451_v27 = vld [vmem:[#allocation8 + $0x3f0] sm:$0xff]  ;;  %v847_v11 = vld [vmem:[#allocation2 + $0x48] sm:$0xff] }
 0x1fc   : > { %5740 = vmatprep.subr.bf16.mxu0 %v8598_v0  ;;  %v5747_v58 = vpack.c.bf16 %v1452_v7, %v1451_v27  ;;  %v913_v27 = vld [vmem:[#allocation2 + $0x61] sm:$0xff] }
 0x1fd   : > { %5428 = vmatmul.mubr.f32.gmra.mrb[28].mxu1 %v811_v33 }
 0x1fe   : > { %2056 = vmatmul.mubr.f32.gmra.mrb[26].mxu0 %v7639_v3 }
 0x1ff   : > { %2060 = vmatprep.mubr.f32.mxu0 %v7478_v35  ;;  %5742 = vmatpush1.bf16.msra.mxu0 %v5741_v15  ;;  %v7650_v35 = vld [vmem:[#allocation2 + $0xc9] sm:$0xff]  ;;  %v5973_v15 = vpack.c.bf16 %v3658_v25, %v3657_v29  ;;  %v3547_v29 = vld [vmem:[#allocation10 + $0x90] sm:$0xff] }
 0x200   : > { %5743 = vmatprep.subr.bf16.mxu0 %v8598_v0  ;;  %8667 = vst [vmem:[#allocation34_spill] sm:$0xff] %v7650_v35  ;;  %v853_v25 = vld [vmem:[#allocation2 + $0x90] sm:$0xff] }
 0x202   : > { %2061 = vmatmul.mubr.f32.gmra.mrb[28].mxu0 %v7645_v13 }
 0x203   : > { %2065 = vmatprep.mubr.f32.mxu0 %v7483_v36  ;;  %5745 = vmatpush1.bf16.msra.mxu0 %v5744_v24  ;;  %v7662_v36 = vld [vmem:[#allocation2 + $0xf1] sm:$0xff] }
 0x204   : > { %5746 = vmatprep.subr.bf16.mxu0 %v8598_v0  ;;  %8670 = vst [vmem:[#allocation37_spill] sm:$0xff] %v7662_v36  ;;  %v3538_v24 = vld [vmem:[#allocation10 + $0x48] sm:$0xff] }
 0x205   : > { %v5794_v7 = vpack.c.bf16 %v3538_v24, %v3537_v32  ;;  %v3550_v32 = vld [vmem:[#allocation10 + $0xa8] sm:$0xff] }
 0x206   : > { %2066 = vmatmul.mubr.f32.gmra.mrb[30].mxu0 %v7650_v35  ;;  %v854_v24 = vld [vmem:[#allocation2 + $0x98] sm:$0xff] }
 0x207   : > { %2070 = vmatprep.mubr.f32.mxu0 %v7487_v43  ;;  %5748 = vmatpush1.bf16.msra.mxu0 %v5747_v58  ;;  %v7666_v43 = vld [vmem:[#allocation2 + $0xf9] sm:$0xff]  ;;  %v3540_v58 = vld [vmem:[#allocation10 + $0x58] sm:$0xff] }
 0x208   : > { %8671 = vst [vmem:[#allocation38_spill] sm:$0xff] %v7666_v43  ;;  %5974 = vmatprep.subr.bf16.mxu0 %v5973_v15 }
 0x20a   : > { %2071 = vmatmul.mubr.f32.gmra.mrb[32].mxu0 %v7654_v10 }
 0x20b   : > { %2075 = vmatprep.mubr.f32.mxu0 %v7491_v4  ;;  %v7674_v4 = vld [vmem:[#allocation2 + $0x111] sm:$0xff] }
 0x20c   : > { %8673 = vst [vmem:[#allocation40_spill] sm:$0xff] %v7674_v4 }
 0x20e   : > { %2076 = vmatmul.mubr.f32.gmra.mrb[34].mxu0 %v7658_v45 }
 0x20f   : > { %2080 = vmatprep.mubr.f32.mxu0 %v7495_v28  ;;  %v7678_v28 = vld [vmem:[#allocation2 + $0x121] sm:$0xff] }
 0x210   : > { %8674 = vst [vmem:[#allocation41_spill] sm:$0xff] %v7678_v28 }
 0x212   : > { %2081 = vmatmul.mubr.f32.gmra.mrb[36].mxu0 %v7662_v36 }
 0x213   : > { %2085 = vmatprep.mubr.f32.mxu0 %v7499_v38  ;;  %v7682_v38 = vld [vmem:[#allocation2 + $0x129] sm:$0xff] }
 0x214   : > { %8675 = vst [vmem:[#allocation42_spill] sm:$0xff] %v7682_v38 }
 0x216   : > { %2086 = vmatmul.mubr.f32.gmra.mrb[38].mxu0 %v7666_v43 }
 0x217   : > { %2090 = vmatprep.mubr.f32.mxu0 %v7503_v5  ;;  %v7686_v5 = vld [vmem:[#allocation2 + $0x139] sm:$0xff] }
 0x218   : > { %8676 = vst [vmem:[#allocation43_spill] sm:$0xff] %v7686_v5 }
 0x21a   : > { %2091 = vmatmul.mubr.f32.gmra.mrb[40].mxu0 %v7670_v61 }
 0x21b   : > { %2095 = vmatprep.mubr.f32.mxu0 %v7507_v41  ;;  %v7690_v41 = vld [vmem:[#allocation2 + $0x141] sm:$0xff] }
 0x21c   : > { %8677 = vst [vmem:[#allocation44_spill] sm:$0xff] %v7690_v41 }
 0x21e   : > { %2096 = vmatmul.mubr.f32.gmra.mrb[42].mxu0 %v7674_v4  ;;  %v3592_v4 = vld [vmem:[#allocation10 + $0x1f8] sm:$0xff] }
 0x21f   : > { %2100 = vmatprep.mubr.f32.mxu0 %v7511_v42  ;;  %v7694_v42 = vld [vmem:[#allocation2 + $0x151] sm:$0xff] }
 0x220   : > { %8678 = vst [vmem:[#allocation45_spill] sm:$0xff] %v7694_v42 }
 0x222   : > { %2101 = vmatmul.mubr.f32.gmra.mrb[44].mxu0 %v7678_v28 }
 0x223   : > { %2105 = vmatprep.mubr.f32.mxu0 %v7515_v47  ;;  %v7698_v47 = vld [vmem:[#allocation2 + $0x159] sm:$0xff] }
 0x224   : > { %8679 = vst [vmem:[#allocation46_spill] sm:$0xff] %v7698_v47 }
 0x226   : > { %2106 = vmatmul.mubr.f32.gmra.mrb[46].mxu0 %v7682_v38  ;;  %v3590_v38 = vld [vmem:[#allocation10 + $0x1e8] sm:$0xff] }
 0x227   : > { %2110 = vmatprep.mubr.f32.mxu0 %v7519_v49  ;;  %v7702_v49 = vld [vmem:[#allocation2 + $0x169] sm:$0xff] }
 0x228   : > { %8680 = vst [vmem:[#allocation47_spill] sm:$0xff] %v7702_v49 }
 0x22a   : > { %2111 = vmatmul.mubr.f32.gmra.mrb[48].mxu0 %v7686_v5  ;;  %v3589_v5 = vld [vmem:[#allocation10 + $0x1e0] sm:$0xff] }
 0x22b   : > { %2115 = vmatprep.mubr.f32.mxu0 %v7523_v51  ;;  %v7706_v51 = vld [vmem:[#allocation2 + $0x171] sm:$0xff] }
 0x22c   : > { %8681 = vst [vmem:[#allocation48_spill] sm:$0xff] %v7706_v51 }
 0x22e   : > { %2116 = vmatmul.mubr.f32.gmra.mrb[50].mxu0 %v7690_v41  ;;  %v3587_v41 = vld [vmem:[#allocation10 + $0x1d0] sm:$0xff] }
 0x22f   : > { %2120 = vmatprep.mubr.f32.mxu0 %v7527_v52  ;;  %v1003_v52 = vld [vmem:[#allocation2 + $0x19a] sm:$0xff] }
 0x230   : > { %5430 = vmatprep.mubr.f32.mxu1 %v1003_v52  ;;  %v849_v52 = vld [vmem:[#allocation2 + $0x60] sm:$0xff] }
 0x232   : > { %2121 = vmatmul.mubr.f32.gmra.mrb[52].mxu0 %v7694_v42  ;;  %v3588_v42 = vld [vmem:[#allocation10 + $0x1d8] sm:$0xff] }
 0x233   : > { %2125 = vmatprep.mubr.f32.mxu0 %v7531_v56  ;;  %v1004_v56 = vld [vmem:[#allocation2 + $0x1a2] sm:$0xff] }
 0x234   : > { %5431 = vmatmul.mubr.f32.gmra.mrb[30].mxu1 %v1004_v56  ;;  %v914_v56 = vld [vmem:[#allocation2 + $0x69] sm:$0xff] }
 0x236   : > { %2126 = vmatmul.mubr.f32.gmra.mrb[54].mxu0 %v7698_v47  ;;  %v3586_v47 = vld [vmem:[#allocation10 + $0x1c8] sm:$0xff] }
 0x237   : > { %2130 = vmatprep.mubr.f32.mxu0 %v7537_v60  ;;  %v3529_v60 = vld [vmem:[#allocation10] sm:$0xff] }
 0x238   : > { %v5782_v26 = vpack.c.bf16 %v3530_v31, %v3529_v60  ;;  %v3541_v60 = vld [vmem:[#allocation10 + $0x60] sm:$0xff]  ;;  %v3542_v31 = vld [vmem:[#allocation10 + $0x68] sm:$0xff] }
 0x23a   : > { %2131 = vmatmul.mubr.f32.gmra.mrb[56].mxu0 %v7702_v49  ;;  %5783 = vmatpush1.bf16.msra.mxu1 %v5782_v26  ;;  %v5800_v26 = vpack.c.bf16 %v3542_v31, %v3541_v60  ;;  %v3554_v60 = vld [vmem:[#allocation10 + $0xc8] sm:$0xff]  ;;  %v856_v31 = vld [vmem:[#allocation2 + $0xb0] sm:$0xff] }
 0x23b   : > { %2135 = vmatprep.mubr.f32.mxu0 %v7543_v46  ;;  %v845_v46 = vld [vmem:[#allocation2 + $0x30] sm:$0xff]  ;;  %5784 = vmatprep.subr.bf16.mxu1 %v8598_v0 }
 0x23c   : > { %v3585_v49 = vld [vmem:[#allocation10 + $0x1c0] sm:$0xff] }
 0x23e   : > { %2136 = vmatmul.mubr.f32.gmra.mrb[58].mxu0 %v7706_v51  ;;  %5786 = vmatpush1.bf16.msra.mxu1 %v5785_v37  ;;  %v851_v37 = vld [vmem:[#allocation2 + $0x78] sm:$0xff]  ;;  %v3583_v51 = vld [vmem:[#allocation10 + $0x1b0] sm:$0xff] }
 0x23f   : > { %2140 = vmatprep.mubr.f32.mxu0 %v810_v6  ;;  %5787 = vmatprep.subr.bf16.mxu1 %v8598_v0  ;;  %v848_v6 = vld [vmem:[#allocation2 + $0x50] sm:$0xff] }
 0x242   : > { %2141 = vmatmul.mubr.f32.gmra.mrb[60].mxu0 %v7386_v55  ;;  %v3533_v55 = vld [vmem:[#allocation10 + $0x20] sm:$0xff] }
 0x243   : > { %2145 = vmatprep.mubr.f32.mxu0 %v811_v33  ;;  %v3539_v33 = vld [vmem:[#allocation10 + $0x50] sm:$0xff] }
 0x246   : > { %2146 = vmatmul.mubr.f32.gmra.mrb[62].mxu0 %v7394_v8  ;;  %v5788_v8 = vpack.c.bf16 %v3534_v40, %v3533_v55  ;;  %v916_v55 = vld [vmem:[#allocation2 + $0x81] sm:$0xff] }
 0x247   : > { %2215 = vmatprep.mubr.f32.mxu0 %v909_v2  ;;  %v5797_v2 = vpack.c.bf16 %v3540_v58, %v3539_v33  ;;  %v3552_v33 = vld [vmem:[#allocation10 + $0xb8] sm:$0xff] }
 0x248   : > { %5789 = vmatpush1.bf16.msra.mxu1 %v5788_v8  ;;  %v852_v8 = vld [vmem:[#allocation2 + $0x80] sm:$0xff]  ;;  %v855_v58 = vld [vmem:[#allocation2 + $0xa8] sm:$0xff] }
 0x249   : > { %5790 = vmatprep.subr.bf16.mxu1 %v8598_v0 }
 0x24a   : > { %2216 = vmatmul.mubr.f32.vlgmr.msra.gmra.mrb[0].mxu0 %v845_v46  ;;  %v915_v46 = vld [vmem:[#allocation2 + $0x79] sm:$0xff] }
 0x24b   : > { %2220 = vmatprep.mubr.f32.mxu0 %v910_v20  ;;  %5976 = vmatpush3.bf16.msra.mxu0 %v5973_v15  ;;  %v3544_v20 = vld [vmem:[#allocation10 + $0x78] sm:$0xff] }
 0x24c   : > { %5792 = vmatpush1.bf16.msra.mxu1 %v5791_v34  ;;  %v5803_v40 = vpack.c.bf16 %v3544_v20, %v3543_v59  ;;  %v3549_v34 = vld [vmem:[#allocation10 + $0xa0] sm:$0xff]  ;;  %v3556_v59 = vld [vmem:[#allocation10 + $0xd8] sm:$0xff]  ;;  %v857_v20 = vld [vmem:[#allocation2 + $0xc0] sm:$0xff] }
 0x24d   : > { %5793 = vmatprep.subr.bf16.mxu1 %v8598_v0 }
 0x24e   : > { %2221 = vmatmul.mubr.f32.gmra.mrb[2].mxu0 %v846_v21  ;;  %v3545_v21 = vld [vmem:[#allocation10 + $0x80] sm:$0xff] }
 0x24f   : > { %2225 = vmatprep.mubr.f32.mxu0 %v911_v50  ;;  %v3546_v50 = vld [vmem:[#allocation10 + $0x88] sm:$0xff] }
 0x250   : > { %5795 = vmatpush1.bf16.msra.mxu1 %v5794_v7  ;;  %v5806_v14 = vpack.c.bf16 %v3546_v50, %v3545_v21  ;;  %v3551_v7 = vld [vmem:[#allocation10 + $0xb0] sm:$0xff]  ;;  %v859_v50 = vld [vmem:[#allocation2 + $0xd8] sm:$0xff] }
 0x251   : > { %5796 = vmatprep.subr.bf16.mxu1 %v8598_v0  ;;  %v923_v21 = vld [vmem:[#allocation2 + $0xd9] sm:$0xff] }
 0x252   : > { %2226 = vmatmul.mubr.f32.gmra.mrb[4].mxu0 %v847_v11  ;;  %v3548_v11 = vld [vmem:[#allocation10 + $0x98] sm:$0xff] }
 0x253   : > { %2230 = vmatprep.mubr.f32.mxu0 %v912_v30  ;;  %v918_v30 = vld [vmem:[#allocation2 + $0x99] sm:$0xff]  ;;  %v5809_v15 = vpack.c.bf16 %v3548_v11, %v3547_v29  ;;  %v861_v29 = vld [vmem:[#allocation2 + $0xf0] sm:$0xff] }
 0x254   : > { %5798 = vmatpush1.bf16.msra.mxu1 %v5797_v2  ;;  %v3553_v2 = vld [vmem:[#allocation10 + $0xc0] sm:$0xff]  ;;  %v926_v11 = vld [vmem:[#allocation2 + $0xf9] sm:$0xff] }
 0x255   : > { %5799 = vmatprep.subr.bf16.mxu1 %v8598_v0 }
 0x256   : > { %2231 = vmatmul.mubr.f32.gmra.mrb[6].mxu0 %v848_v6  ;;  %v919_v6 = vld [vmem:[#allocation2 + $0xa9] sm:$0xff] }
 0x257   : > { %2235 = vmatprep.mubr.f32.mxu0 %v913_v27  ;;  %v5812_v27 = vpack.c.bf16 %v3550_v32, %v3549_v34  ;;  %v928_v34 = vld [vmem:[#allocation2 + $0x111] sm:$0xff] }
 0x258   : > { %5801 = vmatpush1.bf16.msra.mxu1 %v5800_v26  ;;  %v3555_v26 = vld [vmem:[#allocation10 + $0xd0] sm:$0xff]  ;;  %v864_v32 = vld [vmem:[#allocation2 + $0x110] sm:$0xff] }
 0x259   : > { %5802 = vmatprep.subr.bf16.mxu1 %v8598_v0 }
 0x25a   : > { %2236 = vmatmul.mubr.f32.gmra.mrb[8].mxu0 %v849_v52  ;;  %v920_v52 = vld [vmem:[#allocation2 + $0xb1] sm:$0xff] }
 0x25b   : > { %2240 = vmatprep.mubr.f32.mxu0 %v914_v56  ;;  %v5815_v56 = vpack.c.bf16 %v3552_v33, %v3551_v7  ;;  %v865_v33 = vld [vmem:[#allocation2 + $0x120] sm:$0xff] }
 0x25c   : > { %5804 = vmatpush1.bf16.msra.mxu1 %v5803_v40  ;;  %v858_v40 = vld [vmem:[#allocation2 + $0xc8] sm:$0xff] }
 0x25d   : > { %5805 = vmatprep.subr.bf16.mxu1 %v8598_v0 }
 0x25e   : > { %2241 = vmatmul.mubr.f32.gmra.mrb[10].mxu0 %v850_v19  ;;  %v921_v19 = vld [vmem:[#allocation2 + $0xc1] sm:$0xff] }
 0x25f   : > { %2245 = vmatprep.mubr.f32.mxu0 %v915_v46  ;;  %v5818_v46 = vpack.c.bf16 %v3554_v60, %v3553_v2  ;;  %v3659_v2 = vld [vmem:[#allocation10 + $0x410] sm:$0xff]  ;;  %v3660_v60 = vld [vmem:[#allocation10 + $0x418] sm:$0xff] }
 0x260   : > { %5807 = vmatpush1.bf16.msra.mxu1 %v5806_v14  ;;  %v925_v14 = vld [vmem:[#allocation2 + $0xf1] sm:$0xff] }
 0x261   : > { %5808 = vmatprep.subr.bf16.mxu1 %v8598_v0 }
 0x262   : > { %2246 = vmatmul.mubr.f32.gmra.mrb[12].mxu0 %v851_v37  ;;  %v922_v37 = vld [vmem:[#allocation2 + $0xc9] sm:$0xff] }
 0x263   : > { %2250 = vmatprep.mubr.f32.mxu0 %v916_v55  ;;  %v5821_v55 = vpack.c.bf16 %v3556_v59, %v3555_v26  ;;  %v931_v26 = vld [vmem:[#allocation2 + $0x139] sm:$0xff] }
 0x264   : > { %5810 = vmatpush1.bf16.msra.mxu1 %v5809_v15  ;;  %v863_v15 = vld [vmem:[#allocation2 + $0x108] sm:$0xff] }
 0x265   : > { %5811 = vmatprep.subr.bf16.mxu1 %v8598_v0 }
 0x266   : > { %2251 = vmatmul.mubr.f32.gmra.mrb[14].mxu0 %v852_v8  ;;  %v924_v8 = vld [vmem:[#allocation2 + $0xe1] sm:$0xff] }
 0x267   : > { %2255 = vmatprep.mubr.f32.mxu0 %v917_v23  ;;  %v860_v23 = vld [vmem:[#allocation2 + $0xe0] sm:$0xff] }
 0x268   : > { %5813 = vmatpush1.bf16.msra.mxu1 %v5812_v27  ;;  %v3558_v27 = vld [vmem:[#allocation10 + $0xe8] sm:$0xff] }
 0x269   : > { %5814 = vmatprep.subr.bf16.mxu1 %v8598_v0 }
 0x26a   : > { %2256 = vmatmul.mubr.f32.gmra.mrb[16].mxu0 %v853_v25  ;;  %v862_v25 = vld [vmem:[#allocation2 + $0xf8] sm:$0xff] }
 0x26b   : > { %2260 = vmatprep.mubr.f32.mxu0 %v918_v30  ;;  %v927_v30 = vld [vmem:[#allocation2 + $0x109] sm:$0xff] }
 0x26c   : > { %5816 = vmatpush1.bf16.msra.mxu1 %v5815_v56  ;;  %v3560_v56 = vld [vmem:[#allocation10 + $0xf8] sm:$0xff] }
 0x26d   : > { %5817 = vmatprep.subr.bf16.mxu1 %v8598_v0 }
 0x26e   : > { %2261 = vmatmul.mubr.f32.gmra.mrb[18].mxu0 %v854_v24  ;;  %v929_v24 = vld [vmem:[#allocation2 + $0x121] sm:$0xff] }
 0x26f   : > { %2265 = vmatprep.mubr.f32.mxu0 %v919_v6  ;;  %v3557_v6 = vld [vmem:[#allocation10 + $0xe0] sm:$0xff] }
 0x270   : > { %5819 = vmatpush1.bf16.msra.mxu1 %v5818_v46  ;;  %v5824_v7 = vpack.c.bf16 %v3558_v27, %v3557_v6  ;;  %v5977_v46 = vpack.c.bf16 %v3660_v60, %v3659_v2  ;;  %v3666_v6 = vld [vmem:[#allocation10 + $0x448] sm:$0xff]  ;;  %v869_v27 = vld [vmem:[#allocation2 + $0x150] sm:$0xff]  ;;  %v3667_v2 = vld [vmem:[#allocation10 + $0x450] sm:$0xff] }
 0x271   : > { %5820 = vmatprep.subr.bf16.mxu1 %v8598_v0  ;;  %v3668_v60 = vld [vmem:[#allocation10 + $0x458] sm:$0xff] }
 0x272   : > { %2266 = vmatmul.mubr.f32.gmra.mrb[20].mxu0 %v855_v58  ;;  %v930_v58 = vld [vmem:[#allocation2 + $0x129] sm:$0xff]  ;;  %5978 = vmatprep.subr.bf16.mxu0 %v5977_v46 }
 0x273   : > { %2270 = vmatprep.mubr.f32.mxu0 %v920_v52  ;;  %v3559_v52 = vld [vmem:[#allocation10 + $0xf0] sm:$0xff]  ;;  %5980 = vmatpush3.bf16.msra.mxu0 %v5977_v46  ;;  %v935_v46 = vld [vmem:[#allocation2 + $0x169] sm:$0xff] }
 0x274   : > { %5822 = vmatpush1.bf16.msra.mxu1 %v5821_v55  ;;  %v3661_v55 = vld [vmem:[#allocation10 + $0x420] sm:$0xff] }
 0x275   : > { %5823 = vmatprep.subr.bf16.mxu1 %v8598_v0 }
 0x276   : > { %2271 = vmatmul.mubr.f32.gmra.mrb[22].mxu0 %v856_v31  ;;  %v5827_v31 = vpack.c.bf16 %v3560_v56, %v3559_v52  ;;  %v3562_v52 = vld [vmem:[#allocation10 + $0x108] sm:$0xff] }
 0x277   : > { %2275 = vmatprep.mubr.f32.mxu0 %v921_v19  ;;  %v866_v19 = vld [vmem:[#allocation2 + $0x128] sm:$0xff] }
 0x278   : > { %5825 = vmatpush1.bf16.msra.mxu1 %v5824_v7 }
 0x279   : > { %5826 = vmatprep.subr.bf16.mxu1 %v8598_v0 }
 0x27a   : > { %2276 = vmatmul.mubr.f32.gmra.mrb[24].mxu0 %v857_v20  ;;  %v2729_v20 = vld [vmem:[#allocation2 + $0x1] sm:$0xff] }
 0x27b   : > { %2280 = vmatprep.mubr.f32.mxu0 %v922_v37  ;;  %3744 = vmatprep.mubr.f32.mxu1 %v2729_v20 }
 0x27c   : > { %5828 = vmatpush1.bf16.msra.mxu1 %v5827_v31  ;;  %v870_v31 = vld [vmem:[#allocation2 + $0x158] sm:$0xff] }
 0x27d   : > { %5829 = vmatprep.subr.bf16.mxu1 %v8598_v0 }
 0x27e   : > { %2281 = vmatmul.mubr.f32.gmra.mrb[26].mxu0 %v858_v40  ;;  %v3662_v40 = vld [vmem:[#allocation10 + $0x428] sm:$0xff] }
 0x27f   : > { %2285 = vmatprep.mubr.f32.mxu0 %v923_v21  ;;  %v867_v21 = vld [vmem:[#allocation2 + $0x138] sm:$0xff] }
 0x282   : > { %2286 = vmatmul.mubr.f32.gmra.mrb[28].mxu0 %v859_v50  ;;  %v5981_v50 = vpack.c.bf16 %v3662_v40, %v3661_v55  ;;  %v3669_v55 = vld [vmem:[#allocation10 + $0x460] sm:$0xff]  ;;  %v3670_v40 = vld [vmem:[#allocation10 + $0x468] sm:$0xff] }
 0x283   : > { %2290 = vmatprep.mubr.f32.mxu0 %v924_v8  ;;  %v932_v8 = vld [vmem:[#allocation2 + $0x141] sm:$0xff] }
 0x284   : > { %5982 = vmatprep.subr.bf16.mxu0 %v5981_v50 }
 0x285   : > { %5984 = vmatpush3.bf16.msra.mxu0 %v5981_v50  ;;  %v5997_v50 = vpack.c.bf16 %v3670_v40, %v3669_v55  ;;  %v3568_v55 = vld [vmem:[#allocation10 + $0x138] sm:$0xff] }
 0x286   : > { %2291 = vmatmul.mubr.f32.gmra.mrb[30].mxu0 %v860_v23  ;;  %v7731_v23 = vld [vmem:[#allocation2] sm:$0xff] }
 0x287   : > { %2295 = vmatprep.mubr.f32.mxu0 %v925_v14  ;;  %3745 = vmatmul.mubr.f32.vlgmr.msra.gmra.mrb[32].mxu1 %v7731_v23  ;;  %v2730_v14 = vld [vmem:[#allocation2 + $0x9] sm:$0xff] }
 0x288   : > { %3749 = vmatprep.mubr.f32.mxu1 %v2730_v14  ;;  %v3563_v14 = vld [vmem:[#allocation10 + $0x110] sm:$0xff] }
 0x28a   : > { %2296 = vmatmul.mubr.f32.gmra.mrb[32].mxu0 %v861_v29  ;;  %v3663_v29 = vld [vmem:[#allocation10 + $0x430] sm:$0xff] }
 0x28b   : > { %2300 = vmatprep.mubr.f32.mxu0 %v926_v11  ;;  %v3664_v11 = vld [vmem:[#allocation10 + $0x438] sm:$0xff]  ;;  %3750 = vmatmul.mubr.f32.gmra.mrb[34].mxu1 %v7731_v23 }
 0x28e   : > { %2301 = vmatmul.mubr.f32.gmra.mrb[34].mxu0 %v862_v25  ;;  %v868_v25 = vld [vmem:[#allocation2 + $0x140] sm:$0xff] }
 0x28f   : > { %2305 = vmatprep.mubr.f32.mxu0 %v927_v30  ;;  %v5985_v30 = vpack.c.bf16 %v3664_v11, %v3663_v29  ;;  %v3564_v29 = vld [vmem:[#allocation10 + $0x118] sm:$0xff] }
 0x290   : > { %v5833_v11 = vpack.c.bf16 %v3564_v29, %v3563_v14 }
 0x291   : > { %5986 = vmatprep.subr.bf16.mxu0 %v5985_v30 }
 0x292   : > { %2306 = vmatmul.mubr.f32.gmra.mrb[36].mxu0 %v863_v15  ;;  %v933_v15 = vld [vmem:[#allocation2 + $0x151] sm:$0xff] }
 0x293   : > { %2310 = vmatprep.mubr.f32.mxu0 %v928_v34  ;;  %5988 = vmatpush3.bf16.msra.mxu0 %v5985_v30  ;;  %v3672_v30 = vld [vmem:[#allocation10 + $0x478] sm:$0xff] }
 0x296   : > { %2311 = vmatmul.mubr.f32.gmra.mrb[38].mxu0 %v864_v32 }
 0x297   : > { %2315 = vmatprep.mubr.f32.mxu0 %v929_v24  ;;  %v3665_v24 = vld [vmem:[#allocation10 + $0x440] sm:$0xff] }
 0x298   : > { %v7726_v59 = vpop.f32.mrb[0].mxu1  ;;  %v5989_v7 = vpack.c.bf16 %v3666_v6, %v3665_v24 }
 0x299   : > { %v7729_v37 = vpop.f32.mrb[1].mxu1 }
 0x29a   : > { %2316 = vmatmul.mubr.f32.gmra.mrb[40].mxu0 %v865_v33  ;;  %v934_v33 = vld [vmem:[#allocation2 + $0x159] sm:$0xff]  ;;  %5990 = vmatprep.subr.bf16.mxu0 %v5989_v7 }
 0x29b   : > { %2320 = vmatprep.mubr.f32.mxu0 %v930_v58  ;;  %v3561_v58 = vld [vmem:[#allocation10 + $0x100] sm:$0xff]  ;;  %5992 = vmatpush3.bf16.msra.mxu0 %v5989_v7  ;;  %v7749_v7 = vld [vmem:[#allocation2 + $0x181] sm:$0xff] }
 0x29c   : > { %v7735_v34 = vpop.f32.mrb[2].mxu1  ;;  %v5830_v56 = vpack.c.bf16 %v3562_v52, %v3561_v58  ;;  %8682 = vst [vmem:[#allocation49_spill] sm:$0xff] %v7749_v7  ;;  %v3566_v58 = vld [vmem:[#allocation10 + $0x128] sm:$0xff] }
 0x29d   : > { %v7737_v32 = vpop.f32.mrb[3].mxu1 }
 0x29e   : > { %2321 = vmatmul.mubr.f32.gmra.mrb[42].mxu0 %v866_v19  ;;  %5831 = vmatpush1.bf16.msra.mxu1 %v5830_v56  ;;  %v5993_v19 = vpack.c.bf16 %v3668_v60, %v3667_v2  ;;  %v7753_v56 = vld [vmem:[#allocation2 + $0x189] sm:$0xff]  ;;  %v939_v2 = vld [vmem:[#allocation2 + $0x199] sm:$0xff] }
 0x29f   : > { %2325 = vmatprep.mubr.f32.mxu0 %v931_v26  ;;  %5832 = vmatprep.subr.bf16.mxu1 %v8598_v0  ;;  %8683 = vst [vmem:[#allocation50_spill] sm:$0xff] %v7753_v56 }
 0x2a0   : > { %5994 = vmatprep.subr.bf16.mxu0 %v5993_v19  ;;  %v7740_v26 = vpop.f32.mrb[4].mxu1 }
 0x2a1   : > { %v7742_v20 = vpop.f32.mrb[5].mxu1  ;;  %5996 = vmatpush3.bf16.msra.mxu0 %v5993_v19  ;;  %v940_v19 = vld [vmem:[#allocation2 + $0x1a1] sm:$0xff] }
 0x2a2   : > { %2326 = vmatmul.mubr.f32.gmra.mrb[44].mxu0 %v867_v21  ;;  %v871_v21 = vld [vmem:[#allocation2 + $0x168] sm:$0xff]  ;;  %5998 = vmatprep.subr.bf16.mxu0 %v5997_v50 }
 0x2a3   : > { %2330 = vmatprep.mubr.f32.mxu0 %v932_v8  ;;  %v936_v8 = vld [vmem:[#allocation2 + $0x171] sm:$0xff]  ;;  %5834 = vmatpush1.bf16.msra.mxu1 %v5833_v11  ;;  %v3571_v11 = vld [vmem:[#allocation10 + $0x150] sm:$0xff] }
 0x2a4   : > { %5835 = vmatprep.subr.bf16.mxu1 %v8598_v0  ;;  %v7745_v6 = vpop.f32.mrb[6].mxu1 }
 0x2a5   : > { %6000 = vmatpush3.bf16.msra.mxu0 %v5997_v50  ;;  %v3570_v50 = vld [vmem:[#allocation10 + $0x148] sm:$0xff] }
 0x2a6   : > { %2331 = vmatmul.mubr.f32.gmra.mrb[46].mxu0 %v868_v25  ;;  %v3671_v25 = vld [vmem:[#allocation10 + $0x470] sm:$0xff] }
 0x2a7   : > { %2335 = vmatprep.mubr.f32.mxu0 %v933_v15  ;;  %v872_v15 = vld [vmem:[#allocation2 + $0x170] sm:$0xff]  ;;  %v6001_v24 = vpack.c.bf16 %v3672_v30, %v3671_v25  ;;  %v3572_v25 = vld [vmem:[#allocation10 + $0x158] sm:$0xff] }
 0x2a8   : > { %v5845_v30 = vpack.c.bf16 %v3572_v25, %v3571_v11 }
 0x2a9   : > { %6002 = vmatprep.subr.bf16.mxu0 %v6001_v24 }
 0x2aa   : > { %2336 = vmatmul.mubr.f32.gmra.mrb[48].mxu0 %v869_v27  ;;  %v7747_v27 = vpop.f32.mrb[7].mxu1 }
 0x2ab   : > { %2340 = vmatprep.mubr.f32.mxu0 %v934_v33  ;;  %v3565_v33 = vld [vmem:[#allocation10 + $0x120] sm:$0xff]  ;;  %6004 = vmatpush3.bf16.msra.mxu0 %v6001_v24  ;;  %v7757_v60 = vpop.f32.mrb[8].mxu1 }
 0x2ac   : > { %v5836_v52 = vpack.c.bf16 %v3566_v58, %v3565_v33  ;;  %v3573_v24 = vld [vmem:[#allocation10 + $0x160] sm:$0xff]  ;;  %v3574_v33 = vld [vmem:[#allocation10 + $0x168] sm:$0xff] }
 0x2ad   : > { %v5848_v58 = vpack.c.bf16 %v3574_v33, %v3573_v24  ;;  %v3579_v24 = vld [vmem:[#allocation10 + $0x190] sm:$0xff]  ;;  %v3580_v33 = vld [vmem:[#allocation10 + $0x198] sm:$0xff] }
 0x2ae   : > { %2341 = vmatmul.mubr.f32.gmra.mrb[50].mxu0 %v870_v31  ;;  %5837 = vmatpush1.bf16.msra.mxu1 %v5836_v52  ;;  %v7760_v31 = vpop.f32.mrb[9].mxu1 }
 0x2af   : > { %2345 = vmatprep.mubr.f32.mxu0 %v935_v46  ;;  %5838 = vmatprep.subr.bf16.mxu1 %v8598_v0  ;;  %v3567_v46 = vld [vmem:[#allocation10 + $0x130] sm:$0xff] }
 0x2b0   : > { %v5839_v40 = vpack.c.bf16 %v3568_v55, %v3567_v46  ;;  %v3576_v46 = vld [vmem:[#allocation10 + $0x178] sm:$0xff] }
 0x2b2   : > { %2346 = vmatmul.mubr.f32.gmra.mrb[52].mxu0 %v871_v21  ;;  %5840 = vmatpush1.bf16.msra.mxu1 %v5839_v40 }
 0x2b3   : > { %2350 = vmatprep.mubr.f32.mxu0 %v936_v8  ;;  %5841 = vmatprep.subr.bf16.mxu1 %v8598_v0 }
 0x2b6   : > { %2351 = vmatmul.mubr.f32.gmra.mrb[54].mxu0 %v872_v15 }
 0x2b7   : > { %2355 = vmatprep.mubr.f32.mxu0 %v7749_v7  ;;  %v3584_v7 = vld [vmem:[#allocation10 + $0x1b8] sm:$0xff] }
 0x2ba   : > { %2356 = vmatmul.mubr.f32.gmra.mrb[56].mxu0 %v7533_v39  ;;  %v7764_v39 = vpop.f32.mrb[10].mxu1 }
 0x2bb   : > { %2360 = vmatprep.mubr.f32.mxu0 %v7753_v56  ;;  %v7767_v21 = vpop.f32.mrb[11].mxu1  ;;  %v3582_v56 = vld [vmem:[#allocation10 + $0x1a8] sm:$0xff] }
 0x2bc   : > { %v7770_v14 = vpop.f32.mrb[12].mxu1 }
 0x2bd   : > { %v7772_v29 = vpop.f32.mrb[13].mxu1 }
 0x2be   : > { %2361 = vmatmul.mubr.f32.gmra.mrb[58].mxu0 %v7539_v22  ;;  %v3569_v22 = vld [vmem:[#allocation10 + $0x140] sm:$0xff]  ;;  %v7775_v15 = vpop.f32.mrb[14].mxu1 }
 0x2bf   : > { %2365 = vmatprep.mubr.f32.mxu0 %v939_v2  ;;  %v5842_v8 = vpack.c.bf16 %v3570_v50, %v3569_v22  ;;  %v3577_v50 = vld [vmem:[#allocation10 + $0x180] sm:$0xff] }
 0x2c1   : > { %5843 = vmatpush1.bf16.msra.mxu1 %v5842_v8  ;;  %v3578_v8 = vld [vmem:[#allocation10 + $0x188] sm:$0xff] }
 0x2c2   : > { %2366 = vmatmul.mubr.f32.gmra.mrb[60].mxu0 %v7731_v23  ;;  %5844 = vmatprep.subr.bf16.mxu1 %v8598_v0  ;;  %v5854_v11 = vpack.c.bf16 %v3578_v8, %v3577_v50 }
 0x2c3   : > { %2370 = vmatprep.mubr.f32.mxu0 %v940_v19  ;;  %v3575_v19 = vld [vmem:[#allocation10 + $0x170] sm:$0xff] }
 0x2c4   : > { %v5851_v55 = vpack.c.bf16 %v3576_v46, %v3575_v19 }
 0x2c5   : > { %5846 = vmatpush1.bf16.msra.mxu1 %v5845_v30 }
 0x2c6   : > { %2371 = vmatmul.mubr.f32.gmra.mrb[62].mxu0 %v7731_v23  ;;  %5847 = vmatprep.subr.bf16.mxu1 %v8598_v0  ;;  %v7777_v23 = vpop.f32.mrb[15].mxu1 }
 0x2c7   : > { %v7780_v52 = vpop.f32.mrb[16].mxu1 }
 0x2c8   : > { %v7782_v2 = vpop.f32.mrb[17].mxu1 }
 0x2c9   : > { %5849 = vmatpush1.bf16.msra.mxu1 %v5848_v58  ;;  %v7785_v40 = vpop.f32.mrb[18].mxu1  ;;  %v5857_v58 = vpack.c.bf16 %v3580_v33, %v3579_v24  ;;  %v5863_v24 = vpack.c.bf16 %v3584_v7, %v3583_v51  ;;  %v5869_v51 = vpack.c.bf16 %v3588_v42, %v3587_v41 }
 0x2ca   : > { %5850 = vmatprep.subr.bf16.mxu1 %v8598_v0  ;;  %v7787_v22 = vpop.f32.mrb[19].mxu1 }
 0x2cb   : > { %v7790_v25 = vpop.f32.mrb[20].mxu1 }
 0x2cc   : > { %v7792_v30 = vpop.f32.mrb[21].mxu1 }
 0x2cd   : > { %5852 = vmatpush1.bf16.msra.mxu1 %v5851_v55  ;;  %v7795_v19 = vpop.f32.mrb[22].mxu1  ;;  %v3581_v55 = vld [vmem:[#allocation10 + $0x1a0] sm:$0xff] }
 0x2ce   : > { %5853 = vmatprep.subr.bf16.mxu1 %v8598_v0  ;;  %v7797_v46 = vpop.f32.mrb[23].mxu1  ;;  %v5860_v50 = vpack.c.bf16 %v3582_v56, %v3581_v55  ;;  %v5866_v56 = vpack.c.bf16 %v3586_v47, %v3585_v49  ;;  %v5872_v47 = vpack.c.bf16 %v3590_v38, %v3589_v5  ;;  %v7822_v49 = vld [vmem:[%s8572_s2] ss:$0 sm:$0xff] }
 0x2cf   : > { %v7800_v8 = vpop.f32.mrb[24].mxu1 }
 0x2d1   : > { %5855 = vmatpush1.bf16.msra.mxu1 %v5854_v11  ;;  %v7802_v11 = vpop.f32.mrb[25].mxu1 }
 0x2d2   : > { %5856 = vmatprep.subr.bf16.mxu1 %v8598_v0  ;;  %v7805_v33 = vpop.f32.mrb[26].mxu1 }
 0x2d5   : > { %5858 = vmatpush1.bf16.msra.mxu1 %v5857_v58  ;;  %v7807_v58 = vpop.f32.mrb[27].mxu1 }
 0x2d6   : > { %5859 = vmatprep.subr.bf16.mxu1 %v8598_v0  ;;  %v7810_v55 = vpop.f32.mrb[28].mxu1 }
 0x2d9   : > { %5861 = vmatpush1.bf16.msra.mxu1 %v5860_v50  ;;  %v7812_v50 = vpop.f32.mrb[29].mxu1 }
 0x2da   : > { %5862 = vmatprep.subr.bf16.mxu1 %v8598_v0 }
 0x2dd   : > { %5864 = vmatpush1.bf16.msra.mxu1 %v5863_v24 }
 0x2de   : > { %5865 = vmatprep.subr.bf16.mxu1 %v8598_v0 }
 0x2e1   : > { %5867 = vmatpush1.bf16.msra.mxu1 %v5866_v56 }
 0x2e2   : > { %5868 = vmatprep.subr.bf16.mxu1 %v8598_v0 }
 0x2e5   : > { %5870 = vmatpush1.bf16.msra.mxu1 %v5869_v51  ;;  %v3591_v51 = vld [vmem:[#allocation10 + $0x1f0] sm:$0xff] }
 0x2e6   : > { %5871 = vmatprep.subr.bf16.mxu1 %v8598_v0  ;;  %v5875_v28 = vpack.c.bf16 %v3592_v4, %v3591_v51 }
 0x2e9   : > { %5873 = vmatpush1.bf16.msra.mxu1 %v5872_v47 }
 0x2ea   : > { %5874 = vmatprep.subr.bf16.mxu1 %v8598_v0 }
 0x2ed   : > { %5876 = vmatpush1.bf16.msra.mxu1 %v5875_v28 }
 0x2ee   : > { %5877 = vmatprep.subr.bf16.mxu1 %v8598_v0 }
 0x307   : > { %v7815_v7 = vpop.f32.mrb[30].mxu1 }
 0x308   : > { %v7817_v24 = vpop.f32.mrb[31].mxu1 }
 0x31d   : > { %v2217_v56 = vpop.f32.mrb[0].mxu0 }
 0x31e   : > { %v6037_v41 = vadd.f32 %v7822_v49, %v2217_v56  ;;  %v2219_v42 = vpop.f32.mrb[1].mxu0 }
 0x320   : > { %v2443_v61 = vadd.f32 %v6037_v41, %v7729_v37 }
 0x321   : > { %v2222_v43 = vpop.f32.mrb[2].mxu0 }
 0x322   : > { %v2601_v38 = vmax.f32 %v2443_v61, 0.0  ;;  %v6038_v5 = vadd.f32 %v7822_v49, %v2222_v43  ;;  %v2224_v45 = vpop.f32.mrb[3].mxu0 }
 0x324   : > { %2633 = vst [vmem:[#allocation2 + $0x19] sm:$0xff] %v2601_v38  ;;  %v2448_v47 = vadd.f32 %v6038_v5, %v7726_v59  ;;  %3754 = vmatprep.mubr.f32.mxu1 %v2601_v38 }
 0x325   : > { %v2227_v36 = vpop.f32.mrb[4].mxu0 }
 0x326   : > { %v2602_v56 = vmax.f32 %v2448_v47, 0.0  ;;  %v6039_v42 = vadd.f32 %v7822_v49, %v2227_v36  ;;  %v2229_v10 = vpop.f32.mrb[5].mxu0 }
 0x328   : > { %2634 = vst [vmem:[#allocation2 + $0x21] sm:$0xff] %v2602_v56  ;;  %v2453_v4 = vadd.f32 %v6039_v42, %v7737_v32 }
 0x329   : > { %v2232_v37 = vpop.f32.mrb[6].mxu0 }
 0x32a   : > { %v2603_v28 = vmax.f32 %v2453_v4, 0.0  ;;  %v6040_v61 = vadd.f32 %v7822_v49, %v2232_v37  ;;  %v2234_v43 = vpop.f32.mrb[7].mxu0 }
 0x32b   : > { %v7833_v45 = vld [vmem:[#allocation2 + $0x18] sm:$0xff] }
 0x32c   : > { %2635 = vst [vmem:[#allocation2 + $0x31] sm:$0xff] %v2603_v28  ;;  %v2458_v41 = vadd.f32 %v6040_v61, %v7735_v34  ;;  %3755 = vmatmul.mubr.f32.gmra.mrb[36].mxu1 %v7833_v45 }
 0x32d   : > { %v2237_v59 = vpop.f32.mrb[8].mxu0  ;;  %3759 = vmatprep.mubr.f32.mxu1 %v2602_v56 }
 0x32e   : > { %v2604_v51 = vmax.f32 %v2458_v41, 0.0  ;;  %v6041_v10 = vadd.f32 %v7822_v49, %v2237_v59  ;;  %v2239_v36 = vpop.f32.mrb[9].mxu0 }
 0x32f   : > { %v7838_v38 = vld [vmem:[#allocation2 + $0x20] sm:$0xff] }
 0x330   : > { %2636 = vst [vmem:[#allocation2 + $0x39] sm:$0xff] %v2604_v51  ;;  %v2463_v32 = vadd.f32 %v6041_v10, %v7742_v20  ;;  %3760 = vmatmul.mubr.f32.gmra.mrb[38].mxu1 %v7838_v38 }
 0x331   : > { %v2242_v5 = vpop.f32.mrb[10].mxu0  ;;  %3764 = vmatprep.mubr.f32.mxu1 %v2603_v28 }
 0x332   : > { %v2605_v47 = vmax.f32 %v2463_v32, 0.0  ;;  %v6042_v34 = vadd.f32 %v7822_v49, %v2242_v5  ;;  %v2244_v42 = vpop.f32.mrb[11].mxu0 }
 0x333   : > { %v7843_v4 = vld [vmem:[#allocation2 + $0x30] sm:$0xff] }
 0x334   : > { %2637 = vst [vmem:[#allocation2 + $0x49] sm:$0xff] %v2605_v47  ;;  %v2468_v56 = vadd.f32 %v6042_v34, %v7740_v26  ;;  %3765 = vmatmul.mubr.f32.gmra.mrb[40].mxu1 %v7843_v4 }
 0x335   : > { %v2247_v37 = vpop.f32.mrb[12].mxu0  ;;  %3769 = vmatprep.mubr.f32.mxu1 %v2604_v51 }
 0x336   : > { %v2606_v61 = vmax.f32 %v2468_v56, 0.0  ;;  %v6043_v20 = vadd.f32 %v7822_v49, %v2247_v37  ;;  %v2249_v43 = vpop.f32.mrb[13].mxu0 }
 0x337   : > { %v7848_v41 = vld [vmem:[#allocation2 + $0x32] sm:$0xff]  ;;  %v7852_v59 = vld [vmem:[#allocation2 + $0x3a] sm:$0xff] }
 0x338   : > { %v7850_v28 = vld [vmem:[#allocation2 + $0x38] sm:$0xff]  ;;  %2638 = vst [vmem:[#allocation2 + $0x51] sm:$0xff] %v2606_v61  ;;  %v2473_v10 = vadd.f32 %v6043_v20, %v7747_v27  ;;  %5465 = vmatprep.mubr.f32.mxu0 %v7848_v41 }
 0x339   : > { %3770 = vmatmul.mubr.f32.gmra.mrb[42].mxu1 %v7850_v28  ;;  %v2252_v26 = vpop.f32.mrb[14].mxu0  ;;  %5466 = vmatmul.mubr.f32.vlgmr.msra.gmra.mrb[64].mxu0 %v7852_v59 }
 0x33a   : > { %3774 = vmatprep.mubr.f32.mxu1 %v2605_v47  ;;  %v2607_v51 = vmax.f32 %v2473_v10, 0.0  ;;  %v6044_v36 = vadd.f32 %v7822_v49, %v2252_v26  ;;  %v2254_v32 = vpop.f32.mrb[15].mxu0 }
 0x33b   : > { %v7859_v5 = vld [vmem:[#allocation2 + $0x48] sm:$0xff] }
 0x33c   : > { %2639 = vst [vmem:[#allocation2 + $0x61] sm:$0xff] %v2607_v51  ;;  %v2478_v34 = vadd.f32 %v6044_v36, %v7745_v6 }
 0x33d   : > { %3775 = vmatmul.mubr.f32.gmra.mrb[44].mxu1 %v7859_v5  ;;  %v2257_v27 = vpop.f32.mrb[16].mxu0 }
 0x33e   : > { %3779 = vmatprep.mubr.f32.mxu1 %v2606_v61  ;;  %v2608_v42 = vmax.f32 %v2478_v34, 0.0  ;;  %v6045_v56 = vadd.f32 %v7822_v49, %v2257_v27  ;;  %v2259_v37 = vpop.f32.mrb[17].mxu0 }
 0x33f   : > { %v7864_v20 = vld [vmem:[#allocation2 + $0x4a] sm:$0xff]  ;;  %v7868_v43 = vld [vmem:[#allocation2 + $0x52] sm:$0xff] }
 0x340   : > { %v7866_v47 = vld [vmem:[#allocation2 + $0x50] sm:$0xff]  ;;  %2640 = vst [vmem:[#allocation2 + $0x69] sm:$0xff] %v2608_v42  ;;  %v2483_v10 = vadd.f32 %v6045_v56, %v7760_v31  ;;  %5468 = vmatprep.mubr.f32.mxu0 %v7864_v20 }
 0x341   : > { %3780 = vmatmul.mubr.f32.gmra.mrb[46].mxu1 %v7866_v47  ;;  %v2262_v6 = vpop.f32.mrb[18].mxu0  ;;  %5469 = vmatmul.mubr.f32.gmra.mrb[66].mxu0 %v7868_v43 }
 0x342   : > { %3784 = vmatprep.mubr.f32.mxu1 %v2607_v51  ;;  %v2609_v61 = vmax.f32 %v2483_v10, 0.0  ;;  %v6046_v26 = vadd.f32 %v7822_v49, %v2262_v6  ;;  %v2264_v36 = vpop.f32.mrb[19].mxu0 }
 0x343   : > { %v7875_v32 = vld [vmem:[#allocation2 + $0x60] sm:$0xff] }
 0x344   : > { %2641 = vst [vmem:[#allocation2 + $0x79] sm:$0xff] %v2609_v61  ;;  %v2488_v34 = vadd.f32 %v6046_v26, %v7757_v60 }
 0x345   : > { %3785 = vmatmul.mubr.f32.gmra.mrb[48].mxu1 %v7875_v32  ;;  %v2267_v31 = vpop.f32.mrb[20].mxu0 }
 0x346   : > { %3789 = vmatprep.mubr.f32.mxu1 %v2608_v42  ;;  %v2610_v27 = vmax.f32 %v2488_v34, 0.0  ;;  %v6047_v56 = vadd.f32 %v7822_v49, %v2267_v31  ;;  %v2269_v37 = vpop.f32.mrb[21].mxu0 }
 0x347   : > { %v7880_v0 = vld [vmem:[#allocation2 + $0x62] sm:$0xff]  ;;  %v7884_v10 = vld [vmem:[#allocation2 + $0x6a] sm:$0xff] }
 0x348   : > { %v7882_v51 = vld [vmem:[#allocation2 + $0x68] sm:$0xff]  ;;  %2642 = vst [vmem:[#allocation2 + $0x81] sm:$0xff] %v2610_v27  ;;  %v2493_v6 = vadd.f32 %v6047_v56, %v7767_v21  ;;  %5471 = vmatprep.mubr.f32.mxu0 %v7880_v0 }
 0x349   : > { %3790 = vmatmul.mubr.f32.gmra.mrb[50].mxu1 %v7882_v51  ;;  %v2272_v60 = vpop.f32.mrb[22].mxu0  ;;  %5472 = vmatmul.mubr.f32.gmra.mrb[68].mxu0 %v7884_v10 }
 0x34a   : > { %3794 = vmatprep.mubr.f32.mxu1 %v2609_v61  ;;  %v2611_v42 = vmax.f32 %v2493_v6, 0.0  ;;  %v6048_v26 = vadd.f32 %v7822_v49, %v2272_v60  ;;  %v2274_v36 = vpop.f32.mrb[23].mxu0 }
 0x34b   : > { %v7891_v34 = vld [vmem:[#allocation2 + $0x78] sm:$0xff] }
 0x34c   : > { %2643 = vst [vmem:[#allocation2 + $0x91] sm:$0xff] %v2611_v42  ;;  %v2498_v31 = vadd.f32 %v6048_v26, %v7764_v39 }
 0x34d   : > { %3795 = vmatmul.mubr.f32.gmra.mrb[52].mxu1 %v7891_v34  ;;  %v2277_v21 = vpop.f32.mrb[24].mxu0 }
 0x34e   : > { %3799 = vmatprep.mubr.f32.mxu1 %v2610_v27  ;;  %v2612_v56 = vmax.f32 %v2498_v31, 0.0  ;;  %v6049_v37 = vadd.f32 %v7822_v49, %v2277_v21  ;;  %v2279_v35 = vpop.f32.mrb[25].mxu0 }
 0x34f   : > { %v7896_v3 = vld [vmem:[#allocation2 + $0x7a] sm:$0xff]  ;;  %v7900_v6 = vld [vmem:[#allocation2 + $0x82] sm:$0xff] }
 0x350   : > { %v7898_v61 = vld [vmem:[#allocation2 + $0x80] sm:$0xff]  ;;  %2644 = vst [vmem:[#allocation2 + $0x99] sm:$0xff] %v2612_v56  ;;  %v2503_v60 = vadd.f32 %v6049_v37, %v7772_v29  ;;  %5474 = vmatprep.mubr.f32.mxu0 %v7896_v3 }
 0x351   : > { %3800 = vmatmul.mubr.f32.gmra.mrb[54].mxu1 %v7898_v61  ;;  %v2282_v39 = vpop.f32.mrb[26].mxu0  ;;  %5475 = vmatmul.mubr.f32.gmra.mrb[70].mxu0 %v7900_v6 }
 0x352   : > { %3804 = vmatprep.mubr.f32.mxu1 %v2611_v42  ;;  %v2613_v27 = vmax.f32 %v2503_v60, 0.0  ;;  %v6050_v35 = vadd.f32 %v7822_v49, %v2282_v39  ;;  %v2284_v26 = vpop.f32.mrb[27].mxu0 }
 0x353   : > { %v7907_v36 = vld [vmem:[#allocation2 + $0x90] sm:$0xff] }
 0x354   : > { %2645 = vst [vmem:[#allocation2 + $0xa9] sm:$0xff] %v2613_v27  ;;  %v2508_v31 = vadd.f32 %v6050_v35, %v7770_v14 }
 0x355   : > { %3805 = vmatmul.mubr.f32.gmra.mrb[56].mxu1 %v7907_v36  ;;  %v2287_v29 = vpop.f32.mrb[28].mxu0 }
 0x356   : > { %3809 = vmatprep.mubr.f32.mxu1 %v2612_v56  ;;  %v2614_v21 = vmax.f32 %v2508_v31, 0.0  ;;  %v6051_v37 = vadd.f32 %v7822_v49, %v2287_v29  ;;  %v2289_v13 = vpop.f32.mrb[29].mxu0 }
 0x357   : > { %v7912_v62 = vld [vmem:[#allocation2 + $0x92] sm:$0xff]  ;;  %v7916_v60 = vld [vmem:[#allocation2 + $0x9a] sm:$0xff] }
 0x358   : > { %v7914_v42 = vld [vmem:[#allocation2 + $0x98] sm:$0xff]  ;;  %2646 = vst [vmem:[#allocation2 + $0xb1] sm:$0xff] %v2614_v21  ;;  %v2513_v39 = vadd.f32 %v6051_v37, %v7777_v23  ;;  %5477 = vmatprep.mubr.f32.mxu0 %v7912_v62 }
 0x359   : > { %3810 = vmatmul.mubr.f32.gmra.mrb[58].mxu1 %v7914_v42  ;;  %v2292_v14 = vpop.f32.mrb[30].mxu0  ;;  %5478 = vmatmul.mubr.f32.gmra.mrb[72].mxu0 %v7916_v60 }
 0x35a   : > { %3814 = vmatprep.mubr.f32.mxu1 %v2613_v27  ;;  %v2615_v56 = vmax.f32 %v2513_v39, 0.0  ;;  %v6052_v13 = vadd.f32 %v7822_v49, %v2292_v14  ;;  %v2294_v35 = vpop.f32.mrb[31].mxu0 }
 0x35b   : > { %v7923_v26 = vld [vmem:[#allocation2 + $0xa8] sm:$0xff] }
 0x35c   : > { %2647 = vst [vmem:[#allocation2 + $0xc1] sm:$0xff] %v2615_v56  ;;  %v2518_v31 = vadd.f32 %v6052_v13, %v7775_v15 }
 0x35d   : > { %3815 = vmatmul.mubr.f32.gmra.mrb[60].mxu1 %v7923_v26  ;;  %v2297_v23 = vpop.f32.mrb[32].mxu0 }
 0x35e   : > { %3819 = vmatprep.mubr.f32.mxu1 %v2614_v21  ;;  %v2616_v29 = vmax.f32 %v2518_v31, 0.0  ;;  %v6053_v37 = vadd.f32 %v7822_v49, %v2297_v23  ;;  %v2299_v57 = vpop.f32.mrb[33].mxu0 }
 0x35f   : > { %v7928_v63 = vld [vmem:[#allocation2 + $0xaa] sm:$0xff]  ;;  %v7932_v39 = vld [vmem:[#allocation2 + $0xb2] sm:$0xff] }
 0x360   : > { %v7930_v27 = vld [vmem:[#allocation2 + $0xb0] sm:$0xff]  ;;  %2648 = vst [vmem:[#allocation2 + $0xc9] sm:$0xff] %v2616_v29  ;;  %v2523_v14 = vadd.f32 %v6053_v37, %v7782_v2  ;;  %5480 = vmatprep.mubr.f32.mxu0 %v7928_v63 }
 0x361   : > { %3820 = vmatmul.mubr.f32.gmra.mrb[62].mxu1 %v7930_v27  ;;  %v2302_v15 = vpop.f32.mrb[34].mxu0  ;;  %5481 = vmatmul.mubr.f32.gmra.mrb[74].mxu0 %v7932_v39 }
 0x362   : > { %3824 = vmatprep.mubr.f32.mxu1 %v2615_v56  ;;  %v2617_v21 = vmax.f32 %v2523_v14, 0.0  ;;  %v6054_v57 = vadd.f32 %v7822_v49, %v2302_v15  ;;  %v2304_v13 = vpop.f32.mrb[35].mxu0 }
 0x363   : > { %v7939_v35 = vld [vmem:[#allocation2 + $0xc0] sm:$0xff] }
 0x364   : > { %2649 = vst [vmem:[#allocation2 + $0xd9] sm:$0xff] %v2617_v21  ;;  %v2528_v31 = vadd.f32 %v6054_v57, %v7780_v52 }
 0x365   : > { %3825 = vmatmul.mubr.f32.gmra.mrb[64].mxu1 %v7939_v35  ;;  %v2307_v2 = vpop.f32.mrb[36].mxu0 }
 0x366   : > { %3829 = vmatprep.mubr.f32.mxu1 %v2616_v29  ;;  %v2618_v23 = vmax.f32 %v2528_v31, 0.0  ;;  %v6055_v37 = vadd.f32 %v7822_v49, %v2307_v2  ;;  %v2309_v53 = vpop.f32.mrb[37].mxu0 }
 0x367   : > { %v7944_v17 = vld [vmem:[#allocation2 + $0xc2] sm:$0xff]  ;;  %v7948_v14 = vld [vmem:[#allocation2 + $0xca] sm:$0xff] }
 0x368   : > { %v7946_v56 = vld [vmem:[#allocation2 + $0xc8] sm:$0xff]  ;;  %2650 = vst [vmem:[#allocation2 + $0xe1] sm:$0xff] %v2618_v23  ;;  %v2533_v15 = vadd.f32 %v6055_v37, %v7787_v22  ;;  %5483 = vmatprep.mubr.f32.mxu0 %v7944_v17 }
 0x369   : > { %3830 = vmatmul.mubr.f32.gmra.mrb[66].mxu1 %v7946_v56  ;;  %v2312_v52 = vpop.f32.mrb[38].mxu0  ;;  %5484 = vmatmul.mubr.f32.gmra.mrb[76].mxu0 %v7948_v14 }
 0x36a   : > { %3834 = vmatprep.mubr.f32.mxu1 %v2617_v21  ;;  %v2619_v29 = vmax.f32 %v2533_v15, 0.0  ;;  %v6056_v53 = vadd.f32 %v7822_v49, %v2312_v52  ;;  %v2314_v57 = vpop.f32.mrb[39].mxu0 }
 0x36b   : > { %v7955_v13 = vld [vmem:[#allocation2 + $0xd8] sm:$0xff] }
 0x36c   : > { %2651 = vst [vmem:[#allocation2 + $0xf1] sm:$0xff] %v2619_v29  ;;  %v2538_v31 = vadd.f32 %v6056_v53, %v7785_v40 }
 0x36d   : > { %3835 = vmatmul.mubr.f32.gmra.mrb[68].mxu1 %v7955_v13  ;;  %v2317_v22 = vpop.f32.mrb[40].mxu0 }
 0x36e   : > { %3839 = vmatprep.mubr.f32.mxu1 %v2618_v23  ;;  %v2620_v2 = vmax.f32 %v2538_v31, 0.0  ;;  %v6057_v37 = vadd.f32 %v7822_v49, %v2317_v22  ;;  %v2319_v54 = vpop.f32.mrb[41].mxu0 }
 0x36f   : > { %v7960_v12 = vld [vmem:[#allocation2 + $0xda] sm:$0xff]  ;;  %v7964_v15 = vld [vmem:[#allocation2 + $0xe2] sm:$0xff] }
 0x370   : > { %v7962_v21 = vld [vmem:[#allocation2 + $0xe0] sm:$0xff]  ;;  %2652 = vst [vmem:[#allocation2 + $0xf9] sm:$0xff] %v2620_v2  ;;  %v2543_v52 = vadd.f32 %v6057_v37, %v7792_v30  ;;  %5486 = vmatprep.mubr.f32.mxu0 %v7960_v12 }
 0x371   : > { %3840 = vmatmul.mubr.f32.gmra.mrb[70].mxu1 %v7962_v21  ;;  %v2322_v40 = vpop.f32.mrb[42].mxu0  ;;  %5487 = vmatmul.mubr.f32.gmra.mrb[78].mxu0 %v7964_v15 }
 0x372   : > { %3844 = vmatprep.mubr.f32.mxu1 %v2619_v29  ;;  %v2621_v23 = vmax.f32 %v2543_v52, 0.0  ;;  %v6058_v54 = vadd.f32 %v7822_v49, %v2322_v40  ;;  %v2324_v53 = vpop.f32.mrb[43].mxu0 }
 0x373   : > { %v7971_v57 = vld [vmem:[#allocation2 + $0xf0] sm:$0xff] }
 0x374   : > { %2653 = vst [vmem:[#allocation2 + $0x109] sm:$0xff] %v2621_v23  ;;  %v2548_v31 = vadd.f32 %v6058_v54, %v7790_v25 }
 0x375   : > { %3845 = vmatmul.mubr.f32.gmra.mrb[72].mxu1 %v7971_v57  ;;  %v2327_v30 = vpop.f32.mrb[44].mxu0 }
 0x376   : > { %3849 = vmatprep.mubr.f32.mxu1 %v2620_v2  ;;  %v2622_v22 = vmax.f32 %v2548_v31, 0.0  ;;  %v6059_v37 = vadd.f32 %v7822_v49, %v2327_v30  ;;  %v2329_v16 = vpop.f32.mrb[45].mxu0 }
 0x377   : > { %v7976_v9 = vld [vmem:[#allocation2 + $0xf2] sm:$0xff]  ;;  %v7980_v52 = vld [vmem:[#allocation2 + $0xfa] sm:$0xff] }
 0x378   : > { %v7978_v29 = vld [vmem:[#allocation2 + $0xf8] sm:$0xff]  ;;  %2654 = vst [vmem:[#allocation2 + $0x111] sm:$0xff] %v2622_v22  ;;  %v2553_v40 = vadd.f32 %v6059_v37, %v7797_v46  ;;  %5489 = vmatprep.mubr.f32.mxu0 %v7976_v9 }
 0x379   : > { %3850 = vmatmul.mubr.f32.gmra.mrb[74].mxu1 %v7978_v29  ;;  %v2332_v25 = vpop.f32.mrb[46].mxu0  ;;  %5490 = vmatmul.mubr.f32.gmra.mrb[80].mxu0 %v7980_v52 }
 0x37a   : > { %3854 = vmatprep.mubr.f32.mxu1 %v2621_v23  ;;  %v2623_v2 = vmax.f32 %v2553_v40, 0.0  ;;  %v6060_v16 = vadd.f32 %v7822_v49, %v2332_v25  ;;  %v2334_v54 = vpop.f32.mrb[47].mxu0 }
 0x37b   : > { %v7987_v53 = vld [vmem:[#allocation2 + $0x108] sm:$0xff] }
 0x37c   : > { %2655 = vst [vmem:[#allocation2 + $0x121] sm:$0xff] %v2623_v2  ;;  %v2558_v31 = vadd.f32 %v6060_v16, %v7795_v19 }
 0x37d   : > { %3855 = vmatmul.mubr.f32.gmra.mrb[76].mxu1 %v7987_v53  ;;  %v2337_v46 = vpop.f32.mrb[48].mxu0 }
 0x37e   : > { %3859 = vmatprep.mubr.f32.mxu1 %v2622_v22  ;;  %v2624_v30 = vmax.f32 %v2558_v31, 0.0  ;;  %v6061_v37 = vadd.f32 %v7822_v49, %v2337_v46  ;;  %v2339_v18 = vpop.f32.mrb[49].mxu0 }
 0x37f   : > { %v7992_v48 = vld [vmem:[#allocation2 + $0x10a] sm:$0xff]  ;;  %v7996_v40 = vld [vmem:[#allocation2 + $0x112] sm:$0xff] }
 0x380   : > { %v7994_v23 = vld [vmem:[#allocation2 + $0x110] sm:$0xff]  ;;  %2656 = vst [vmem:[#allocation2 + $0x129] sm:$0xff] %v2624_v30  ;;  %v2563_v25 = vadd.f32 %v6061_v37, %v7802_v11  ;;  %5492 = vmatprep.mubr.f32.mxu0 %v7992_v48 }
 0x381   : > { %3860 = vmatmul.mubr.f32.gmra.mrb[78].mxu1 %v7994_v23  ;;  %v2342_v19 = vpop.f32.mrb[50].mxu0  ;;  %5493 = vmatmul.mubr.f32.gmra.mrb[82].mxu0 %v7996_v40 }
 0x382   : > { %3864 = vmatprep.mubr.f32.mxu1 %v2623_v2  ;;  %v2625_v22 = vmax.f32 %v2563_v25, 0.0  ;;  %v6062_v18 = vadd.f32 %v7822_v49, %v2342_v19  ;;  %v2344_v16 = vpop.f32.mrb[51].mxu0 }
 0x383   : > { %v8003_v54 = vld [vmem:[#allocation2 + $0x120] sm:$0xff] }
 0x384   : > { %2657 = vst [vmem:[#allocation2 + $0x139] sm:$0xff] %v2625_v22  ;;  %v2568_v31 = vadd.f32 %v6062_v18, %v7800_v8 }
 0x385   : > { %3865 = vmatmul.mubr.f32.gmra.mrb[80].mxu1 %v8003_v54  ;;  %v2347_v11 = vpop.f32.mrb[52].mxu0 }
 0x386   : > { %3869 = vmatprep.mubr.f32.mxu1 %v2624_v30  ;;  %v2626_v46 = vmax.f32 %v2568_v31, 0.0  ;;  %v6063_v37 = vadd.f32 %v7822_v49, %v2347_v11  ;;  %v2349_v1 = vpop.f32.mrb[53].mxu0 }
 0x387   : > { %v8008_v44 = vld [vmem:[#allocation2 + $0x122] sm:$0xff]  ;;  %v8012_v25 = vld [vmem:[#allocation2 + $0x12a] sm:$0xff] }
 0x388   : > { %v8010_v2 = vld [vmem:[#allocation2 + $0x128] sm:$0xff]  ;;  %8684 = vst [vmem:[#allocation51_spill] sm:$0xff] %v8012_v25  ;;  %2658 = vst [vmem:[#allocation2 + $0x141] sm:$0xff] %v2626_v46  ;;  %v2573_v19 = vadd.f32 %v6063_v37, %v7807_v58  ;;  %5495 = vmatprep.mubr.f32.mxu0 %v8008_v44 }
 0x389   : > { %3870 = vmatmul.mubr.f32.gmra.mrb[82].mxu1 %v8010_v2  ;;  %v2352_v8 = vpop.f32.mrb[54].mxu0  ;;  %5496 = vmatmul.mubr.f32.gmra.mrb[84].mxu0 %v8012_v25 }
 0x38a   : > { %3874 = vmatprep.mubr.f32.mxu1 %v2625_v22  ;;  %v8018_v30 = vmax.f32 %v2573_v19, 0.0  ;;  %v6064_v1 = vadd.f32 %v7822_v49, %v2352_v8  ;;  %v2354_v18 = vpop.f32.mrb[55].mxu0 }
 0x38b   : > { %v8021_v16 = vld [vmem:[#allocation2 + $0x138] sm:$0xff] }
 0x38c   : > { %8685 = vst [vmem:[#allocation52_spill] sm:$0xff] %v8018_v30  ;;  %2659 = vst [vmem:[#allocation2 + $0x151] sm:$0xff] %v8018_v30  ;;  %v2578_v31 = vadd.f32 %v6064_v1, %v7805_v33 }
 0x38d   : > { %3875 = vmatmul.mubr.f32.gmra.mrb[84].mxu1 %v8021_v16  ;;  %v2357_v58 = vpop.f32.mrb[56].mxu0 }
 0x38e   : > { %3879 = vmatprep.mubr.f32.mxu1 %v2626_v46  ;;  %v8026_v11 = vmax.f32 %v2578_v31, 0.0  ;;  %v6065_v37 = vadd.f32 %v7822_v49, %v2357_v58  ;;  %v2359_v22 = vpop.f32.mrb[57].mxu0 }
 0x38f   : > { %v8029_v19 = vld [vmem:[#allocation2 + $0x13a] sm:$0xff]  ;;  %v8033_v8 = vld [vmem:[#allocation2 + $0x142] sm:$0xff] }
 0x390   : > { %8686 = vst [vmem:[#allocation53_spill] sm:$0xff] %v8026_v11  ;;  %v8031_v25 = vld [vmem:[#allocation2 + $0x140] sm:$0xff]  ;;  %8687 = vst [vmem:[#allocation54_spill] sm:$0xff] %v8033_v8  ;;  %v2583_v18 = vadd.f32 %v6065_v37, %v7812_v50  ;;  %5498 = vmatprep.mubr.f32.mxu0 %v8029_v19 }
 0x391   : > { %2660 = vst [vmem:[#allocation2 + $0x159] sm:$0xff] %v8026_v11  ;;  %3880 = vmatmul.mubr.f32.gmra.mrb[86].mxu1 %v8031_v25  ;;  %v2362_v33 = vpop.f32.mrb[58].mxu0  ;;  %5499 = vmatmul.mubr.f32.gmra.mrb[86].mxu0 %v8033_v8 }
 0x392   : > { %3884 = vmatprep.mubr.f32.mxu1 %v8018_v30  ;;  %v8041_v46 = vmax.f32 %v2583_v18, 0.0  ;;  %v6066_v1 = vadd.f32 %v7822_v49, %v2362_v33  ;;  %v2364_v31 = vpop.f32.mrb[59].mxu0 }
 0x393   : > { %v8044_v58 = vld [vmem:[#allocation2 + $0x150] sm:$0xff] }
 0x394   : > { %8688 = vst [vmem:[#allocation55_spill] sm:$0xff] %v8041_v46  ;;  %2661 = vst [vmem:[#allocation2 + $0x169] sm:$0xff] %v8041_v46  ;;  %v2588_v50 = vadd.f32 %v6066_v1, %v7810_v55 }
 0x395   : > { %3885 = vmatmul.mubr.f32.gmra.mrb[88].mxu1 %v8044_v58  ;;  %v2367_v37 = vpop.f32.mrb[60].mxu0 }
 0x396   : > { %3889 = vmatprep.mubr.f32.mxu1 %v8026_v11  ;;  %v8050_v22 = vmax.f32 %v2588_v50, 0.0  ;;  %v6067_v30 = vadd.f32 %v7822_v49, %v2367_v37  ;;  %v2369_v18 = vpop.f32.mrb[61].mxu0 }
 0x398   : > { %8689 = vst [vmem:[#allocation56_spill] sm:$0xff] %v8050_v22  ;;  %v8053_v8 = vld [vmem:[#allocation2 + $0x152] sm:$0xff]  ;;  %v8057_v31 = vld [vmem:[#allocation2 + $0x15a] sm:$0xff]  ;;  %2662 = vst [vmem:[#allocation2 + $0x171] sm:$0xff] %v8050_v22  ;;  %v8061_v55 = vadd.f32 %v6067_v30, %v7817_v24 }
 0x399   : > { %8690 = vst [vmem:[#allocation57_spill] sm:$0xff] %v8053_v8  ;;  %v8055_v33 = vld [vmem:[#allocation2 + $0x158] sm:$0xff]  ;;  %8691 = vst [vmem:[#allocation58_spill] sm:$0xff] %v8057_v31  ;;  %5501 = vmatprep.mubr.f32.mxu0 %v8053_v8  ;;  %v2372_v1 = vpop.f32.mrb[62].mxu0 }
 0x39a   : > { %8692 = vst [vmem:[#allocation59_spill] sm:$0xff] %v8061_v55  ;;  %3890 = vmatmul.mubr.f32.gmra.mrb[90].mxu1 %v8055_v33  ;;  %5502 = vmatmul.mubr.f32.gmra.mrb[88].mxu0 %v8057_v31  ;;  %v8627_v50 = vmax.f32 %v8061_v55, 0.0  ;;  %v6068_v37 = vadd.f32 %v7822_v49, %v2372_v1  ;;  %v2374_v18 = vpop.f32.mrb[63].mxu0  ;;  %v3594_v31 = vld [vmem:[#allocation10 + $0x208] sm:$0xff]  ;;  %v2794_v55 = vld [vmem:[#allocation2 + $0xa] sm:$0xff] }
 0x39b   : > { %3894 = vmatprep.mubr.f32.mxu1 %v8041_v46  ;;  %v8069_v11 = vld [vmem:[#allocation2 + $0x168] sm:$0xff]  ;;  %v3593_v46 = vld [vmem:[#allocation10 + $0x200] sm:$0xff]  ;;  %v3595_v18 = vld [vmem:[#allocation10 + $0x210] sm:$0xff] }
 0x39c   : > { %2663 = vst [vmem:[#allocation2 + $0x181] sm:$0xff] %v8627_v50  ;;  %v8074_v24 = vadd.f32 %v6068_v37, %v7815_v7  ;;  %v2793_v7 = vld [vmem:[#allocation2 + $0x2] sm:$0xff]  ;;  %v5878_v37 = vpack.c.bf16 %v3594_v31, %v3593_v46 }
 0x39d   : > { %v3596_v50 = vld [vmem:[#allocation10 + $0x218] sm:$0xff]  ;;  %v3599_v46 = vld [vmem:[#allocation10 + $0x230] sm:$0xff] }
 0x39e   : > { %8693 = vst [vmem:[#allocation60_spill] sm:$0xff] %v8074_v24  ;;  %3895 = vmatmul.mubr.f32.gmra.mrb[92].mxu1 %v8069_v11  ;;  %v8630_v30 = vmax.f32 %v8074_v24, 0.0  ;;  %v3597_v24 = vld [vmem:[#allocation10 + $0x220] sm:$0xff]  ;;  %v3600_v31 = vld [vmem:[#allocation10 + $0x238] sm:$0xff] }
 0x39f   : > { %3899 = vmatprep.mubr.f32.mxu1 %v8050_v22  ;;  %v8079_v8 = vld [vmem:[#allocation2 + $0x16a] sm:$0xff]  ;;  %v8083_v1 = vld [vmem:[#allocation2 + $0x172] sm:$0xff]  ;;  %v8697_v22 = vmov 0.0|0.0  }
 0x3a0   : > { %8694 = vst [vmem:[#allocation61_spill] sm:$0xff] %v8079_v8  ;;  %v8081_v49 = vld [vmem:[#allocation2 + $0x170] sm:$0xff]  ;;  %8696 = vst [vmem:[#allocation63_spill] sm:$0xff] %v8083_v1  ;;  %5504 = vmatprep.mubr.f32.mxu0 %v8079_v8 }
 0x3a1   : > { %8695 = vst [vmem:[#allocation62_spill] sm:$0xff] %v8081_v49  ;;  %2664 = vst [vmem:[#allocation2 + $0x189] sm:$0xff] %v8630_v30  ;;  %5505 = vmatmul.mubr.f32.gmra.mrb[90].mxu0 %v8083_v1  ;;  %v5881_v30 = vpack.c.bf16 %v3596_v50, %v3595_v18  ;;  %v3598_v1 = vld [vmem:[#allocation10 + $0x228] sm:$0xff]  ;;  %v5887_v50 = vpack.c.bf16 %v3600_v31, %v3599_v46  ;;  %v3608_v46 = vld [vmem:[#allocation10 + $0x278] sm:$0xff] }
 0x3a2   : > { %3900 = vmatmul.mubr.f32.gmra.mrb[94].mxu1 %v8081_v49  ;;  %v3606_v18 = vld [vmem:[#allocation10 + $0x268] sm:$0xff] }
 0x3a3   : > { %3969 = vmatprep.mubr.f32.mxu1 %v7833_v45  ;;  %v5884_v45 = vpack.c.bf16 %v3598_v1, %v3597_v24  ;;  %v3604_v1 = vld [vmem:[#allocation10 + $0x258] sm:$0xff]  ;;  %v3610_v31 = vld [vmem:[#allocation10 + $0x288] sm:$0xff] }
 0x3a6   : > { %3970 = vmatmul.mubr.f32.vlgmr.msra.gmra.mrb[32].mxu1 %v2793_v7  ;;  %v8105_v7 = vld [vmem:[#allocation2 + $0x22] sm:$0xff] }
 0x3a7   : > { %3974 = vmatprep.mubr.f32.mxu1 %v7838_v38  ;;  %5879 = vmatpush1.bf16.msra.mxu1 %v5878_v37  ;;  %v8100_v38 = vld [vmem:[#allocation2 + $0x1a] sm:$0xff]  ;;  %v3605_v37 = vld [vmem:[#allocation10 + $0x260] sm:$0xff] }
 0x3a8   : > { %5880 = vmatprep.subr.bf16.mxu1 %v8697_v22  ;;  %v8093_v8 = vld [vmem:[#allocation2 + $0x182] sm:$0xff]  ;;  %v8095_v49 = vld [vmem:[#allocation2 + $0x18a] sm:$0xff] }
 0x3a9   : > { %5507 = vmatprep.mubr.f32.mxu0 %v8093_v8 }
 0x3aa   : > { %3975 = vmatmul.mubr.f32.gmra.mrb[34].mxu1 %v2794_v55  ;;  %5508 = vmatmul.mubr.f32.gmra.mrb[92].mxu0 %v8095_v49  ;;  %v3601_v55 = vld [vmem:[#allocation10 + $0x240] sm:$0xff] }
 0x3ab   : > { %3979 = vmatprep.mubr.f32.mxu1 %v7843_v4  ;;  %5882 = vmatpush1.bf16.msra.mxu1 %v5881_v30  ;;  %v3602_v4 = vld [vmem:[#allocation10 + $0x248] sm:$0xff]  ;;  %v3603_v30 = vld [vmem:[#allocation10 + $0x250] sm:$0xff] }
 0x3ac   : > { %5883 = vmatprep.subr.bf16.mxu1 %v8697_v22  ;;  %v5890_v24 = vpack.c.bf16 %v3602_v4, %v3601_v55  ;;  %v3614_v55 = vld [vmem:[#allocation10 + $0x2a8] sm:$0xff]  ;;  %v3616_v4 = vld [vmem:[#allocation10 + $0x2b8] sm:$0xff] }
 0x3ae   : > { %3980 = vmatmul.mubr.f32.gmra.mrb[36].mxu1 %v8100_v38 }
 0x3af   : > { %3984 = vmatprep.mubr.f32.mxu1 %v7850_v28  ;;  %5885 = vmatpush1.bf16.msra.mxu1 %v5884_v45  ;;  %v5893_v28 = vpack.c.bf16 %v3604_v1, %v3603_v30  ;;  %v3607_v45 = vld [vmem:[#allocation10 + $0x270] sm:$0xff]  ;;  %v3620_v30 = vld [vmem:[#allocation10 + $0x2d8] sm:$0xff]  ;;  %v3622_v1 = vld [vmem:[#allocation10 + $0x2e8] sm:$0xff] }
 0x3b0   : > { %5886 = vmatprep.subr.bf16.mxu1 %v8697_v22 }
 0x3b2   : > { %3985 = vmatmul.mubr.f32.gmra.mrb[38].mxu1 %v8105_v7 }
 0x3b3   : > { %3989 = vmatprep.mubr.f32.mxu1 %v7859_v5  ;;  %5888 = vmatpush1.bf16.msra.mxu1 %v5887_v50  ;;  %v5896_v5 = vpack.c.bf16 %v3606_v18, %v3605_v37  ;;  %v3612_v50 = vld [vmem:[#allocation10 + $0x298] sm:$0xff]  ;;  %v3629_v18 = vld [vmem:[#allocation10 + $0x320] sm:$0xff] }
 0x3b4   : > { %5889 = vmatprep.subr.bf16.mxu1 %v8697_v22 }
 0x3b6   : > { %3990 = vmatmul.mubr.f32.gmra.mrb[40].mxu1 %v7848_v41  ;;  %v5899_v41 = vpack.c.bf16 %v3608_v46, %v3607_v45  ;;  %v2922_v45 = vld [vmem:[#allocation2 + $0x21] sm:$0xff] }
 0x3b7   : > { %3994 = vmatprep.mubr.f32.mxu1 %v7866_v47  ;;  %5891 = vmatpush1.bf16.msra.mxu1 %v5890_v24  ;;  %v3609_v47 = vld [vmem:[#allocation10 + $0x280] sm:$0xff]  ;;  %v3618_v24 = vld [vmem:[#allocation10 + $0x2c8] sm:$0xff] }
 0x3b8   : > { %5892 = vmatprep.subr.bf16.mxu1 %v8697_v22 }
 0x3ba   : > { %3995 = vmatmul.mubr.f32.gmra.mrb[42].mxu1 %v7852_v59  ;;  %v5902_v59 = vpack.c.bf16 %v3610_v31, %v3609_v47  ;;  %v3632_v47 = vld [vmem:[#allocation10 + $0x338] sm:$0xff]  ;;  %v8202_v31 = vld [vmem:[#allocation2 + $0x31] sm:$0xff] }
 0x3bb   : > { %3999 = vmatprep.mubr.f32.mxu1 %v7875_v32  ;;  %5894 = vmatpush1.bf16.msra.mxu1 %v5893_v28  ;;  %v3611_v32 = vld [vmem:[#allocation10 + $0x290] sm:$0xff]  ;;  %v3624_v28 = vld [vmem:[#allocation10 + $0x2f8] sm:$0xff] }
 0x3bc   : > { %5895 = vmatprep.subr.bf16.mxu1 %v8697_v22 }
 0x3be   : > { %4000 = vmatmul.mubr.f32.gmra.mrb[44].mxu1 %v7864_v20  ;;  %v5905_v20 = vpack.c.bf16 %v3612_v50, %v3611_v32 }
 0x3bf   : > { %4004 = vmatprep.mubr.f32.mxu1 %v7882_v51  ;;  %5897 = vmatpush1.bf16.msra.mxu1 %v5896_v5  ;;  %v3613_v51 = vld [vmem:[#allocation10 + $0x2a0] sm:$0xff]  ;;  %v3630_v5 = vld [vmem:[#allocation10 + $0x328] sm:$0xff] }
 0x3c0   : > { %5898 = vmatprep.subr.bf16.mxu1 %v8697_v22  ;;  %v5932_v46 = vpack.c.bf16 %v3630_v5, %v3629_v18  ;;  %v2993_v18 = vld [vmem:[#allocation2 + $0x7a] sm:$0xff] }
 0x3c2   : > { %4005 = vmatmul.mubr.f32.gmra.mrb[46].mxu1 %v7868_v43  ;;  %v5908_v43 = vpack.c.bf16 %v3614_v55, %v3613_v51  ;;  %v3634_v51 = vld [vmem:[#allocation10 + $0x348] sm:$0xff] }
 0x3c3   : > { %4009 = vmatprep.mubr.f32.mxu1 %v7891_v34  ;;  %5900 = vmatpush1.bf16.msra.mxu1 %v5899_v41  ;;  %v3615_v34 = vld [vmem:[#allocation10 + $0x2b0] sm:$0xff] }
 0x3c4   : > { %5901 = vmatprep.subr.bf16.mxu1 %v8697_v22  ;;  %v3631_v41 = vld [vmem:[#allocation10 + $0x330] sm:$0xff] }
 0x3c5   : > { %v5935_v50 = vpack.c.bf16 %v3632_v47, %v3631_v41  ;;  %v8210_v55 = vld [vmem:[#allocation2 + $0x39] sm:$0xff]  ;;  %v2994_v47 = vld [vmem:[#allocation2 + $0x82] sm:$0xff] }
 0x3c6   : > { %4010 = vmatmul.mubr.f32.gmra.mrb[48].mxu1 %v7880_v0  ;;  %v5911_v0 = vpack.c.bf16 %v3616_v4, %v3615_v34  ;;  %v3635_v4 = vld [vmem:[#allocation10 + $0x350] sm:$0xff] }
 0x3c7   : > { %4014 = vmatprep.mubr.f32.mxu1 %v7898_v61  ;;  %5903 = vmatpush1.bf16.msra.mxu1 %v5902_v59  ;;  %v3617_v61 = vld [vmem:[#allocation10 + $0x2c0] sm:$0xff] }
 0x3c8   : > { %5904 = vmatprep.subr.bf16.mxu1 %v8697_v22 }
 0x3ca   : > { %4015 = vmatmul.mubr.f32.gmra.mrb[50].mxu1 %v7884_v10  ;;  %v5914_v10 = vpack.c.bf16 %v3618_v24, %v3617_v61  ;;  %v8214_v61 = vld [vmem:[#allocation2 + $0x49] sm:$0xff] }
 0x3cb   : > { %4019 = vmatprep.mubr.f32.mxu1 %v7907_v36  ;;  %5906 = vmatpush1.bf16.msra.mxu1 %v5905_v20  ;;  %v3619_v36 = vld [vmem:[#allocation10 + $0x2d0] sm:$0xff]  ;;  %v3633_v20 = vld [vmem:[#allocation10 + $0x340] sm:$0xff] }
 0x3cc   : > { %5907 = vmatprep.subr.bf16.mxu1 %v8697_v22  ;;  %v5938_v34 = vpack.c.bf16 %v3634_v51, %v3633_v20  ;;  %v3645_v20 = vld [vmem:[#allocation10 + $0x3a0] sm:$0xff]  ;;  %v3646_v51 = vld [vmem:[#allocation10 + $0x3a8] sm:$0xff] }
 0x3ce   : > { %4020 = vmatmul.mubr.f32.gmra.mrb[52].mxu1 %v7896_v3  ;;  %v5917_v3 = vpack.c.bf16 %v3620_v30, %v3619_v36 }
 0x3cf   : > { %4024 = vmatprep.mubr.f32.mxu1 %v7914_v42  ;;  %5909 = vmatpush1.bf16.msra.mxu1 %v5908_v43  ;;  %v3621_v42 = vld [vmem:[#allocation10 + $0x2e0] sm:$0xff] }
 0x3d0   : > { %5910 = vmatprep.subr.bf16.mxu1 %v8697_v22  ;;  %v2989_v43 = vld [vmem:[#allocation2 + $0x4a] sm:$0xff] }
 0x3d2   : > { %4025 = vmatmul.mubr.f32.gmra.mrb[54].mxu1 %v7900_v6  ;;  %v5920_v6 = vpack.c.bf16 %v3622_v1, %v3621_v42  ;;  %v3638_v42 = vld [vmem:[#allocation10 + $0x368] sm:$0xff] }
 0x3d3   : > { %4029 = vmatprep.mubr.f32.mxu1 %v7923_v26  ;;  %5912 = vmatpush1.bf16.msra.mxu1 %v5911_v0  ;;  %v3623_v26 = vld [vmem:[#allocation10 + $0x2f0] sm:$0xff]  ;;  %v3636_v0 = vld [vmem:[#allocation10 + $0x358] sm:$0xff]  ;;  %v8222_v1 = vld [vmem:[#allocation2 + $0x51] sm:$0xff] }
 0x3d4   : > { %5913 = vmatprep.subr.bf16.mxu1 %v8697_v22  ;;  %v5941_v30 = vpack.c.bf16 %v3636_v0, %v3635_v4  ;;  %v5956_v4 = vpack.c.bf16 %v3646_v51, %v3645_v20  ;;  %v3647_v0 = vld [vmem:[#allocation10 + $0x3b0] sm:$0xff]  ;;  %v3653_v20 = vld [vmem:[#allocation10 + $0x3e0] sm:$0xff]  ;;  %v3654_v51 = vld [vmem:[#allocation10 + $0x3e8] sm:$0xff] }
 0x3d6   : > { %4030 = vmatmul.mubr.f32.gmra.mrb[56].mxu1 %v7912_v62  ;;  %v5923_v62 = vpack.c.bf16 %v3624_v28, %v3623_v26  ;;  %v3639_v28 = vld [vmem:[#allocation10 + $0x370] sm:$0xff] }
 0x3d7   : > { %4034 = vmatprep.mubr.f32.mxu1 %v7930_v27  ;;  %5915 = vmatpush1.bf16.msra.mxu1 %v5914_v10  ;;  %v2990_v10 = vld [vmem:[#allocation2 + $0x52] sm:$0xff] }
 0x3d8   : > { %5916 = vmatprep.subr.bf16.mxu1 %v8697_v22 }
 0x3da   : > { %4035 = vmatmul.mubr.f32.gmra.mrb[58].mxu1 %v7916_v60  ;;  %v8699_v60 = vld [vmem:[#allocation54_spill] sm:$0xff] }
 0x3db   : > { %4039 = vmatprep.mubr.f32.mxu1 %v7939_v35  ;;  %5918 = vmatpush1.bf16.msra.mxu1 %v5917_v3  ;;  %v3637_v3 = vld [vmem:[#allocation10 + $0x360] sm:$0xff] }
 0x3dc   : > { %5919 = vmatprep.subr.bf16.mxu1 %v8697_v22  ;;  %v5944_v26 = vpack.c.bf16 %v3638_v42, %v3637_v3  ;;  %v2996_v42 = vld [vmem:[#allocation2 + $0x9a] sm:$0xff] }
 0x3de   : > { %4040 = vmatmul.mubr.f32.gmra.mrb[60].mxu1 %v7928_v63 }
 0x3df   : > { %4044 = vmatprep.mubr.f32.mxu1 %v7946_v56  ;;  %5921 = vmatpush1.bf16.msra.mxu1 %v5920_v6  ;;  %v8701_v56 = vld [vmem:[#allocation62_spill] sm:$0xff] }
 0x3e0   : > { %5922 = vmatprep.subr.bf16.mxu1 %v8697_v22  ;;  %v2991_v6 = vld [vmem:[#allocation2 + $0x62] sm:$0xff] }
 0x3e2   : > { %4045 = vmatmul.mubr.f32.gmra.mrb[62].mxu1 %v7932_v39  ;;  %v8700_v39 = vld [vmem:[#allocation57_spill] sm:$0xff] }
 0x3e3   : > { %4049 = vmatprep.mubr.f32.mxu1 %v7955_v13  ;;  %5924 = vmatpush1.bf16.msra.mxu1 %v5923_v62  ;;  %v8182_v13 = vld [vmem:[#allocation2 + $0x180] sm:$0xff]  ;;  %v3640_v62 = vld [vmem:[#allocation10 + $0x378] sm:$0xff] }
 0x3e4   : > { %5925 = vmatprep.subr.bf16.mxu1 %v8697_v22 }
 0x3e6   : > { %4050 = vmatmul.mubr.f32.gmra.mrb[64].mxu1 %v7944_v17 }
 0x3e7   : > { %4054 = vmatprep.mubr.f32.mxu1 %v7962_v21 }
 0x3ea   : > { %4055 = vmatmul.mubr.f32.gmra.mrb[66].mxu1 %v7948_v14  ;;  %v8702_v14 = vld [vmem:[#allocation58_spill] sm:$0xff] }
 0x3eb   : > { %4059 = vmatprep.mubr.f32.mxu1 %v7971_v57  ;;  %v8188_v57 = vld [vmem:[#allocation2 + $0x188] sm:$0xff] }
 0x3ee   : > { %4060 = vmatmul.mubr.f32.gmra.mrb[68].mxu1 %v7960_v12  ;;  %v8698_v12 = vld [vmem:[#allocation51_spill] sm:$0xff] }
 0x3ef   : > { %4064 = vmatprep.mubr.f32.mxu1 %v7978_v29 }
 0x3f2   : > { %4065 = vmatmul.mubr.f32.gmra.mrb[70].mxu1 %v7964_v15  ;;  %v8703_v15 = vld [vmem:[#allocation61_spill] sm:$0xff] }
 0x3f3   : > { %4069 = vmatprep.mubr.f32.mxu1 %v7987_v53  ;;  %v3625_v53 = vld [vmem:[#allocation10 + $0x300] sm:$0xff] }
 0x3f6   : > { %4070 = vmatmul.mubr.f32.gmra.mrb[72].mxu1 %v7976_v9 }
 0x3f7   : > { %4074 = vmatprep.mubr.f32.mxu1 %v7994_v23  ;;  %v3626_v23 = vld [vmem:[#allocation10 + $0x308] sm:$0xff] }
 0x3fa   : > { %4075 = vmatmul.mubr.f32.gmra.mrb[74].mxu1 %v7980_v52 }
 0x3fb   : > { %4079 = vmatprep.mubr.f32.mxu1 %v8003_v54  ;;  %v8704_v54 = vld [vmem:[#allocation63_spill] sm:$0xff] }
 0x3fe   : > { %4080 = vmatmul.mubr.f32.gmra.mrb[76].mxu1 %v7992_v48 }
 0x3ff   : > { %4084 = vmatprep.mubr.f32.mxu1 %v8010_v2  ;;  %v5926_v2 = vpack.c.bf16 %v3626_v23, %v3625_v53  ;;  %v2992_v23 = vld [vmem:[#allocation2 + $0x6a] sm:$0xff] }
 0x402   : > { %4085 = vmatmul.mubr.f32.gmra.mrb[78].mxu1 %v7996_v40 }
 0x403   : > { %4089 = vmatprep.mubr.f32.mxu1 %v8021_v16  ;;  %v3628_v16 = vld [vmem:[#allocation10 + $0x318] sm:$0xff] }
 0x406   : > { %4090 = vmatmul.mubr.f32.gmra.mrb[80].mxu1 %v8008_v44 }
 0x407   : > { %4094 = vmatprep.mubr.f32.mxu1 %v8031_v25  ;;  %v3627_v25 = vld [vmem:[#allocation10 + $0x310] sm:$0xff] }
 0x408   : > { %v5929_v37 = vpack.c.bf16 %v3628_v16, %v3627_v25  ;;  %v5947_v25 = vpack.c.bf16 %v3640_v62, %v3639_v28  ;;  %v3641_v16 = vld [vmem:[#allocation10 + $0x380] sm:$0xff]  ;;  %v3650_v62 = vld [vmem:[#allocation10 + $0x3c8] sm:$0xff] }
 0x409   : > { %v3649_v28 = vld [vmem:[#allocation10 + $0x3c0] sm:$0xff] }
 0x40a   : > { %4095 = vmatmul.mubr.f32.gmra.mrb[82].mxu1 %v8698_v12 }
 0x40b   : > { %4099 = vmatprep.mubr.f32.mxu1 %v8044_v58 }
 0x40c   : > { %v8167_v17 = vpop.f32.mrb[64].mxu0 }
 0x40d   : > { %v8170_v63 = vpop.f32.mrb[65].mxu0 }
 0x40e   : > { %4100 = vmatmul.mubr.f32.gmra.mrb[84].mxu1 %v8029_v19 }
 0x40f   : > { %4104 = vmatprep.mubr.f32.mxu1 %v8055_v33 }
 0x412   : > { %4105 = vmatmul.mubr.f32.gmra.mrb[86].mxu1 %v8699_v60 }
 0x413   : > { %4109 = vmatprep.mubr.f32.mxu1 %v8069_v11  ;;  %v2921_v11 = vld [vmem:[#allocation2 + $0x19] sm:$0xff] }
 0x414   : > { %v8175_v27 = vpop.f32.mrb[66].mxu0 }
 0x415   : > { %v8178_v35 = vpop.f32.mrb[67].mxu0 }
 0x416   : > { %4110 = vmatmul.mubr.f32.gmra.mrb[88].mxu1 %v8700_v39 }
 0x417   : > { %4114 = vmatprep.mubr.f32.mxu1 %v8701_v56  ;;  %v8226_v56 = vld [vmem:[#allocation2 + $0x61] sm:$0xff] }
 0x41a   : > { %4115 = vmatmul.mubr.f32.gmra.mrb[90].mxu1 %v8702_v14 }
 0x41b   : > { %4119 = vmatprep.mubr.f32.mxu1 %v8182_v13 }
 0x41c   : > { %v8185_v21 = vpop.f32.mrb[68].mxu0 }
 0x41d   : > { %v8190_v29 = vpop.f32.mrb[69].mxu0 }
 0x41e   : > { %4120 = vmatmul.mubr.f32.gmra.mrb[92].mxu1 %v8703_v15 }
 0x41f   : > { %4124 = vmatprep.mubr.f32.mxu1 %v8188_v57 }
 0x422   : > { %4125 = vmatmul.mubr.f32.gmra.mrb[94].mxu1 %v8704_v54 }
 0x423   : > { %4194 = vmatprep.mubr.f32.mxu1 %v8100_v38  ;;  %v2987_v38 = vld [vmem:[#allocation2 + $0x32] sm:$0xff] }
 0x424   : > { %v8195_v58 = vpop.f32.mrb[70].mxu0 }
 0x425   : > { %v8197_v33 = vpop.f32.mrb[71].mxu0 }
 0x426   : > { %4195 = vmatmul.mubr.f32.vlgmr.msra.gmra.mrb[32].mxu1 %v2921_v11  ;;  %v3642_v11 = vld [vmem:[#allocation10 + $0x388] sm:$0xff] }
 0x427   : > { %4199 = vmatprep.mubr.f32.mxu1 %v8105_v7  ;;  %5927 = vmatpush1.bf16.msra.mxu1 %v5926_v2  ;;  %v2988_v7 = vld [vmem:[#allocation2 + $0x3a] sm:$0xff]  ;;  %v5950_v5 = vpack.c.bf16 %v3642_v11, %v3641_v16  ;;  %v5962_v16 = vpack.c.bf16 %v3650_v62, %v3649_v28  ;;  %v3000_v62 = vld [vmem:[#allocation2 + $0xca] sm:$0xff] }
 0x428   : > { %5928 = vmatprep.subr.bf16.mxu1 %v8697_v22  ;;  %v3651_v11 = vld [vmem:[#allocation10 + $0x3d0] sm:$0xff] }
 0x42a   : > { %4200 = vmatmul.mubr.f32.gmra.mrb[34].mxu1 %v2922_v45  ;;  %v3643_v45 = vld [vmem:[#allocation10 + $0x390] sm:$0xff] }
 0x42b   : > { %4204 = vmatprep.mubr.f32.mxu1 %v2987_v38  ;;  %5930 = vmatpush1.bf16.msra.mxu1 %v5929_v37  ;;  %v8234_v37 = vld [vmem:[#allocation2 + $0x69] sm:$0xff] }
 0x42c   : > { %5931 = vmatprep.subr.bf16.mxu1 %v8697_v22  ;;  %v8204_v59 = vpop.f32.mrb[72].mxu0  ;;  %v3644_v38 = vld [vmem:[#allocation10 + $0x398] sm:$0xff] }
 0x42d   : > { %v8207_v32 = vpop.f32.mrb[73].mxu0 }
 0x42e   : > { %4205 = vmatmul.mubr.f32.gmra.mrb[36].mxu1 %v8202_v31 }
 0x42f   : > { %4209 = vmatprep.mubr.f32.mxu1 %v2988_v7  ;;  %5933 = vmatpush1.bf16.msra.mxu1 %v5932_v46  ;;  %v8238_v46 = vld [vmem:[#allocation2 + $0x79] sm:$0xff] }
 0x430   : > { %5934 = vmatprep.subr.bf16.mxu1 %v8697_v22 }
 0x432   : > { %4210 = vmatmul.mubr.f32.gmra.mrb[38].mxu1 %v8210_v55 }
 0x433   : > { %4214 = vmatprep.mubr.f32.mxu1 %v2989_v43  ;;  %5936 = vmatpush1.bf16.msra.mxu1 %v5935_v50  ;;  %v5953_v50 = vpack.c.bf16 %v3644_v38, %v3643_v45  ;;  %v8246_v43 = vld [vmem:[#allocation2 + $0x81] sm:$0xff]  ;;  %v2998_v38 = vld [vmem:[#allocation2 + $0xb2] sm:$0xff] }
 0x434   : > { %5937 = vmatprep.subr.bf16.mxu1 %v8697_v22  ;;  %v8216_v24 = vpop.f32.mrb[74].mxu0 }
 0x435   : > { %v8219_v36 = vpop.f32.mrb[75].mxu0 }
 0x436   : > { %4215 = vmatmul.mubr.f32.gmra.mrb[40].mxu1 %v8214_v61 }
 0x437   : > { %4219 = vmatprep.mubr.f32.mxu1 %v2990_v10  ;;  %5939 = vmatpush1.bf16.msra.mxu1 %v5938_v34  ;;  %v2995_v34 = vld [vmem:[#allocation2 + $0x92] sm:$0xff]  ;;  %v3648_v10 = vld [vmem:[#allocation10 + $0x3b8] sm:$0xff] }
 0x438   : > { %5940 = vmatprep.subr.bf16.mxu1 %v8697_v22 }
 0x43a   : > { %4220 = vmatmul.mubr.f32.gmra.mrb[42].mxu1 %v8222_v1 }
 0x43b   : > { %4224 = vmatprep.mubr.f32.mxu1 %v2991_v6  ;;  %5942 = vmatpush1.bf16.msra.mxu1 %v5941_v30  ;;  %v8250_v30 = vld [vmem:[#allocation2 + $0x91] sm:$0xff] }
 0x43c   : > { %5943 = vmatprep.subr.bf16.mxu1 %v8697_v22  ;;  %v8228_v53 = vpop.f32.mrb[76].mxu0 }
 0x43d   : > { %v8231_v2 = vpop.f32.mrb[77].mxu0 }
 0x43e   : > { %4225 = vmatmul.mubr.f32.gmra.mrb[44].mxu1 %v8226_v56 }
 0x43f   : > { %4229 = vmatprep.mubr.f32.mxu1 %v2992_v23  ;;  %5945 = vmatpush1.bf16.msra.mxu1 %v5944_v26  ;;  %v5959_v26 = vpack.c.bf16 %v3648_v10, %v3647_v0  ;;  %v8258_v23 = vld [vmem:[#allocation2 + $0x99] sm:$0xff]  ;;  %v5968_v0 = vpack.c.bf16 %v3654_v51, %v3653_v20  ;;  %v3002_v20 = vld [vmem:[#allocation2 + $0xe2] sm:$0xff] }
 0x440   : > { %5946 = vmatprep.subr.bf16.mxu1 %v8697_v22  ;;  %v3655_v10 = vld [vmem:[#allocation10 + $0x3f0] sm:$0xff] }
 0x442   : > { %4230 = vmatmul.mubr.f32.gmra.mrb[46].mxu1 %v8234_v37 }
 0x443   : > { %4234 = vmatprep.mubr.f32.mxu1 %v2993_v18  ;;  %5948 = vmatpush1.bf16.msra.mxu1 %v5947_v25  ;;  %v2997_v25 = vld [vmem:[#allocation2 + $0xaa] sm:$0xff] }
 0x444   : > { %5949 = vmatprep.subr.bf16.mxu1 %v8697_v22  ;;  %v8240_v41 = vpop.f32.mrb[78].mxu0  ;;  %v3652_v18 = vld [vmem:[#allocation10 + $0x3d8] sm:$0xff] }
 0x445   : > { %v8243_v7 = vpop.f32.mrb[79].mxu0 }
 0x446   : > { %4235 = vmatmul.mubr.f32.gmra.mrb[48].mxu1 %v8238_v46 }
 0x447   : > { %4239 = vmatprep.mubr.f32.mxu1 %v2994_v47  ;;  %5951 = vmatpush1.bf16.msra.mxu1 %v5950_v5  ;;  %v8262_v5 = vld [vmem:[#allocation2 + $0xa9] sm:$0xff] }
 0x448   : > { %5952 = vmatprep.subr.bf16.mxu1 %v8697_v22 }
 0x44a   : > { %4240 = vmatmul.mubr.f32.gmra.mrb[50].mxu1 %v8246_v43 }
 0x44b   : > { %4244 = vmatprep.mubr.f32.mxu1 %v2995_v34  ;;  %5954 = vmatpush1.bf16.msra.mxu1 %v5953_v50  ;;  %v5965_v50 = vpack.c.bf16 %v3652_v18, %v3651_v11  ;;  %v8270_v34 = vld [vmem:[#allocation2 + $0xb1] sm:$0xff]  ;;  %v8282_v11 = vld [vmem:[#allocation2 + $0xc9] sm:$0xff]  ;;  %v3001_v18 = vld [vmem:[#allocation2 + $0xda] sm:$0xff] }
 0x44c   : > { %5955 = vmatprep.subr.bf16.mxu1 %v8697_v22  ;;  %v8252_v3 = vpop.f32.mrb[80].mxu0 }
 0x44d   : > { %v8255_v6 = vpop.f32.mrb[81].mxu0 }
 0x44e   : > { %4245 = vmatmul.mubr.f32.gmra.mrb[52].mxu1 %v8250_v30 }
 0x44f   : > { %4249 = vmatprep.mubr.f32.mxu1 %v2996_v42  ;;  %5957 = vmatpush1.bf16.msra.mxu1 %v5956_v4  ;;  %v2999_v4 = vld [vmem:[#allocation2 + $0xc2] sm:$0xff] }
 0x450   : > { %5958 = vmatprep.subr.bf16.mxu1 %v8697_v22  ;;  %v3656_v42 = vld [vmem:[#allocation10 + $0x3f8] sm:$0xff] }
 0x452   : > { %4250 = vmatmul.mubr.f32.gmra.mrb[54].mxu1 %v8258_v23 }
 0x453   : > { %4254 = vmatprep.mubr.f32.mxu1 %v2997_v25  ;;  %5960 = vmatpush1.bf16.msra.mxu1 %v5959_v26  ;;  %v8274_v26 = vld [vmem:[#allocation2 + $0xc1] sm:$0xff] }
 0x454   : > { %5961 = vmatprep.subr.bf16.mxu1 %v8697_v22  ;;  %v8264_v45 = vpop.f32.mrb[82].mxu0 }
 0x455   : > { %v8267_v47 = vpop.f32.mrb[83].mxu0 }
 0x456   : > { %4255 = vmatmul.mubr.f32.gmra.mrb[56].mxu1 %v8262_v5 }
 0x457   : > { %4259 = vmatprep.mubr.f32.mxu1 %v2998_v38  ;;  %5963 = vmatpush1.bf16.msra.mxu1 %v5962_v16  ;;  %v5971_v16 = vpack.c.bf16 %v3656_v42, %v3655_v10  ;;  %v8285_v38 = vld [vmem:[#allocation2 + $0xd9] sm:$0xff] }
 0x458   : > { %5964 = vmatprep.subr.bf16.mxu1 %v8697_v22  ;;  %v8304_v42 = vld [vmem:[#allocation2 + $0xf9] sm:$0xff] }
 0x45a   : > { %4260 = vmatmul.mubr.f32.gmra.mrb[58].mxu1 %v8270_v34 }
 0x45b   : > { %4264 = vmatprep.mubr.f32.mxu1 %v2999_v4  ;;  %5966 = vmatpush1.bf16.msra.mxu1 %v5965_v50  ;;  %v8292_v4 = vld [vmem:[#allocation2 + $0xe1] sm:$0xff] }
 0x45c   : > { %5967 = vmatprep.subr.bf16.mxu1 %v8697_v22  ;;  %v8276_v28 = vpop.f32.mrb[84].mxu0 }
 0x45d   : > { %v8279_v25 = vpop.f32.mrb[85].mxu0 }
 0x45e   : > { %4265 = vmatmul.mubr.f32.gmra.mrb[60].mxu1 %v8274_v26 }
 0x45f   : > { %4269 = vmatprep.mubr.f32.mxu1 %v3000_v62  ;;  %5969 = vmatpush1.bf16.msra.mxu1 %v5968_v0  ;;  %v8308_v62 = vld [vmem:[#allocation2 + $0x109] sm:$0xff] }
 0x460   : > { %5970 = vmatprep.subr.bf16.mxu1 %v8697_v22  ;;  %v8296_v22 = vld [vmem:[#allocation2 + $0xf1] sm:$0xff] }
 0x462   : > { %4270 = vmatmul.mubr.f32.gmra.mrb[62].mxu1 %v8282_v11 }
 0x463   : > { %4274 = vmatprep.mubr.f32.mxu1 %v3001_v18  ;;  %5972 = vmatpush1.bf16.msra.mxu1 %v5971_v16  ;;  %v8316_v18 = vld [vmem:[#allocation2 + $0x111] sm:$0xff] }
 0x464   : > { %v8287_v50 = vpop.f32.mrb[86].mxu0 }
 0x465   : > { %v8290_v51 = vpop.f32.mrb[87].mxu0 }
 0x466   : > { %4275 = vmatmul.mubr.f32.gmra.mrb[64].mxu1 %v8285_v38 }
 0x467   : > { %4279 = vmatprep.mubr.f32.mxu1 %v3002_v20 }
 0x46a   : > { %4280 = vmatmul.mubr.f32.gmra.mrb[66].mxu1 %v8292_v4 }
 0x46b   : > { %4284 = vmatprep.mubr.f32.mxu1 %v7976_v9 }
 0x46d   : > { %v8298_v0 = vpop.f32.mrb[88].mxu0 }
 0x46e   : > { %8705 = vst [vmem:[#allocation51_spill] sm:$0xff] %v8298_v0  ;;  %4285 = vmatmul.mubr.f32.gmra.mrb[68].mxu1 %v8296_v22  ;;  %v8301_v10 = vpop.f32.mrb[89].mxu0  ;;  %v3208_v0 = vld [vmem:[#allocation2 + $0x1a2] sm:$0xff] }
 0x46f   : > { %4289 = vmatprep.mubr.f32.mxu1 %v7980_v52  ;;  %v8320_v52 = vld [vmem:[#allocation2 + $0x121] sm:$0xff] }
 0x472   : > { %4290 = vmatmul.mubr.f32.gmra.mrb[70].mxu1 %v8304_v42 }
 0x473   : > { %4294 = vmatprep.mubr.f32.mxu1 %v7992_v48 }
 0x474   : > { %v8310_v16 = vpop.f32.mrb[90].mxu0 }
 0x475   : > { %8706 = vst [vmem:[#allocation54_spill] sm:$0xff] %v8310_v16  ;;  %v8313_v9 = vpop.f32.mrb[91].mxu0  ;;  %v8328_v16 = vld [vmem:[#allocation2 + $0x129] sm:$0xff] }
 0x476   : > { %4295 = vmatmul.mubr.f32.gmra.mrb[72].mxu1 %v8308_v62  ;;  %8707 = vst [vmem:[#allocation57_spill] sm:$0xff] %v8313_v9 }
 0x477   : > { %4299 = vmatprep.mubr.f32.mxu1 %v7996_v40  ;;  %v8332_v40 = vld [vmem:[#allocation2 + $0x139] sm:$0xff] }
 0x47a   : > { %4300 = vmatmul.mubr.f32.gmra.mrb[74].mxu1 %v8316_v18 }
 0x47b   : > { %4304 = vmatprep.mubr.f32.mxu1 %v8008_v44  ;;  %v8336_v44 = vld [vmem:[#allocation2 + $0x141] sm:$0xff] }
 0x47d   : > { %v8322_v20 = vpop.f32.mrb[92].mxu0 }
 0x47e   : > { %8708 = vst [vmem:[#allocation62_spill] sm:$0xff] %v8322_v20  ;;  %4305 = vmatmul.mubr.f32.gmra.mrb[76].mxu1 %v8320_v52  ;;  %v8325_v48 = vpop.f32.mrb[93].mxu0  ;;  %v8710_v20 = vld [vmem:[#allocation52_spill] sm:$0xff] }
 0x47f   : > { %8709 = vst [vmem:[#allocation58_spill] sm:$0xff] %v8325_v48  ;;  %4309 = vmatprep.mubr.f32.mxu1 %v8698_v12  ;;  %v8711_v12 = vld [vmem:[#allocation53_spill] sm:$0xff]  ;;  %v8713_v48 = vld [vmem:[#allocation56_spill] sm:$0xff] }
 0x482   : > { %4310 = vmatmul.mubr.f32.gmra.mrb[78].mxu1 %v8328_v16 }
 0x483   : > { %4314 = vmatprep.mubr.f32.mxu1 %v8029_v19  ;;  %v8712_v19 = vld [vmem:[#allocation55_spill] sm:$0xff] }
 0x486   : > { %4315 = vmatmul.mubr.f32.gmra.mrb[80].mxu1 %v8332_v40 }
 0x487   : > { %4319 = vmatprep.mubr.f32.mxu1 %v8699_v60  ;;  %v8714_v60 = vld [vmem:[#allocation59_spill] sm:$0xff] }
 0x488   : > { %v8715_v9 = vmax.f32 %v8714_v60, 0.0  ;;  %v3139_v60 = vld [vmem:[#allocation2 + $0x169] sm:$0xff] }
 0x48a   : > { %4320 = vmatmul.mubr.f32.gmra.mrb[82].mxu1 %v8336_v44 }
 0x48b   : > { %4324 = vmatprep.mubr.f32.mxu1 %v8700_v39  ;;  %v3207_v39 = vld [vmem:[#allocation2 + $0x19a] sm:$0xff] }
 0x48c   : > { %5510 = vmatprep.mubr.f32.mxu0 %v3207_v39  ;;  %v3076_v39 = vld [vmem:[#allocation2 + $0x170] sm:$0xff] }
 0x48d   : > { %5511 = vmatmul.mubr.f32.gmra.mrb[94].mxu0 %v3208_v0  ;;  %v3053_v0 = vld [vmem:[#allocation2 + $0x60] sm:$0xff] }
 0x48e   : > { %4325 = vmatmul.mubr.f32.gmra.mrb[84].mxu1 %v8710_v20 }
 0x48f   : > { %4329 = vmatprep.mubr.f32.mxu1 %v8702_v14  ;;  %v8716_v14 = vld [vmem:[#allocation60_spill] sm:$0xff] }
 0x490   : > { %v8717_v20 = vmax.f32 %v8716_v14, 0.0  ;;  %v3141_v14 = vld [vmem:[#allocation2 + $0x181] sm:$0xff] }
 0x492   : > { %4330 = vmatmul.mubr.f32.gmra.mrb[86].mxu1 %v8711_v12  ;;  %v4949_v12 = vld [vmem:[#allocation11 + $0x8] sm:$0xff] }
 0x493   : > { %4334 = vmatprep.mubr.f32.mxu1 %v8703_v15  ;;  %v3049_v15 = vld [vmem:[#allocation2 + $0x30] sm:$0xff] }
 0x496   : > { %4335 = vmatmul.mubr.f32.gmra.mrb[88].mxu1 %v8712_v19  ;;  %v3074_v19 = vld [vmem:[#allocation2 + $0x158] sm:$0xff] }
 0x497   : > { %4339 = vmatprep.mubr.f32.mxu1 %v8704_v54  ;;  %v3050_v54 = vld [vmem:[#allocation2 + $0x38] sm:$0xff] }
 0x49a   : > { %4340 = vmatmul.mubr.f32.gmra.mrb[90].mxu1 %v8713_v48  ;;  %v3138_v48 = vld [vmem:[#allocation2 + $0x159] sm:$0xff] }
 0x49b   : > { %4344 = vmatprep.mubr.f32.mxu1 %v8093_v8  ;;  %v3051_v8 = vld [vmem:[#allocation2 + $0x48] sm:$0xff] }
 0x49e   : > { %4345 = vmatmul.mubr.f32.gmra.mrb[92].mxu1 %v8715_v9  ;;  %v3137_v9 = vld [vmem:[#allocation2 + $0x151] sm:$0xff] }
 0x49f   : > { %4349 = vmatprep.mubr.f32.mxu1 %v8095_v49  ;;  %v3052_v49 = vld [vmem:[#allocation2 + $0x50] sm:$0xff] }
 0x4a2   : > { %4350 = vmatmul.mubr.f32.gmra.mrb[94].mxu1 %v8717_v20  ;;  %v4950_v20 = vld [vmem:[#allocation11 + $0x10] sm:$0xff] }
 0x4a3   : > { %4419 = vmatprep.mubr.f32.mxu1 %v8202_v31  ;;  %v3054_v31 = vld [vmem:[#allocation2 + $0x68] sm:$0xff] }
 0x4a6   : > { %4420 = vmatmul.mubr.f32.vlgmr.msra.gmra.mrb[32].mxu1 %v3049_v15  ;;  %v4951_v15 = vld [vmem:[#allocation11 + $0x18] sm:$0xff] }
 0x4a7   : > { %4424 = vmatprep.mubr.f32.mxu1 %v8210_v55  ;;  %v3055_v55 = vld [vmem:[#allocation2 + $0x78] sm:$0xff] }
 0x4aa   : > { %4425 = vmatmul.mubr.f32.gmra.mrb[34].mxu1 %v3050_v54  ;;  %v6009_v54 = vpack.c.bf16 %v4951_v15, %v4950_v20 }
 0x4ab   : > { %4429 = vmatprep.mubr.f32.mxu1 %v8214_v61  ;;  %v3056_v61 = vld [vmem:[#allocation2 + $0x80] sm:$0xff] }
 0x4ae   : > { %4430 = vmatmul.mubr.f32.gmra.mrb[36].mxu1 %v3051_v8  ;;  %v3142_v8 = vld [vmem:[#allocation2 + $0x189] sm:$0xff] }
 0x4af   : > { %4434 = vmatprep.mubr.f32.mxu1 %v8222_v1  ;;  %v3057_v1 = vld [vmem:[#allocation2 + $0x90] sm:$0xff] }
 0x4b2   : > { %4435 = vmatmul.mubr.f32.gmra.mrb[38].mxu1 %v3052_v49  ;;  %v4952_v49 = vld [vmem:[#allocation11 + $0x20] sm:$0xff] }
 0x4b3   : > { %4439 = vmatprep.mubr.f32.mxu1 %v8226_v56  ;;  %v3058_v56 = vld [vmem:[#allocation2 + $0x98] sm:$0xff] }
 0x4b6   : > { %4440 = vmatmul.mubr.f32.gmra.mrb[40].mxu1 %v3053_v0  ;;  %v4953_v0 = vld [vmem:[#allocation11 + $0x28] sm:$0xff] }
 0x4b7   : > { %4444 = vmatprep.mubr.f32.mxu1 %v8234_v37  ;;  %v3059_v37 = vld [vmem:[#allocation2 + $0xa8] sm:$0xff] }
 0x4ba   : > { %4445 = vmatmul.mubr.f32.gmra.mrb[42].mxu1 %v3054_v31  ;;  %v3143_v31 = vld [vmem:[#allocation2 + $0x199] sm:$0xff] }
 0x4bb   : > { %4449 = vmatprep.mubr.f32.mxu1 %v8238_v46  ;;  %v3060_v46 = vld [vmem:[#allocation2 + $0xb0] sm:$0xff] }
 0x4be   : > { %4450 = vmatmul.mubr.f32.gmra.mrb[44].mxu1 %v3055_v55  ;;  %v6013_v55 = vpack.c.bf16 %v4953_v0, %v4952_v49 }
 0x4bf   : > { %4454 = vmatprep.mubr.f32.mxu1 %v8246_v43  ;;  %v3061_v43 = vld [vmem:[#allocation2 + $0xc0] sm:$0xff] }
 0x4c2   : > { %4455 = vmatmul.mubr.f32.gmra.mrb[46].mxu1 %v3056_v61  ;;  %v4954_v61 = vld [vmem:[#allocation11 + $0x30] sm:$0xff] }
 0x4c3   : > { %4459 = vmatprep.mubr.f32.mxu1 %v8250_v30  ;;  %v3062_v30 = vld [vmem:[#allocation2 + $0xc8] sm:$0xff] }
 0x4c6   : > { %4460 = vmatmul.mubr.f32.gmra.mrb[48].mxu1 %v3057_v1  ;;  %v4955_v1 = vld [vmem:[#allocation11 + $0x38] sm:$0xff] }
 0x4c7   : > { %4464 = vmatprep.mubr.f32.mxu1 %v8258_v23  ;;  %v3063_v23 = vld [vmem:[#allocation2 + $0xd8] sm:$0xff] }
 0x4ca   : > { %4465 = vmatmul.mubr.f32.gmra.mrb[50].mxu1 %v3058_v56  ;;  %v3144_v56 = vld [vmem:[#allocation2 + $0x1a1] sm:$0xff] }
 0x4cb   : > { %4469 = vmatprep.mubr.f32.mxu1 %v8262_v5  ;;  %v3064_v5 = vld [vmem:[#allocation2 + $0xe0] sm:$0xff] }
 0x4ce   : > { %4470 = vmatmul.mubr.f32.gmra.mrb[52].mxu1 %v3059_v37  ;;  %v6017_v37 = vpack.c.bf16 %v4955_v1, %v4954_v61 }
 0x4cf   : > { %4474 = vmatprep.mubr.f32.mxu1 %v8270_v34  ;;  %v3065_v34 = vld [vmem:[#allocation2 + $0xf0] sm:$0xff] }
 0x4d2   : > { %4475 = vmatmul.mubr.f32.gmra.mrb[54].mxu1 %v3060_v46  ;;  %v6601_v46 = vld [vmem:[#allocation2] sm:$0xff] }
 0x4d3   : > { %4479 = vmatprep.mubr.f32.mxu1 %v8274_v26  ;;  %v3066_v26 = vld [vmem:[#allocation2 + $0xf8] sm:$0xff] }
 0x4d6   : > { %4480 = vmatmul.mubr.f32.gmra.mrb[56].mxu1 %v3061_v43  ;;  %v4957_v43 = vld [vmem:[#allocation11 + $0x48] sm:$0xff] }
 0x4d7   : > { %4484 = vmatprep.mubr.f32.mxu1 %v8282_v11  ;;  %v3067_v11 = vld [vmem:[#allocation2 + $0x108] sm:$0xff] }
 0x4da   : > { %4485 = vmatmul.mubr.f32.gmra.mrb[58].mxu1 %v3062_v30 }
 0x4db   : > { %4489 = vmatprep.mubr.f32.mxu1 %v8285_v38  ;;  %v3068_v38 = vld [vmem:[#allocation2 + $0x110] sm:$0xff] }
 0x4de   : > { %4490 = vmatmul.mubr.f32.gmra.mrb[60].mxu1 %v3063_v23  ;;  %v4958_v23 = vld [vmem:[#allocation11 + $0x50] sm:$0xff] }
 0x4df   : > { %4494 = vmatprep.mubr.f32.mxu1 %v8292_v4  ;;  %v3069_v4 = vld [vmem:[#allocation2 + $0x120] sm:$0xff] }
 0x4e2   : > { %4495 = vmatmul.mubr.f32.gmra.mrb[62].mxu1 %v3064_v5 }
 0x4e3   : > { %4499 = vmatprep.mubr.f32.mxu1 %v8296_v22  ;;  %v3070_v22 = vld [vmem:[#allocation2 + $0x128] sm:$0xff] }
 0x4e6   : > { %4500 = vmatmul.mubr.f32.gmra.mrb[64].mxu1 %v3065_v34  ;;  %v4960_v34 = vld [vmem:[#allocation11 + $0x60] sm:$0xff] }
 0x4e7   : > { %4504 = vmatprep.mubr.f32.mxu1 %v8304_v42  ;;  %v3071_v42 = vld [vmem:[#allocation2 + $0x138] sm:$0xff] }
 0x4ea   : > { %4505 = vmatmul.mubr.f32.gmra.mrb[66].mxu1 %v3066_v26  ;;  %v4961_v26 = vld [vmem:[#allocation11 + $0x68] sm:$0xff] }
 0x4eb   : > { %4509 = vmatprep.mubr.f32.mxu1 %v8308_v62  ;;  %v3072_v62 = vld [vmem:[#allocation2 + $0x140] sm:$0xff] }
 0x4ee   : > { %4510 = vmatmul.mubr.f32.gmra.mrb[68].mxu1 %v3067_v11  ;;  %v6029_v11 = vpack.c.bf16 %v4961_v26, %v4960_v34 }
 0x4ef   : > { %4514 = vmatprep.mubr.f32.mxu1 %v8316_v18  ;;  %v3073_v18 = vld [vmem:[#allocation2 + $0x150] sm:$0xff] }
 0x4f2   : > { %4515 = vmatmul.mubr.f32.gmra.mrb[70].mxu1 %v3068_v38  ;;  %v4962_v38 = vld [vmem:[#allocation11 + $0x70] sm:$0xff] }
 0x4f3   : > { %4519 = vmatprep.mubr.f32.mxu1 %v8320_v52  ;;  %v4948_v52 = vld [vmem:[#allocation11] sm:$0xff] }
 0x4f6   : > { %4520 = vmatmul.mubr.f32.gmra.mrb[72].mxu1 %v3069_v4  ;;  %v4963_v4 = vld [vmem:[#allocation11 + $0x78] sm:$0xff] }
 0x4f7   : > { %4524 = vmatprep.mubr.f32.mxu1 %v8328_v16  ;;  %v6005_v16 = vpack.c.bf16 %v4949_v12, %v4948_v52 }
 0x4f9   : > { %6006 = vmatprep.subr.bf16.mxu1 %v6005_v16 }
 0x4fa   : > { %4525 = vmatmul.mubr.f32.gmra.mrb[74].mxu1 %v3070_v22  ;;  %v6033_v22 = vpack.c.bf16 %v4963_v4, %v4962_v38 }
 0x4fb   : > { %4529 = vmatprep.mubr.f32.mxu1 %v8332_v40  ;;  %6008 = vmatpush3.bf16.msra.mxu1 %v6005_v16  ;;  %v3075_v40 = vld [vmem:[#allocation2 + $0x168] sm:$0xff] }
 0x4fc   : > { %6010 = vmatprep.subr.bf16.mxu1 %v6009_v54 }
 0x4fe   : > { %4530 = vmatmul.mubr.f32.gmra.mrb[76].mxu1 %v3071_v42 }
 0x4ff   : > { %4534 = vmatprep.mubr.f32.mxu1 %v8336_v44  ;;  %v3140_v44 = vld [vmem:[#allocation2 + $0x171] sm:$0xff]  ;;  %6012 = vmatpush3.bf16.msra.mxu1 %v6009_v54 }
 0x500   : > { %6014 = vmatprep.subr.bf16.mxu1 %v6013_v55 }
 0x502   : > { %4535 = vmatmul.mubr.f32.gmra.mrb[78].mxu1 %v3072_v62 }
 0x503   : > { %4539 = vmatprep.mubr.f32.mxu1 %v3137_v9  ;;  %6016 = vmatpush3.bf16.msra.mxu1 %v6013_v55  ;;  %v8386_v9 = vld [vmem:[%s8574_s4] ss:$0 sm:$0xff] }
 0x504   : > { %6018 = vmatprep.subr.bf16.mxu1 %v6017_v37 }
 0x506   : > { %4540 = vmatmul.mubr.f32.gmra.mrb[80].mxu1 %v3073_v18 }
 0x507   : > { %4544 = vmatprep.mubr.f32.mxu1 %v3138_v48  ;;  %6020 = vmatpush3.bf16.msra.mxu1 %v6017_v37  ;;  %v8718_v37 = vld [vmem:[#allocation19_spill] sm:$0xff] }
 0x50a   : > { %4545 = vmatmul.mubr.f32.gmra.mrb[82].mxu1 %v3074_v19 }
 0x50b   : > { %4549 = vmatprep.mubr.f32.mxu1 %v3139_v60 }
 0x50e   : > { %4550 = vmatmul.mubr.f32.gmra.mrb[84].mxu1 %v3075_v40 }
 0x50f   : > { %4554 = vmatprep.mubr.f32.mxu1 %v3140_v44 }
 0x512   : > { %4555 = vmatmul.mubr.f32.gmra.mrb[86].mxu1 %v3076_v39 }
 0x513   : > { %4559 = vmatprep.mubr.f32.mxu1 %v3141_v14 }
 0x516   : > { %4560 = vmatmul.mubr.f32.gmra.mrb[88].mxu1 %v8182_v13  ;;  %v4956_v13 = vld [vmem:[#allocation11 + $0x40] sm:$0xff] }
 0x517   : > { %4564 = vmatprep.mubr.f32.mxu1 %v3142_v8  ;;  %v6021_v30 = vpack.c.bf16 %v4957_v43, %v4956_v13  ;;  %v8720_v43 = vld [vmem:[#allocation20_spill] sm:$0xff] }
 0x519   : > { %6022 = vmatprep.subr.bf16.mxu1 %v6021_v30 }
 0x51a   : > { %4565 = vmatmul.mubr.f32.gmra.mrb[90].mxu1 %v8188_v57  ;;  %v4959_v57 = vld [vmem:[#allocation11 + $0x58] sm:$0xff] }
 0x51b   : > { %4569 = vmatprep.mubr.f32.mxu1 %v3143_v31  ;;  %6024 = vmatpush3.bf16.msra.mxu1 %v6021_v30  ;;  %v6025_v5 = vpack.c.bf16 %v4959_v57, %v4958_v23  ;;  %v8721_v30 = vld [vmem:[#allocation22_spill] sm:$0xff] }
 0x51c   : > { %v4885_v23 = vadd.f32 %v8721_v30, %v8720_v43 }
 0x51d   : > { %6026 = vmatprep.subr.bf16.mxu1 %v6025_v5 }
 0x51e   : > { %4570 = vmatmul.mubr.f32.gmra.mrb[92].mxu1 %v6601_v46 }
 0x51f   : > { %4574 = vmatprep.mubr.f32.mxu1 %v3144_v56  ;;  %6028 = vmatpush3.bf16.msra.mxu1 %v6025_v5 }
 0x520   : > { %6030 = vmatprep.subr.bf16.mxu1 %v6029_v11 }
 0x522   : > { %4575 = vmatmul.mubr.f32.gmra.mrb[94].mxu1 %v6601_v46  ;;  %v8719_v46 = vld [vmem:[#allocation21_spill] sm:$0xff] }
 0x523   : > { %6032 = vmatpush3.bf16.msra.mxu1 %v6029_v11  ;;  %v4884_v13 = vadd.f32 %v8719_v46, %v8718_v37 }
 0x524   : > { %6034 = vmatprep.subr.bf16.mxu1 %v6033_v22 }
 0x527   : > { %6036 = vmatpush3.bf16.msra.mxu1 %v6033_v22 }
 0x560   : > { %v8379_v42 = vpop.f32.mrb[94].mxu0 }
 0x561   : > { %v8381_v62 = vpop.f32.mrb[95].mxu0 }
 0x579   : > { %v4421_v18 = vpop.f32.mrb[32].mxu1 }
 0x57a   : > { %v6069_v48 = vadd.f32 %v8386_v9, %v4421_v18  ;;  %v4423_v52 = vpop.f32.mrb[33].mxu1 }
 0x57c   : > { %v4647_v12 = vadd.f32 %v6069_v48, %v8170_v63 }
 0x57d   : > { %v4426_v19 = vpop.f32.mrb[34].mxu1 }
 0x57e   : > { %v6070_v16 = vadd.f32 %v8386_v9, %v4426_v19  ;;  %v4428_v60 = vpop.f32.mrb[35].mxu1 }
 0x580   : > { %v4652_v40 = vadd.f32 %v6070_v16, %v8167_v17 }
 0x581   : > { %v4431_v44 = vpop.f32.mrb[36].mxu1 }
 0x582   : > { %v6071_v39 = vadd.f32 %v8386_v9, %v4431_v44  ;;  %v4433_v14 = vpop.f32.mrb[37].mxu1 }
 0x584   : > { %v4657_v20 = vadd.f32 %v6071_v39, %v8178_v35 }
 0x585   : > { %v4436_v15 = vpop.f32.mrb[38].mxu1 }
 0x586   : > { %v4805_v54 = vadd.f32 %v4657_v20, %v4647_v12  ;;  %v6072_v8 = vadd.f32 %v8386_v9, %v4436_v15  ;;  %v4438_v49 = vpop.f32.mrb[39].mxu1 }
 0x588   : > { %4821 = vst [vmem:[#allocation4] sm:$0xff] %v4805_v54  ;;  %v4662_v63 = vadd.f32 %v6072_v8, %v8175_v27  ;;  %v8722_v54 = vld [vmem:[#allocation23_spill] sm:$0xff]  ;;  %v8723_v8 = vld [vmem:[#allocation25_spill] sm:$0xff] }
 0x589   : > { %v4441_v0 = vpop.f32.mrb[40].mxu1  ;;  %v4886_v49 = vadd.f32 %v8723_v8, %v8722_v54 }
 0x58a   : > { %v4806_v31 = vadd.f32 %v4662_v63, %v4652_v40  ;;  %v6073_v55 = vadd.f32 %v8386_v9, %v4441_v0  ;;  %v4443_v61 = vpop.f32.mrb[41].mxu1  ;;  %v8725_v63 = vld [vmem:[#allocation26_spill] sm:$0xff] }
 0x58c   : > { %4822 = vst [vmem:[#allocation4 + $0x8] sm:$0xff] %v4806_v31  ;;  %v4667_v17 = vadd.f32 %v6073_v55, %v8190_v29 }
 0x58d   : > { %v4446_v1 = vpop.f32.mrb[42].mxu1 }
 0x58e   : > { %v6074_v56 = vadd.f32 %v8386_v9, %v4446_v1  ;;  %v4448_v35 = vpop.f32.mrb[43].mxu1 }
 0x590   : > { %v4672_v27 = vadd.f32 %v6074_v56, %v8185_v21 }
 0x591   : > { %v4451_v57 = vpop.f32.mrb[44].mxu1 }
 0x592   : > { %v6075_v5 = vadd.f32 %v8386_v9, %v4451_v57  ;;  %v4453_v34 = vpop.f32.mrb[45].mxu1 }
 0x593   : > { %v4837_v26 = vld [vmem:[#allocation4] ss:$2 sm:$0xff]  ;;  %v4853_v11 = vld [vmem:[#allocation4 + $0x1] ss:$2 sm:$0xff] }
 0x594   : > { %4900 = vst [vmem:[#allocation4] sm:$0xff] %v4884_v13  ;;  %4901 = vst [vmem:[#allocation4 + $0x8] sm:$0xff] %v4885_v23  ;;  %v4677_v29 = vadd.f32 %v6075_v5, %v8197_v33  ;;  %v8406_v38 = vadd.f32 %v4853_v11, %v4837_v26 }
 0x595   : > { %v4456_v4 = vpop.f32.mrb[46].mxu1 }
 0x596   : > { %v4807_v22 = vadd.f32 %v4677_v29, %v4667_v17  ;;  %v6076_v18 = vadd.f32 %v8386_v9, %v4456_v4  ;;  %v4458_v48 = vpop.f32.mrb[47].mxu1 }
 0x597   : > { %v8727_v48 = vld [vmem:[#allocation29_spill] sm:$0xff] }
 0x598   : > { %4823 = vst [vmem:[#allocation4 + $0x10] sm:$0xff] %v4807_v22  ;;  %v4682_v21 = vadd.f32 %v6076_v18, %v8195_v58  ;;  %v8724_v58 = vld [vmem:[#allocation24_spill] sm:$0xff]  ;;  %v8726_v18 = vld [vmem:[#allocation27_spill] sm:$0xff] }
 0x599   : > { %v4461_v52 = vpop.f32.mrb[48].mxu1  ;;  %v4887_v0 = vadd.f32 %v8725_v63, %v8724_v58 }
 0x59a   : > { %v4808_v12 = vadd.f32 %v4682_v21, %v4672_v27  ;;  %v6077_v19 = vadd.f32 %v8386_v9, %v4461_v52  ;;  %v4463_v16 = vpop.f32.mrb[49].mxu1  ;;  %v4888_v21 = vadd.f32 %v8727_v48, %v8726_v18  ;;  %v8729_v52 = vld [vmem:[#allocation30_spill] sm:$0xff] }
 0x59b   : > { %v4916_v60 = vld [vmem:[#allocation4] ss:$2 sm:$0xff]  ;;  %v4924_v40 = vld [vmem:[#allocation4 + $0x1] ss:$2 sm:$0xff] }
 0x59c   : > { %4824 = vst [vmem:[#allocation4 + $0x18] sm:$0xff] %v4808_v12  ;;  %v4687_v33 = vadd.f32 %v6077_v19, %v8207_v32  ;;  %v4932_v44 = vadd.f32 %v4924_v40, %v4916_v60 }
 0x59d   : > { %v4466_v39 = vpop.f32.mrb[50].mxu1 }
 0x59e   : > { %v6078_v14 = vadd.f32 %v8386_v9, %v4466_v39  ;;  %v4468_v20 = vpop.f32.mrb[51].mxu1  ;;  %v4940_v15 = vmul.f32 0.25, %v4932_v44 }
 0x5a0   : > { %v4692_v31 = vadd.f32 %v6078_v14, %v8204_v59  ;;  %5545 = vmatprep.mubr.f32.mxu1 %v4940_v15 }
 0x5a1   : > { %v4471_v55 = vpop.f32.mrb[52].mxu1 }
 0x5a2   : > { %v6079_v61 = vadd.f32 %v8386_v9, %v4471_v55  ;;  %v4473_v17 = vpop.f32.mrb[53].mxu1 }
 0x5a3   : > { %v4839_v32 = vld [vmem:[#allocation4 + $0x10] ss:$2 sm:$0xff]  ;;  %v4855_v1 = vld [vmem:[#allocation4 + $0x11] ss:$2 sm:$0xff] }
 0x5a4   : > { %4902 = vst [vmem:[#allocation4 + $0x10] sm:$0xff] %v4886_v49  ;;  %4903 = vst [vmem:[#allocation4 + $0x18] sm:$0xff] %v4887_v0  ;;  %v4697_v56 = vadd.f32 %v6079_v61, %v8219_v36  ;;  %v8420_v35 = vadd.f32 %v4855_v1, %v4839_v32 }
 0x5a5   : > { %v4476_v37 = vpop.f32.mrb[54].mxu1 }
 0x5a6   : > { %v4809_v46 = vadd.f32 %v4697_v56, %v4687_v33  ;;  %v6080_v13 = vadd.f32 %v8386_v9, %v4476_v37  ;;  %v4478_v43 = vpop.f32.mrb[55].mxu1  ;;  %v8730_v56 = vld [vmem:[#allocation31_spill] sm:$0xff]  ;;  %v8731_v37 = vld [vmem:[#allocation33_spill] sm:$0xff] }
 0x5a8   : > { %4825 = vst [vmem:[#allocation4 + $0x20] sm:$0xff] %v4809_v46  ;;  %v4702_v59 = vadd.f32 %v6080_v13, %v8216_v24  ;;  %v8728_v24 = vld [vmem:[#allocation28_spill] sm:$0xff]  ;;  %v4890_v46 = vadd.f32 %v8731_v37, %v8730_v56  ;;  %v8733_v13 = vld [vmem:[#allocation34_spill] sm:$0xff] }
 0x5a9   : > { %v4481_v30 = vpop.f32.mrb[56].mxu1  ;;  %v4889_v12 = vadd.f32 %v8729_v52, %v8728_v24 }
 0x5aa   : > { %v4810_v23 = vadd.f32 %v4702_v59, %v4692_v31  ;;  %v6081_v27 = vadd.f32 %v8386_v9, %v4481_v30  ;;  %v4483_v57 = vpop.f32.mrb[57].mxu1 }
 0x5ab   : > { %v4917_v5 = vld [vmem:[#allocation4 + $0x10] ss:$2 sm:$0xff]  ;;  %v4925_v34 = vld [vmem:[#allocation4 + $0x11] ss:$2 sm:$0xff] }
 0x5ac   : > { %4826 = vst [vmem:[#allocation4 + $0x28] sm:$0xff] %v4810_v23  ;;  %v4707_v36 = vadd.f32 %v6081_v27, %v8231_v2  ;;  %v4933_v26 = vadd.f32 %v4925_v34, %v4917_v5 }
 0x5ad   : > { %v4486_v11 = vpop.f32.mrb[58].mxu1 }
 0x5ae   : > { %v6082_v29 = vadd.f32 %v8386_v9, %v4486_v11  ;;  %v4488_v4 = vpop.f32.mrb[59].mxu1  ;;  %v4941_v22 = vmul.f32 0.25, %v4933_v26 }
 0x5b0   : > { %v4712_v19 = vadd.f32 %v6082_v29, %v8228_v53  ;;  %5546 = vmatmul.mubr.f32.vlgmr.msra.gmra.mrb[96].mxu1 %v4941_v22 }
 0x5b1   : > { %v4491_v16 = vpop.f32.mrb[60].mxu1 }
 0x5b2   : > { %v6083_v60 = vadd.f32 %v8386_v9, %v4491_v16  ;;  %v4493_v40 = vpop.f32.mrb[61].mxu1 }
 0x5b3   : > { %v4841_v2 = vld [vmem:[#allocation4 + $0x20] ss:$2 sm:$0xff]  ;;  %v4857_v33 = vld [vmem:[#allocation4 + $0x21] ss:$2 sm:$0xff] }
 0x5b4   : > { %4904 = vst [vmem:[#allocation4 + $0x20] sm:$0xff] %v4888_v21  ;;  %4905 = vst [vmem:[#allocation4 + $0x28] sm:$0xff] %v4889_v12  ;;  %v4717_v44 = vadd.f32 %v6083_v60, %v8243_v7  ;;  %v8434_v39 = vadd.f32 %v4857_v33, %v4841_v2  ;;  %v8734_v40 = vld [vmem:[#allocation35_spill] sm:$0xff]  ;;  %v8735_v2 = vld [vmem:[#allocation37_spill] sm:$0xff] }
 0x5b5   : > { %v4496_v14 = vpop.f32.mrb[62].mxu1  ;;  %v4892_v33 = vadd.f32 %v8735_v2, %v8734_v40 }
 0x5b6   : > { %v4811_v20 = vadd.f32 %v4717_v44, %v4707_v36  ;;  %v6084_v15 = vadd.f32 %v8386_v9, %v4496_v14  ;;  %v4498_v54 = vpop.f32.mrb[63].mxu1  ;;  %v8737_v44 = vld [vmem:[#allocation38_spill] sm:$0xff] }
 0x5b8   : > { %4827 = vst [vmem:[#allocation4 + $0x30] sm:$0xff] %v4811_v20  ;;  %v4722_v53 = vadd.f32 %v6084_v15, %v8240_v41  ;;  %v8732_v41 = vld [vmem:[#allocation32_spill] sm:$0xff] }
 0x5b9   : > { %v4501_v8 = vpop.f32.mrb[64].mxu1  ;;  %v4891_v43 = vadd.f32 %v8733_v13, %v8732_v41 }
 0x5ba   : > { %v4812_v49 = vadd.f32 %v4722_v53, %v4712_v19  ;;  %v6085_v58 = vadd.f32 %v8386_v9, %v4501_v8  ;;  %v4503_v63 = vpop.f32.mrb[65].mxu1 }
 0x5bb   : > { %v4918_v0 = vld [vmem:[#allocation4 + $0x20] ss:$2 sm:$0xff]  ;;  %v4926_v31 = vld [vmem:[#allocation4 + $0x21] ss:$2 sm:$0xff] }
 0x5bc   : > { %4828 = vst [vmem:[#allocation4 + $0x38] sm:$0xff] %v4812_v49  ;;  %v4727_v7 = vadd.f32 %v6085_v58, %v8255_v6  ;;  %v4934_v55 = vadd.f32 %v4926_v31, %v4918_v0 }
 0x5bd   : > { %v4506_v61 = vpop.f32.mrb[66].mxu1 }
 0x5be   : > { %v6086_v17 = vadd.f32 %v8386_v9, %v4506_v61  ;;  %v4508_v32 = vpop.f32.mrb[67].mxu1  ;;  %v4942_v1 = vmul.f32 0.25, %v4934_v55 }
 0x5c0   : > { %v4732_v59 = vadd.f32 %v6086_v17, %v8252_v3  ;;  %5548 = vmatprep.mubr.f32.mxu1 %v4942_v1 }
 0x5c1   : > { %v4511_v30 = vpop.f32.mrb[68].mxu1 }
 0x5c2   : > { %v6087_v23 = vadd.f32 %v8386_v9, %v4511_v30  ;;  %v4513_v27 = vpop.f32.mrb[69].mxu1  ;;  %v8739_v30 = vld [vmem:[#allocation41_spill] sm:$0xff] }
 0x5c3   : > { %v4843_v6 = vld [vmem:[#allocation4 + $0x30] ss:$2 sm:$0xff]  ;;  %v4859_v57 = vld [vmem:[#allocation4 + $0x31] ss:$2 sm:$0xff] }
 0x5c4   : > { %4906 = vst [vmem:[#allocation4 + $0x30] sm:$0xff] %v4890_v46  ;;  %4907 = vst [vmem:[#allocation4 + $0x38] sm:$0xff] %v4891_v43  ;;  %v4737_v5 = vadd.f32 %v6087_v23, %v8267_v47  ;;  %v8448_v34 = vadd.f32 %v4859_v57, %v4843_v6  ;;  %v8741_v27 = vld [vmem:[#allocation42_spill] sm:$0xff]  ;;  %v8742_v57 = vld [vmem:[#allocation51_spill] sm:$0xff] }
 0x5c5   : > { %v4516_v36 = vpop.f32.mrb[70].mxu1 }
 0x5c6   : > { %v4813_v26 = vadd.f32 %v4737_v5, %v4727_v7  ;;  %v6088_v11 = vadd.f32 %v8386_v9, %v4516_v36  ;;  %v4518_v29 = vpop.f32.mrb[71].mxu1 }
 0x5c8   : > { %4829 = vst [vmem:[#allocation4 + $0x40] sm:$0xff] %v4813_v26  ;;  %v4742_v3 = vadd.f32 %v6088_v11, %v8264_v45  ;;  %v8736_v45 = vld [vmem:[#allocation36_spill] sm:$0xff] }
 0x5c9   : > { %v4521_v4 = vpop.f32.mrb[72].mxu1  ;;  %v4893_v14 = vadd.f32 %v8737_v44, %v8736_v45 }
 0x5ca   : > { %v4814_v22 = vadd.f32 %v4742_v3, %v4732_v59  ;;  %v6089_v18 = vadd.f32 %v8386_v9, %v4521_v4  ;;  %v4523_v48 = vpop.f32.mrb[73].mxu1  ;;  %v8738_v59 = vld [vmem:[#allocation39_spill] sm:$0xff]  ;;  %v8743_v3 = vld [vmem:[#allocation57_spill] sm:$0xff] }
 0x5cb   : > { %v4919_v21 = vld [vmem:[#allocation4 + $0x30] ss:$2 sm:$0xff]  ;;  %v4927_v24 = vld [vmem:[#allocation4 + $0x31] ss:$2 sm:$0xff]  ;;  %v4894_v23 = vadd.f32 %v8739_v30, %v8738_v59 }
 0x5cc   : > { %4830 = vst [vmem:[#allocation4 + $0x48] sm:$0xff] %v4814_v22  ;;  %v4747_v47 = vadd.f32 %v6089_v18, %v8279_v25  ;;  %v4935_v52 = vadd.f32 %v4927_v24, %v4919_v21 }
 0x5cd   : > { %v4526_v12 = vpop.f32.mrb[74].mxu1 }
 0x5ce   : > { %v6090_v19 = vadd.f32 %v8386_v9, %v4526_v12  ;;  %v4528_v16 = vpop.f32.mrb[75].mxu1  ;;  %v4943_v60 = vmul.f32 0.25, %v4935_v52 }
 0x5d0   : > { %v4752_v20 = vadd.f32 %v6090_v19, %v8276_v28  ;;  %5549 = vmatmul.mubr.f32.gmra.mrb[98].mxu1 %v4943_v60 }
 0x5d1   : > { %v4531_v15 = vpop.f32.mrb[76].mxu1 }
 0x5d2   : > { %v6091_v54 = vadd.f32 %v8386_v9, %v4531_v15  ;;  %v4533_v53 = vpop.f32.mrb[77].mxu1 }
 0x5d3   : > { %v4845_v25 = vld [vmem:[#allocation4 + $0x40] ss:$2 sm:$0xff]  ;;  %v4861_v8 = vld [vmem:[#allocation4 + $0x41] ss:$2 sm:$0xff] }
 0x5d4   : > { %4908 = vst [vmem:[#allocation4 + $0x40] sm:$0xff] %v4892_v33  ;;  %4909 = vst [vmem:[#allocation4 + $0x48] sm:$0xff] %v4893_v14  ;;  %v4757_v49 = vadd.f32 %v6091_v54, %v8290_v51  ;;  %v8462_v58 = vadd.f32 %v4861_v8, %v4845_v25  ;;  %v8745_v33 = vld [vmem:[#allocation58_spill] sm:$0xff]  ;;  %v8746_v53 = vld [vmem:[#allocation43_spill] sm:$0xff] }
 0x5d5   : > { %v4536_v63 = vpop.f32.mrb[78].mxu1  ;;  %v8747_v25 = vld [vmem:[#allocation45_spill] sm:$0xff] }
 0x5d6   : > { %v4815_v0 = vadd.f32 %v4757_v49, %v4747_v47  ;;  %v6092_v31 = vadd.f32 %v8386_v9, %v4536_v63  ;;  %v4538_v7 = vpop.f32.mrb[79].mxu1  ;;  %v8744_v47 = vld [vmem:[#allocation54_spill] sm:$0xff]  ;;  %v4896_v8 = vadd.f32 %v8747_v25, %v8746_v53  ;;  %v8748_v49 = vld [vmem:[#allocation44_spill] sm:$0xff] }
 0x5d7   : > { %v8749_v63 = vld [vmem:[#allocation46_spill] sm:$0xff] }
 0x5d8   : > { %4831 = vst [vmem:[#allocation4 + $0x50] sm:$0xff] %v4815_v0  ;;  %v4762_v28 = vadd.f32 %v6092_v31, %v8287_v50  ;;  %v8740_v50 = vld [vmem:[#allocation40_spill] sm:$0xff]  ;;  %v4897_v0 = vadd.f32 %v8749_v63, %v8748_v49  ;;  %v8750_v31 = vld [vmem:[#allocation62_spill] sm:$0xff] }
 0x5d9   : > { %v4541_v55 = vpop.f32.mrb[80].mxu1  ;;  %v4895_v6 = vadd.f32 %v8741_v27, %v8740_v50  ;;  %v8751_v27 = vld [vmem:[#allocation47_spill] sm:$0xff] }
 0x5da   : > { %v4816_v61 = vadd.f32 %v4762_v28, %v4752_v20  ;;  %v6093_v17 = vadd.f32 %v8386_v9, %v4541_v55  ;;  %v4543_v32 = vpop.f32.mrb[81].mxu1 }
 0x5db   : > { %v4920_v1 = vld [vmem:[#allocation4 + $0x40] ss:$2 sm:$0xff]  ;;  %v4928_v56 = vld [vmem:[#allocation4 + $0x41] ss:$2 sm:$0xff] }
 0x5dc   : > { %4832 = vst [vmem:[#allocation4 + $0x58] sm:$0xff] %v4816_v61  ;;  %v4767_v51 = vadd.f32 %v6093_v17, %v8301_v10  ;;  %v4936_v37 = vadd.f32 %v4928_v56, %v4920_v1 }
 0x5dd   : > { %v4546_v46 = vpop.f32.mrb[82].mxu1 }
 0x5de   : > { %v6094_v41 = vadd.f32 %v8386_v9, %v4546_v46  ;;  %v4548_v13 = vpop.f32.mrb[83].mxu1  ;;  %v4944_v43 = vmul.f32 0.25, %v4936_v37 }
 0x5e0   : > { %v4772_v5 = vadd.f32 %v6094_v41, %v8742_v57  ;;  %5551 = vmatprep.mubr.f32.mxu1 %v4944_v43  ;;  %v8753_v57 = vld [vmem:[#allocation48_spill] sm:$0xff] }
 0x5e1   : > { %v4551_v36 = vpop.f32.mrb[84].mxu1 }
 0x5e2   : > { %v6095_v26 = vadd.f32 %v8386_v9, %v4551_v36  ;;  %v4553_v11 = vpop.f32.mrb[85].mxu1 }
 0x5e3   : > { %v4847_v10 = vld [vmem:[#allocation4 + $0x50] ss:$2 sm:$0xff]  ;;  %v4863_v29 = vld [vmem:[#allocation4 + $0x51] ss:$2 sm:$0xff] }
 0x5e4   : > { %4910 = vst [vmem:[#allocation4 + $0x50] sm:$0xff] %v4894_v23  ;;  %4911 = vst [vmem:[#allocation4 + $0x58] sm:$0xff] %v4895_v6  ;;  %v4777_v4 = vadd.f32 %v6095_v26, %v8743_v3  ;;  %v8476_v22 = vadd.f32 %v4863_v29, %v4847_v10  ;;  %v8752_v6 = vld [vmem:[#allocation49_spill] sm:$0xff] }
 0x5e5   : > { %v4556_v18 = vpop.f32.mrb[86].mxu1 }
 0x5e6   : > { %v4817_v48 = vadd.f32 %v4777_v4, %v4767_v51  ;;  %v6096_v21 = vadd.f32 %v8386_v9, %v4556_v18  ;;  %v4558_v24 = vpop.f32.mrb[87].mxu1  ;;  %v5225_v4 = vld [vmem:[%s8576_s6] ss:$0 sm:$0xff] }
 0x5e8   : > { %4833 = vst [vmem:[#allocation4 + $0x60] sm:$0xff] %v4817_v48  ;;  %v4782_v52 = vadd.f32 %v6096_v21, %v8744_v47  ;;  %v4877_v48 = vmul.f32 0.25, %v8420_v35  ;;  %v4876_v47 = vmul.f32 0.25, %v8406_v38  ;;  %v4878_v38 = vmul.f32 0.25, %v8434_v39 }
 0x5e9   : > { %v4561_v12 = vpop.f32.mrb[88].mxu1 }
 0x5ea   : > { %v4818_v19 = vadd.f32 %v4782_v52, %v4772_v5  ;;  %v6097_v16 = vadd.f32 %v8386_v9, %v4561_v12  ;;  %v4563_v60 = vpop.f32.mrb[89].mxu1  ;;  %v8754_v5 = vld [vmem:[#allocation50_spill] sm:$0xff] }
 0x5eb   : > { %v4921_v40 = vld [vmem:[#allocation4 + $0x50] ss:$2 sm:$0xff]  ;;  %v4929_v2 = vld [vmem:[#allocation4 + $0x51] ss:$2 sm:$0xff]  ;;  %v4899_v36 = vadd.f32 %v8754_v5, %v8753_v57  ;;  %v4879_v60 = vmul.f32 0.25, %v8448_v34  ;;  %v4880_v34 = vmul.f32 0.25, %v8462_v58 }
 0x5ec   : > { %4834 = vst [vmem:[#allocation4 + $0x68] sm:$0xff] %v4818_v19  ;;  %v4787_v45 = vadd.f32 %v6097_v16, %v8745_v33  ;;  %v4937_v44 = vadd.f32 %v4929_v2, %v4921_v40 }
 0x5ed   : > { %v4566_v14 = vpop.f32.mrb[90].mxu1 }
 0x5ee   : > { %v6098_v20 = vadd.f32 %v8386_v9, %v4566_v14  ;;  %v4568_v15 = vpop.f32.mrb[91].mxu1  ;;  %v4945_v54 = vmul.f32 0.25, %v4937_v44  ;;  %v4881_v14 = vmul.f32 0.25, %v8476_v22 }
 0x5f0   : > { %v4792_v7 = vadd.f32 %v6098_v20, %v8750_v31  ;;  %5552 = vmatmul.mubr.f32.gmra.mrb[100].mxu1 %v4945_v54 }
 0x5f1   : > { %v4571_v28 = vpop.f32.mrb[92].mxu1 }
 0x5f2   : > { %v6099_v55 = vadd.f32 %v8386_v9, %v4571_v28  ;;  %v4573_v61 = vpop.f32.mrb[93].mxu1 }
 0x5f3   : > { %v4849_v17 = vld [vmem:[#allocation4 + $0x60] ss:$2 sm:$0xff]  ;;  %v4865_v32 = vld [vmem:[#allocation4 + $0x61] ss:$2 sm:$0xff] }
 0x5f4   : > { %4912 = vst [vmem:[#allocation4 + $0x60] sm:$0xff] %v4896_v8  ;;  %4913 = vst [vmem:[#allocation4 + $0x68] sm:$0xff] %v4897_v0  ;;  %v4797_v1 = vadd.f32 %v6099_v55, %v8381_v62  ;;  %v8490_v56 = vadd.f32 %v4865_v32, %v4849_v17  ;;  %v4898_v62 = vadd.f32 %v8752_v6, %v8751_v27 }
 0x5f5   : > { %v4576_v51 = vpop.f32.mrb[94].mxu1 }
 0x5f6   : > { %v4819_v37 = vadd.f32 %v4797_v1, %v4787_v45  ;;  %v6100_v46 = vadd.f32 %v8386_v9, %v4576_v51  ;;  %v4578_v41 = vpop.f32.mrb[95].mxu1  ;;  %v4882_v58 = vmul.f32 0.25, %v8490_v56 }
 0x5f8   : > { %4835 = vst [vmem:[#allocation4 + $0x70] sm:$0xff] %v4819_v37  ;;  %v4802_v13 = vadd.f32 %v6100_v46, %v8379_v42 }
 0x5fa   : > { %v4820_v43 = vadd.f32 %v4802_v13, %v4792_v7 }
 0x5fb   : > { %v4922_v59 = vld [vmem:[#allocation4 + $0x60] ss:$2 sm:$0xff]  ;;  %v4930_v30 = vld [vmem:[#allocation4 + $0x61] ss:$2 sm:$0xff] }
 0x5fc   : > { %4836 = vst [vmem:[#allocation4 + $0x78] sm:$0xff] %v4820_v43  ;;  %v4938_v23 = vadd.f32 %v4930_v30, %v4922_v59 }
 0x5fe   : > { %v4946_v50 = vmul.f32 0.25, %v4938_v23 }
 0x600   : > { %5554 = vmatprep.mubr.f32.mxu1 %v4946_v50 }
 0x603   : > { %v4851_v26 = vld [vmem:[#allocation4 + $0x70] ss:$2 sm:$0xff]  ;;  %v4867_v9 = vld [vmem:[#allocation4 + $0x71] ss:$2 sm:$0xff] }
 0x604   : > { %4914 = vst [vmem:[#allocation4 + $0x70] sm:$0xff] %v4898_v62  ;;  %4915 = vst [vmem:[#allocation4 + $0x78] sm:$0xff] %v4899_v36  ;;  %v4875_v11 = vadd.f32 %v4867_v9, %v4851_v26 }
 0x606   : > { %v4883_v8 = vmul.f32 0.25, %v4875_v11 }
 0x60b   : > { %v4923_v42 = vld [vmem:[#allocation4 + $0x70] ss:$2 sm:$0xff]  ;;  %v4931_v10 = vld [vmem:[#allocation4 + $0x71] ss:$2 sm:$0xff] }
 0x60c   : > { %v4939_v29 = vadd.f32 %v4931_v10, %v4923_v42 }
 0x60e   : > { %v4947_v3 = vmul.f32 0.25, %v4939_v29 }
 0x610   : > { %5555 = vmatmul.mubr.f32.gmra.mrb[102].mxu1 %v4947_v3 }
 0x683   : > { %v5547_v18 = vpop.f32.mrb[96].mxu1 }
 0x684   : > { %v5043_v21 = vadd.f32 %v5547_v18, %v5225_v4  ;;  %v5037_v24 = vpop.f32.mrb[97].mxu1 }
 0x685   : > { %v5038_v52 = vadd.f32 %v5225_v4, %v5037_v24 }
 0x686   : > { %v5077_v12 = vadd.f32 %v5043_v21, %v4877_v48 }
 0x687   : > { %v5076_v19 = vadd.f32 %v5038_v52, %v4876_v47 }
 0x688   : > { %5085 = vst [vmem:[%s8504_s12 + $0x8] sm:$0xff] %v5077_v12 }
 0x689   : > { %5084 = vst [vmem:[%s8504_s12] sm:$0xff] %v5076_v19 }
 0x6a3   : > { %v5550_v16 = vpop.f32.mrb[98].mxu1 }
 0x6a4   : > { %v5053_v40 = vadd.f32 %v5550_v16, %v5225_v4  ;;  %v5047_v35 = vpop.f32.mrb[99].mxu1 }
 0x6a5   : > { %v5048_v2 = vadd.f32 %v5225_v4, %v5047_v35 }
 0x6a6   : > { %v5079_v33 = vadd.f32 %v5053_v40, %v4879_v60 }
 0x6a7   : > { %v5078_v45 = vadd.f32 %v5048_v2, %v4878_v38 }
 0x6a8   : > { %5087 = vst [vmem:[%s8504_s12 + $0x18] sm:$0xff] %v5079_v33 }
 0x6a9   : > { %5086 = vst [vmem:[%s8504_s12 + $0x10] sm:$0xff] %v5078_v45 }
 0x6c3   : > { %v5553_v44 = vpop.f32.mrb[100].mxu1 }
 0x6c4   : > { %v5063_v20 = vadd.f32 %v5553_v44, %v5225_v4  ;;  %v5057_v15 = vpop.f32.mrb[101].mxu1 }
 0x6c5   : > { %v5058_v54 = vadd.f32 %v5225_v4, %v5057_v15 }
 0x6c6   : > { %v5081_v53 = vadd.f32 %v5063_v20, %v4881_v14 }
 0x6c7   : > { %v5080_v25 = vadd.f32 %v5058_v54, %v4880_v34 }
 0x6c8   : > { %5089 = vst [vmem:[%s8504_s12 + $0x28] sm:$0xff] %v5081_v53 }
 0x6c9   : > { %5088 = vst [vmem:[%s8504_s12 + $0x20] sm:$0xff] %v5080_v25 }
 0x6e3   : > { %v5556_v39 = vpop.f32.mrb[102].mxu1 }
 0x6e4   : > { %v5073_v49 = vadd.f32 %v5556_v39, %v5225_v4  ;;  %v5067_v63 = vpop.f32.mrb[103].mxu1 }
 0x6e5   : > { %v5068_v22 = vadd.f32 %v5225_v4, %v5067_v63 }
 0x6e6   : > { %v5083_v0 = vadd.f32 %v5073_v49, %v4883_v8 }
 0x6e7   : > { %v5082_v31 = vadd.f32 %v5068_v22, %v4882_v58 }
 0x6e8   : > { %5091 = vst [vmem:[%s8504_s12 + $0x38] sm:$0xff] %v5083_v0 }
 0x6e9   : > { %5090 = vst [vmem:[%s8504_s12 + $0x30] sm:$0xff] %v5082_v31 }
 0x6ea   : > { %6729 = shalt.err (!%p6726_p4)
}
 0x6eb   : > { %s6730_s15 = scalar_lea.hbm %s8524_s11, 1024  ;;  %s6734_s8 = scalar_lea.hbm %s8577_s7, 2048 }
 0x6ec   : > { %p6731_p9 = scmp.ne.s32.totalorder %s8524_s11, %s6730_s15  ;;  %p6735_p8 = scmp.lt.u32.totalorder %s8524_s11, %s8577_s7 }
 0x6ed   : > { %p6736_p13 = scmp.lt.u32.totalorder %s6734_s8, %s6730_s15  ;;  %p6738_p10 = scmp.lt.u32.totalorder %s6730_s15, %s8524_s11 }
 0x6ee   : > { %p6732_p0 = pnand %p6731_p9, %p6997_p5 }
 0x6ef   : > { %p6737_p6 = por %p6736_p13, %p6735_p8 }
 0x6f0   : > { %p6733_p11 = pneg %p6732_p0 }
 0x6f1   : > { %p6739_p3 = por %p6738_p10, %p6737_p6 }
 0x6f3   : > { %p6740_p7 = pnand %p6739_p3, %p6733_p11 }
 0x6f5   : > { %6743 = shalt.err (!%p6740_p7)
}
 0x6f6   : > { %s6801_s29 = smov 128   ;;  %s6802_s23 = smov 8  }
 0x6f7   : > { %6499 = dma.vmem_to_hbm [thread:$0]  (%p6997_p5), %s8518_s21, 1024, %s8524_s11, %s5093_s28, %s6801_s29, %s6801_s29, %s6802_s23  }
 0x6f8 PF: > { %s8755_s20 = sld [smem:[#allocation18_spill]]  ;;  %s5121_s30 = sand.u32 1, %s6778_s24  }
 0x6f9   : > { %p8757_p1 = scmp.ge.s32.totalorder %s6790_s27, 2  ;;  %s5122_s9 = scalar_lea.sflag [#allocation7], %s5121_s30 }
 0x6fe   : > { %p8756_p12 = scmp.ne.s32.totalorder %s8755_s20, 0 }
 0x700   : > { %p6516_p2 = pnand %p8757_p1, %p8756_p12 }
 0x702   : > { %6773 = dma.done.wait (!%p6516_p2), %s5122_s9, 1024  }
 0x703   : > { %6775 = vsyncadd (!%p6516_p2), %s5122_s9, 4294966272  ;;  %p22_p4 = scmp.ge.s32.totalorder %s6983_s22, 4   ;;  %s8758_s24 = smov %s6782_s25 }
 0x704   : > { %s8759_s25 = smov %s6786_s26  ;;  %s8760_s26 = smov %s6993_s18 }
 0x705   : > { %s8761_s27 = smov %s6983_s22  ;;  %24 = sbr.rel (!%p22_p4) target bundleno = 7 (0x7), region = 122 }
 0x70c   :  { %5127 = vsyncpa [#allocation6], 1 }
 0x70d   :  { %5129 = vsyncpa [#allocation6 + $0x1], 1 }
 0x70e   :  { %5130 = vsyncpa [#allocation9], 1 }
 0x70f   :  { %5131 = vsyncpa [#allocation12], 1 }
 0x710   :  { %5132 = vsyncpa [#allocation7], 1 }
 0x711   :  { %5134 = vsyncpa [#allocation7 + $0x1], 1 }

</bundles_post_ra>
